<compile_context>
chip_gen: v6e
topology: v6e:2x2x1
jax: 0.10.0
libtpu: 0.0.40
codegen_flags: <defaults>
</compile_context>

<pallas_src>
import functools

import jax
import jax.numpy as jnp
from jax.experimental import pallas as pl
from jax.experimental.pallas import tpu as pltpu


# ---------------------------------------------------------------------------
# Fused kernel: Router (mean -> MLP -> sigmoid) + global similarity vector
# ---------------------------------------------------------------------------
def _glsa_fused_kernel(x_ref, i0_ref,
                       wt_ref, bt_ref, wi_ref, bi_ref,
                       wg_ref, bg_ref, w2_ref, b2_ref,
                       wr1_ref, br1_ref, wr2_ref, br2_ref,
                       sim_ref, prob_ref, *, inv_s):
    x = x_ref[...].astype(jnp.float32)                 # (1, S, E) full text row

    # ---- Router: mean over seq -> Linear -> ReLU -> Linear -> sigmoid ----
    mean = jnp.sum(x, axis=1) * inv_s                  # (1, E)
    h = jnp.maximum(
        jnp.dot(mean, wr1_ref[...], preferred_element_type=jnp.float32) + br1_ref[...],
        0.0)
    logits = jnp.dot(h, wr2_ref[...], preferred_element_type=jnp.float32) + br2_ref[...]
    prob_ref[...] = jax.nn.sigmoid(logits)[None].astype(prob_ref.dtype)

    # ---- Global similarity: BertPoolers on CLS tokens -> (diff)^2 -> fc -> l2norm -> fc ----
    wdt = wt_ref.dtype                                  # bf16 weights, f32 accumulation
    t0 = x[:, 0, :]                                     # text CLS  (1, E)
    i0 = i0_ref[...][:, 0, :].astype(jnp.float32)       # image CLS (1, E)
    t_cls = jnp.tanh(jnp.dot(t0.astype(wdt), wt_ref[...],
                             preferred_element_type=jnp.float32) + bt_ref[...])
    i_cls = jnp.tanh(jnp.dot(i0.astype(wdt), wi_ref[...],
                             preferred_element_type=jnp.float32) + bi_ref[...])
    g = (t_cls - i_cls) ** 2
    g = jnp.dot(g.astype(wdt), wg_ref[...],
                preferred_element_type=jnp.float32) + bg_ref[...]          # fc_sim_tranglo
    g = g / (jnp.sqrt(jnp.sum(g * g, axis=-1, keepdims=True)) + 1e-8)      # l2norm
    g = jnp.dot(g.astype(wdt), w2_ref[...],
                preferred_element_type=jnp.float32) + b2_ref[...]          # fc_2
    sim_ref[...] = g[None].astype(sim_ref.dtype)


def global_local_alignment_cell(text, image, params):
    """text: (B, S_t, E); image: (B, S_i, E). Returns (sim_emb (B, S_t, E), path_prob (B, P))."""
    B, S, E = text.shape
    H = params["w_r1"].shape[1]
    P = params["w_r2"].shape[1]

    wdt = jnp.bfloat16
    image_cls = image[:, :1, :]       # (B, 1, E): only the CLS row ever leaves HBM

    kernel = functools.partial(_glsa_fused_kernel, inv_s=1.0 / float(S))
    const = lambda b: (0, 0)

    itemsize = text.dtype.itemsize
    flops = B * (S * E + 2 * (E * H + H * P) + 4 * 2 * E * E + 12 * E)
    bytes_accessed = (itemsize * B * (S + 1) * E           # text rows + image CLS rows
                      + 2 * 4 * E * E                       # bf16 E x E weights
                      + 4 * (E * H + H * P + 4 * E + H + P)  # router weights + biases
                      + 4 * B * (E + P))                     # outputs

    sim_vec, path_prob = pl.pallas_call(
        kernel,
        out_shape=(jax.ShapeDtypeStruct((B, 1, E), jnp.float32),
                   jax.ShapeDtypeStruct((B, 1, P), jnp.float32)),
        grid_spec=pltpu.PrefetchScalarGridSpec(
            num_scalar_prefetch=0,
            grid=(B,),
            in_specs=[
                pl.BlockSpec((1, S, E), lambda b: (b, 0, 0)),   # full-seq text row (no padding)
                pl.BlockSpec((1, 1, E), lambda b: (b, 0, 0)),   # image CLS row
                pl.BlockSpec((E, E), const), pl.BlockSpec((1, E), const),   # text_cls_pool
                pl.BlockSpec((E, E), const), pl.BlockSpec((1, E), const),   # image_cls_pool
                pl.BlockSpec((E, E), const), pl.BlockSpec((1, E), const),   # fc_sim_tranglo
                pl.BlockSpec((E, E), const), pl.BlockSpec((1, E), const),   # fc_2
                pl.BlockSpec((E, H), const), pl.BlockSpec((1, H), const),   # Router fc1
                pl.BlockSpec((H, P), const), pl.BlockSpec((1, P), const),   # Router fc2
            ],
            out_specs=(
                pl.BlockSpec((1, 1, E), lambda b: (b, 0, 0)),   # global sim vector
                pl.BlockSpec((1, 1, P), lambda b: (b, 0, 0)),   # path_prob
            ),
        ),
        compiler_params=pltpu.CompilerParams(
            dimension_semantics=("parallel",),
            vmem_limit_bytes=32 * 1024 * 1024),
        cost_estimate=pl.CostEstimate(flops=int(flops),
                                      transcendentals=int(B * (2 * E + P)),
                                      bytes_accessed=int(bytes_accessed)),
    )(text, image_cls,
      params["w_tpool"].astype(wdt), params["b_tpool"],
      params["w_ipool"].astype(wdt), params["b_ipool"],
      params["w_glo"].astype(wdt), params["b_glo"],
      params["w_fc2"].astype(wdt), params["b_fc2"],
      params["w_r1"], params["b_r1"], params["w_r2"], params["b_r2"])

    # PyTorch `expand` is a view; keep the broadcast outside the kernel so XLA can fuse it into
    # the consumer instead of paying a (B, S, E) HBM store inside the kernel.
    sim_emb = jnp.broadcast_to(sim_vec, (B, S, E))
    return sim_emb, path_prob[:, 0, :]


# ---------------------------------------------------------------------------
# Pure-JAX reference (f32, HIGHEST precision)
# ---------------------------------------------------------------------------
def _reference(text, image, p):
    hi = jax.lax.Precision.HIGHEST
    mean = jnp.mean(text, axis=1)
    h = jnp.maximum(jnp.dot(mean, p["w_r1"], precision=hi) + p["b_r1"], 0.0)
    path_prob = jax.nn.sigmoid(jnp.dot(h, p["w_r2"], precision=hi) + p["b_r2"])

    t_cls = jnp.tanh(jnp.dot(text[:, 0, :], p["w_tpool"], precision=hi) + p["b_tpool"])
    i_cls = jnp.tanh(jnp.dot(image[:, 0, :], p["w_ipool"], precision=hi) + p["b_ipool"])
    g = (t_cls - i_cls) ** 2
    g = jnp.dot(g, p["w_glo"], precision=hi) + p["b_glo"]
    g = g / (jnp.sqrt(jnp.sum(g * g, axis=-1, keepdims=True)) + 1e-8)
    g = jnp.dot(g, p["w_fc2"], precision=hi) + p["b_fc2"]
    sim_emb = jnp.broadcast_to(g[:, None, :], (text.shape[0], text.shape[1], g.shape[-1]))
    return sim_emb, path_prob


if __name__ == "__main__":
    # Small shapes consistent with the module: hidden/embed size 768 is hard-coded by the
    # nn.Linear(768, 768) layers; batch=2, text seq=8, image tokens=10, hid_router=128,
    # num_out_path=4.
    B, S_TXT, S_IMG, E, H, P = 2, 8, 10, 768, 128, 4

    key = jax.random.PRNGKey(0)
    keys = jax.random.split(key, 16)
    text = jax.random.normal(keys[0], (B, S_TXT, E), dtype=jnp.float32)
    image = jax.random.normal(keys[1], (B, S_IMG, E), dtype=jnp.float32)

    def _linear(kw, kb, fan_in, fan_out, bias_fill=None):
        w = jax.random.normal(kw, (fan_in, fan_out), dtype=jnp.float32) / jnp.sqrt(fan_in)
        if bias_fill is None:
            b = jax.random.normal(kb, (1, fan_out), dtype=jnp.float32) * 0.01
        else:
            b = jnp.full((1, fan_out), bias_fill, dtype=jnp.float32)
        return w, b

    params = {}
    params["w_r1"], params["b_r1"] = _linear(keys[2], keys[3], E, H)
    params["w_r2"], params["b_r2"] = _linear(keys[4], keys[5], H, P, bias_fill=1.5)  # Router.init_weights
    params["w_tpool"], params["b_tpool"] = _linear(keys[6], keys[7], E, E)           # text_cls_pool
    params["w_ipool"], params["b_ipool"] = _linear(keys[8], keys[9], E, E)           # image_cls_pool
    params["w_glo"], params["b_glo"] = _linear(keys[10], keys[11], E, E)             # fc_sim_tranglo
    params["w_fc2"], params["b_fc2"] = _linear(keys[12], keys[13], E, E)             # fc_2

    sim_emb, path_prob = global_local_alignment_cell(text, image, params)
    jax.block_until_ready((sim_emb, path_prob))

    ref_emb, ref_prob = _reference(text, image, params)
    assert sim_emb.shape == (B, S_TXT, E) and path_prob.shape == (B, P)
    # bf16 weights / default-precision MXU in the kernel vs f32-HIGHEST reference -> loose tolerance.
    assert jnp.allclose(sim_emb, ref_emb, atol=1e-2, rtol=2e-2), float(
        jnp.max(jnp.abs(sim_emb - ref_emb)))
    assert jnp.allclose(path_prob, ref_prob, atol=5e-3, rtol=5e-3), float(
        jnp.max(jnp.abs(path_prob - ref_prob)))

    print("KERNEL_OK")
</pallas_src>

<mosaic_0001>
module attributes {stable_mosaic.version = 11 : i64} {
  func.func @_glsa_fused_kernel(%arg0: i32, %arg1: memref<1x8x768xf32, #tpu.memory_space<vmem>>, %arg2: memref<1x1x768xf32, #tpu.memory_space<vmem>>, %arg3: memref<768x768xbf16, #tpu.memory_space<vmem>>, %arg4: memref<1x768xf32, #tpu.memory_space<vmem>>, %arg5: memref<768x768xbf16, #tpu.memory_space<vmem>>, %arg6: memref<1x768xf32, #tpu.memory_space<vmem>>, %arg7: memref<768x768xbf16, #tpu.memory_space<vmem>>, %arg8: memref<1x768xf32, #tpu.memory_space<vmem>>, %arg9: memref<768x768xbf16, #tpu.memory_space<vmem>>, %arg10: memref<1x768xf32, #tpu.memory_space<vmem>>, %arg11: memref<768x128xf32, #tpu.memory_space<vmem>>, %arg12: memref<1x128xf32, #tpu.memory_space<vmem>>, %arg13: memref<128x4xf32, #tpu.memory_space<vmem>>, %arg14: memref<1x4xf32, #tpu.memory_space<vmem>>, %arg15: memref<1x1x768xf32, #tpu.memory_space<vmem>>, %arg16: memref<1x1x4xf32, #tpu.memory_space<vmem>>) attributes {dimension_semantics = [#tpu.dimension_semantics<parallel>], iteration_bounds = array<i64: 2>, scalar_prefetch = 0 : i64, scratch_operands = 0 : i64, tpu.core_type = #tpu.core_type<tc>, window_params = [{transform_indices = @transform_0, window_bounds = array<i64: 1, 8, 768>}, {transform_indices = @transform_1, window_bounds = array<i64: 1, 1, 768>}, {pipeline_mode = #tpu.pipeline_mode<synchronous>, transform_indices = @transform_2, window_bounds = array<i64: 768, 768>}, {pipeline_mode = #tpu.pipeline_mode<synchronous>, transform_indices = @transform_3, window_bounds = array<i64: 1, 768>}, {pipeline_mode = #tpu.pipeline_mode<synchronous>, transform_indices = @transform_4, window_bounds = array<i64: 768, 768>}, {pipeline_mode = #tpu.pipeline_mode<synchronous>, transform_indices = @transform_5, window_bounds = array<i64: 1, 768>}, {pipeline_mode = #tpu.pipeline_mode<synchronous>, transform_indices = @transform_6, window_bounds = array<i64: 768, 768>}, {pipeline_mode = #tpu.pipeline_mode<synchronous>, transform_indices = @transform_7, window_bounds = array<i64: 1, 768>}, {pipeline_mode = #tpu.pipeline_mode<synchronous>, transform_indices = @transform_8, window_bounds = array<i64: 768, 768>}, {pipeline_mode = #tpu.pipeline_mode<synchronous>, transform_indices = @transform_9, window_bounds = array<i64: 1, 768>}, {pipeline_mode = #tpu.pipeline_mode<synchronous>, transform_indices = @transform_10, window_bounds = array<i64: 768, 128>}, {pipeline_mode = #tpu.pipeline_mode<synchronous>, transform_indices = @transform_11, window_bounds = array<i64: 1, 128>}, {pipeline_mode = #tpu.pipeline_mode<synchronous>, transform_indices = @transform_12, window_bounds = array<i64: 128, 4>}, {pipeline_mode = #tpu.pipeline_mode<synchronous>, transform_indices = @transform_13, window_bounds = array<i64: 1, 4>}, {transform_indices = @transform_14, window_bounds = array<i64: 1, 1, 768>}, {transform_indices = @transform_15, window_bounds = array<i64: 1, 1, 4>}]} {
    %c0 = arith.constant 0 : index
    %c0_0 = arith.constant 0 : index
    %c0_1 = arith.constant 0 : index
    %0 = vector.load %arg1[%c0, %c0_0, %c0_1] : memref<1x8x768xf32, #tpu.memory_space<vmem>>, vector<1x8x768xf32>
    %cst = arith.constant dense<0.000000e+00> : vector<1x768xf32>
    %1 = vector.multi_reduction <add>, %0, %cst [1] : vector<1x8x768xf32> to vector<1x768xf32>
    %cst_2 = arith.constant 1.250000e-01 : f32
    %2 = vector.broadcast %cst_2 : f32 to vector<1x768xf32>
    %3 = arith.mulf %1, %2 : vector<1x768xf32>
    %c0_3 = arith.constant 0 : index
    %c0_4 = arith.constant 0 : index
    %4 = vector.load %arg11[%c0_3, %c0_4] : memref<768x128xf32, #tpu.memory_space<vmem>>, vector<768x128xf32>
    %cst_5 = arith.constant dense<0.000000e+00> : vector<1x128xf32>
    %5 = tpu.matmul %3, %4, %cst_5 {dimension_numbers = #tpu.dot_dimension_numbers<[1], [0], [0], [1], [0, 0, 1, 1], [], []>} : vector<1x768xf32>, vector<768x128xf32>, vector<1x128xf32> -> vector<1x128xf32>
    %c0_6 = arith.constant 0 : index
    %c0_7 = arith.constant 0 : index
    %6 = vector.load %arg12[%c0_6, %c0_7] : memref<1x128xf32, #tpu.memory_space<vmem>>, vector<1x128xf32>
    %7 = arith.addf %5, %6 : vector<1x128xf32>
    %cst_8 = arith.constant 0.000000e+00 : f32
    %8 = vector.broadcast %cst_8 : f32 to vector<1x128xf32>
    %9 = arith.maximumf %7, %8 : vector<1x128xf32>
    %c0_9 = arith.constant 0 : index
    %c0_10 = arith.constant 0 : index
    %10 = vector.load %arg13[%c0_9, %c0_10] : memref<128x4xf32, #tpu.memory_space<vmem>>, vector<128x4xf32>
    %cst_11 = arith.constant dense<0.000000e+00> : vector<1x4xf32>
    %11 = tpu.matmul %9, %10, %cst_11 {dimension_numbers = #tpu.dot_dimension_numbers<[1], [0], [0], [1], [0, 0, 1, 1], [], []>} : vector<1x128xf32>, vector<128x4xf32>, vector<1x4xf32> -> vector<1x4xf32>
    %c0_12 = arith.constant 0 : index
    %c0_13 = arith.constant 0 : index
    %12 = vector.load %arg14[%c0_12, %c0_13] : memref<1x4xf32, #tpu.memory_space<vmem>>, vector<1x4xf32>
    %13 = arith.addf %11, %12 : vector<1x4xf32>
    %14 = arith.negf %13 : vector<1x4xf32>
    %15 = math.exp %14 : vector<1x4xf32>
    %cst_14 = arith.constant 1.000000e+00 : f32
    %16 = vector.broadcast %cst_14 : f32 to vector<1x4xf32>
    %17 = arith.addf %16, %15 : vector<1x4xf32>
    %18 = arith.divf %16, %17 : vector<1x4xf32>
    %19 = vector.shape_cast %18 : vector<1x4xf32> to vector<1x1x4xf32>
    %c0_15 = arith.constant 0 : index
    %c0_16 = arith.constant 0 : index
    %c0_17 = arith.constant 0 : index
    %20 = vector.load %arg16[%c0_15, %c0_16, %c0_17] : memref<1x1x4xf32, #tpu.memory_space<vmem>>, vector<1x1x4xf32>
    tpu.vector_store %arg16[%c0_15, %c0_16, %c0_17], %19 {strides = array<i32>} : memref<1x1x4xf32, #tpu.memory_space<vmem>>, vector<1x1x4xf32>,
    %21 = vector.extract_strided_slice %0 {offsets = [0, 0, 0], sizes = [1, 1, 768], strides = [1, 1, 1]} : vector<1x8x768xf32> to vector<1x1x768xf32>
    %22 = vector.shape_cast %21 : vector<1x1x768xf32> to vector<1x768xf32>
    %c0_18 = arith.constant 0 : index
    %c0_19 = arith.constant 0 : index
    %c0_20 = arith.constant 0 : index
    %23 = vector.load %arg2[%c0_18, %c0_19, %c0_20] : memref<1x1x768xf32, #tpu.memory_space<vmem>>, vector<1x1x768xf32>
    %24 = vector.shape_cast %23 : vector<1x1x768xf32> to vector<1x768xf32>
    %25 = arith.truncf %22 : vector<1x768xf32> to vector<1x768xbf16>
    %c0_21 = arith.constant 0 : index
    %c0_22 = arith.constant 0 : index
    %26 = vector.load %arg3[%c0_21, %c0_22] : memref<768x768xbf16, #tpu.memory_space<vmem>>, vector<768x768xbf16>
    %cst_23 = arith.constant dense<0.000000e+00> : vector<1x768xf32>
    %27 = tpu.matmul %25, %26, %cst_23 {dimension_numbers = #tpu.dot_dimension_numbers<[1], [0], [0], [1], [0, 0, 1, 1], [], []>} : vector<1x768xbf16>, vector<768x768xbf16>, vector<1x768xf32> -> vector<1x768xf32>
    %c0_24 = arith.constant 0 : index
    %c0_25 = arith.constant 0 : index
    %28 = vector.load %arg4[%c0_24, %c0_25] : memref<1x768xf32, #tpu.memory_space<vmem>>, vector<1x768xf32>
    %29 = arith.addf %27, %28 : vector<1x768xf32>
    %30 = math.tanh %29 : vector<1x768xf32>
    %31 = arith.truncf %24 : vector<1x768xf32> to vector<1x768xbf16>
    %c0_26 = arith.constant 0 : index
    %c0_27 = arith.constant 0 : index
    %32 = vector.load %arg5[%c0_26, %c0_27] : memref<768x768xbf16, #tpu.memory_space<vmem>>, vector<768x768xbf16>
    %cst_28 = arith.constant dense<0.000000e+00> : vector<1x768xf32>
    %33 = tpu.matmul %31, %32, %cst_28 {dimension_numbers = #tpu.dot_dimension_numbers<[1], [0], [0], [1], [0, 0, 1, 1], [], []>} : vector<1x768xbf16>, vector<768x768xbf16>, vector<1x768xf32> -> vector<1x768xf32>
    %c0_29 = arith.constant 0 : index
    %c0_30 = arith.constant 0 : index
    %34 = vector.load %arg6[%c0_29, %c0_30] : memref<1x768xf32, #tpu.memory_space<vmem>>, vector<1x768xf32>
    %35 = arith.addf %33, %34 : vector<1x768xf32>
    %36 = math.tanh %35 : vector<1x768xf32>
    %37 = arith.subf %30, %36 : vector<1x768xf32>
    %38 = arith.mulf %37, %37 : vector<1x768xf32>
    %39 = arith.truncf %38 : vector<1x768xf32> to vector<1x768xbf16>
    %c0_31 = arith.constant 0 : index
    %c0_32 = arith.constant 0 : index
    %40 = vector.load %arg7[%c0_31, %c0_32] : memref<768x768xbf16, #tpu.memory_space<vmem>>, vector<768x768xbf16>
    %cst_33 = arith.constant dense<0.000000e+00> : vector<1x768xf32>
    %41 = tpu.matmul %39, %40, %cst_33 {dimension_numbers = #tpu.dot_dimension_numbers<[1], [0], [0], [1], [0, 0, 1, 1], [], []>} : vector<1x768xbf16>, vector<768x768xbf16>, vector<1x768xf32> -> vector<1x768xf32>
    %c0_34 = arith.constant 0 : index
    %c0_35 = arith.constant 0 : index
    %42 = vector.load %arg8[%c0_34, %c0_35] : memref<1x768xf32, #tpu.memory_space<vmem>>, vector<1x768xf32>
    %43 = arith.addf %41, %42 : vector<1x768xf32>
    %44 = arith.mulf %43, %43 : vector<1x768xf32>
    %cst_36 = arith.constant dense<0.000000e+00> : vector<1xf32>
    %45 = vector.multi_reduction <add>, %44, %cst_36 [1] : vector<1x768xf32> to vector<1xf32>
    %46 = vector.shape_cast %45 : vector<1xf32> to vector<1x1xf32>
    %47 = math.sqrt %46 : vector<1x1xf32>
    %cst_37 = arith.constant 9.99999993E-9 : f32
    %48 = vector.broadcast %cst_37 : f32 to vector<1x1xf32>
    %49 = arith.addf %47, %48 : vector<1x1xf32>
    %50 = vector.broadcast %49 : vector<1x1xf32> to vector<1x768xf32>
    %51 = arith.divf %43, %50 : vector<1x768xf32>
    %52 = arith.truncf %51 : vector<1x768xf32> to vector<1x768xbf16>
    %c0_38 = arith.constant 0 : index
    %c0_39 = arith.constant 0 : index
    %53 = vector.load %arg9[%c0_38, %c0_39] : memref<768x768xbf16, #tpu.memory_space<vmem>>, vector<768x768xbf16>
    %cst_40 = arith.constant dense<0.000000e+00> : vector<1x768xf32>
    %54 = tpu.matmul %52, %53, %cst_40 {dimension_numbers = #tpu.dot_dimension_numbers<[1], [0], [0], [1], [0, 0, 1, 1], [], []>} : vector<1x768xbf16>, vector<768x768xbf16>, vector<1x768xf32> -> vector<1x768xf32>
    %c0_41 = arith.constant 0 : index
    %c0_42 = arith.constant 0 : index
    %55 = vector.load %arg10[%c0_41, %c0_42] : memref<1x768xf32, #tpu.memory_space<vmem>>, vector<1x768xf32>
    %56 = arith.addf %54, %55 : vector<1x768xf32>
    %57 = vector.shape_cast %56 : vector<1x768xf32> to vector<1x1x768xf32>
    %c0_43 = arith.constant 0 : index
    %c0_44 = arith.constant 0 : index
    %c0_45 = arith.constant 0 : index
    %58 = vector.load %arg15[%c0_43, %c0_44, %c0_45] : memref<1x1x768xf32, #tpu.memory_space<vmem>>, vector<1x1x768xf32>
    tpu.vector_store %arg15[%c0_43, %c0_44, %c0_45], %57 {strides = array<i32>} : memref<1x1x768xf32, #tpu.memory_space<vmem>>, vector<1x1x768xf32>,
    return
  }
  func.func @transform_0(%arg0: i32) -> (i32, i32, i32) {
    %c0_i32 = arith.constant 0 : i32
    %c0_i32_0 = arith.constant 0 : i32
    %c0_i32_1 = arith.constant 0 : i32
    return %arg0, %c0_i32, %c0_i32_0 : i32, i32, i32
  }
  func.func @transform_1(%arg0: i32) -> (i32, i32, i32) {
    %c0_i32 = arith.constant 0 : i32
    %c0_i32_0 = arith.constant 0 : i32
    %c0_i32_1 = arith.constant 0 : i32
    return %arg0, %c0_i32, %c0_i32_0 : i32, i32, i32
  }
  func.func @transform_2(%arg0: i32) -> (i32, i32) {
    %c0_i32 = arith.constant 0 : i32
    %c0_i32_0 = arith.constant 0 : i32
    %c0_i32_1 = arith.constant 0 : i32
    return %c0_i32, %c0_i32_0 : i32, i32
  }
  func.func @transform_3(%arg0: i32) -> (i32, i32) {
    %c0_i32 = arith.constant 0 : i32
    %c0_i32_0 = arith.constant 0 : i32
    %c0_i32_1 = arith.constant 0 : i32
    return %c0_i32, %c0_i32_0 : i32, i32
  }
  func.func @transform_4(%arg0: i32) -> (i32, i32) {
    %c0_i32 = arith.constant 0 : i32
    %c0_i32_0 = arith.constant 0 : i32
    %c0_i32_1 = arith.constant 0 : i32
    return %c0_i32, %c0_i32_0 : i32, i32
  }
  func.func @transform_5(%arg0: i32) -> (i32, i32) {
    %c0_i32 = arith.constant 0 : i32
    %c0_i32_0 = arith.constant 0 : i32
    %c0_i32_1 = arith.constant 0 : i32
    return %c0_i32, %c0_i32_0 : i32, i32
  }
  func.func @transform_6(%arg0: i32) -> (i32, i32) {
    %c0_i32 = arith.constant 0 : i32
    %c0_i32_0 = arith.constant 0 : i32
    %c0_i32_1 = arith.constant 0 : i32
    return %c0_i32, %c0_i32_0 : i32, i32
  }
  func.func @transform_7(%arg0: i32) -> (i32, i32) {
    %c0_i32 = arith.constant 0 : i32
    %c0_i32_0 = arith.constant 0 : i32
    %c0_i32_1 = arith.constant 0 : i32
    return %c0_i32, %c0_i32_0 : i32, i32
  }
  func.func @transform_8(%arg0: i32) -> (i32, i32) {
    %c0_i32 = arith.constant 0 : i32
    %c0_i32_0 = arith.constant 0 : i32
    %c0_i32_1 = arith.constant 0 : i32
    return %c0_i32, %c0_i32_0 : i32, i32
  }
  func.func @transform_9(%arg0: i32) -> (i32, i32) {
    %c0_i32 = arith.constant 0 : i32
    %c0_i32_0 = arith.constant 0 : i32
    %c0_i32_1 = arith.constant 0 : i32
    return %c0_i32, %c0_i32_0 : i32, i32
  }
  func.func @transform_10(%arg0: i32) -> (i32, i32) {
    %c0_i32 = arith.constant 0 : i32
    %c0_i32_0 = arith.constant 0 : i32
    %c0_i32_1 = arith.constant 0 : i32
    return %c0_i32, %c0_i32_0 : i32, i32
  }
  func.func @transform_11(%arg0: i32) -> (i32, i32) {
    %c0_i32 = arith.constant 0 : i32
    %c0_i32_0 = arith.constant 0 : i32
    %c0_i32_1 = arith.constant 0 : i32
    return %c0_i32, %c0_i32_0 : i32, i32
  }
  func.func @transform_12(%arg0: i32) -> (i32, i32) {
    %c0_i32 = arith.constant 0 : i32
    %c0_i32_0 = arith.constant 0 : i32
    %c0_i32_1 = arith.constant 0 : i32
    return %c0_i32, %c0_i32_0 : i32, i32
  }
  func.func @transform_13(%arg0: i32) -> (i32, i32) {
    %c0_i32 = arith.constant 0 : i32
    %c0_i32_0 = arith.constant 0 : i32
    %c0_i32_1 = arith.constant 0 : i32
    return %c0_i32, %c0_i32_0 : i32, i32
  }
  func.func @transform_14(%arg0: i32) -> (i32, i32, i32) {
    %c0_i32 = arith.constant 0 : i32
    %c0_i32_0 = arith.constant 0 : i32
    %c0_i32_1 = arith.constant 0 : i32
    return %arg0, %c0_i32, %c0_i32_0 : i32, i32, i32
  }
  func.func @transform_15(%arg0: i32) -> (i32, i32, i32) {
    %c0_i32 = arith.constant 0 : i32
    %c0_i32_0 = arith.constant 0 : i32
    %c0_i32_1 = arith.constant 0 : i32
    return %arg0, %c0_i32, %c0_i32_0 : i32, i32, i32
  }
}

</mosaic_0001>

<bundles_post_ra>
// kernel: tpu_custom_call.1
= control target key start
LH: loop header
LB: loop body
LE: loop exit
PB: predicated region body
PF: predicated region fallthrough
CT: control target
= control target key end

     0   :  { %s14757_s0 = inlined_call_operand.hbm [shape: f32[2,8,768], index: 0, kind: input, shape index: {}]   ;;  %s14758_s1 = inlined_call_operand.hbm [shape: f32[2,1,768], index: 1, kind: input, shape index: {}]   ;;  %s14759_s2 = inlined_call_operand.hbm [shape: bf16[768,768], index: 2, kind: input, shape index: {}]   ;;  %s14760_s3 = inlined_call_operand.hbm [shape: f32[1,768], index: 3, kind: input, shape index: {}]   ;;  %s14761_s4 = inlined_call_operand.hbm [shape: bf16[768,768], index: 4, kind: input, shape index: {}]   ;;  %s14762_s5 = inlined_call_operand.hbm [shape: f32[1,768], index: 5, kind: input, shape index: {}]   ;;  %s14763_s6 = inlined_call_operand.hbm [shape: bf16[768,768], index: 6, kind: input, shape index: {}]   ;;  %s14764_s7 = inlined_call_operand.hbm [shape: f32[1,768], index: 7, kind: input, shape index: {}]   ;;  %s14765_s8 = inlined_call_operand.hbm [shape: bf16[768,768], index: 8, kind: input, shape index: {}]   ;;  %s14766_s9 = inlined_call_operand.hbm [shape: f32[1,768], index: 9, kind: input, shape index: {}]   ;;  %s14767_s10 = inlined_call_operand.hbm [shape: f32[768,128], index: 10, kind: input, shape index: {}]   ;;  %s14768_s11 = inlined_call_operand.hbm [shape: f32[1,128], index: 11, kind: input, shape index: {}]   ;;  %s14769_s12 = inlined_call_operand.vmem [shape: f32[128,4], index: 12, kind: input, shape index: {}]   ;;  %s14770_s13 = inlined_call_operand.hbm [shape: f32[1,4], index: 13, kind: input, shape index: {}]   ;;  %s14771_s14 = inlined_call_operand.hbm [shape: f32[2,1,768], index: 14, kind: output, shape index: {0}]   ;;  %s14772_s15 = inlined_call_operand.hbm [shape: f32[2,1,4], index: 15, kind: output, shape index: {1}]  }
   0x1   :  { %14782 = sst [smem:[#allocation36_spill]] %s14757_s0 }
   0x2   :  { %14783 = sst [smem:[#allocation37_spill]] %s14759_s2 }
   0x3   :  { %14784 = sst [smem:[#allocation38_spill]] %s14760_s3 }
   0x4   :  { %14785 = sst [smem:[#allocation39_spill]] %s14761_s4 }
   0x5   :  { %14786 = sst [smem:[#allocation40_spill]] %s14762_s5 }
   0x6   :  { %14787 = sst [smem:[#allocation41_spill]] %s14763_s6 }
   0x7   :  { %14788 = sst [smem:[#allocation42_spill]] %s14764_s7 }
   0x8   :  { %14789 = sst [smem:[#allocation43_spill]] %s14765_s8 }
   0x9   :  { %14790 = sst [smem:[#allocation44_spill]] %s14769_s12 }
   0xa   :  { %14791 = sst [smem:[#allocation45_spill]] %s14771_s14 }
   0xb   :  { %14792 = sst [smem:[#allocation46_spill]] %s14772_s15 }
   0xc   :  { %21 = vsyncpa [#allocation3], 0 }
   0xd   :  { %23 = vsyncpa [#allocation3 + $0x1], 0 }
   0xe   :  { %24 = vsyncpa [#allocation6], 0 }
   0xf   :  { %26 = vsyncpa [#allocation6 + $0x1], 0 }
  0x10   :  { %27 = vsyncpa [#allocation9], 0 }
  0x11   :  { %28 = vsyncpa [#allocation12], 0 }
  0x12   :  { %29 = vsyncpa [#allocation15], 0 }
  0x13   :  { %30 = vsyncpa [#allocation18], 0 }
  0x14   :  { %31 = vsyncpa [#allocation21], 0 }
  0x15   :  { %32 = vsyncpa [#allocation4], 0 }
  0x16   :  { %34 = vsyncpa [#allocation4 + $0x1], 0 }
  0x17   :  { %35 = vsyncpa [#allocation25], 0 }
  0x18   :  { %37 = vsyncpa [#allocation25 + $0x1], 0  ;;  %s13956_s18 = smov 0   ;;  %s13958_s19 = smov 0  }
  0x19   :  { %s13960_s20 = smov 0   ;;  %s13962_s21 = smov 0  }
  0x1a LB: > { %s13854_s22 = smov [#allocation7]   ;;  %s13977_s24 = sadd.s32 4294967295, %s13852_s21   ;;  %s13852_s21 = sphi %s13962_s21, %s14834_s21   ;;  %s13848_s20 = sphi %s13960_s20, %s14833_s20   ;;  %s13844_s19 = sphi %s13958_s19, %s14832_s19   ;;  %s13840_s18 = sphi %s13956_s18, %s14831_s18  }
  0x1b   : > { %s416_s23 = sshll.u32 %s13854_s22, 4  ;;  %p10098_p0 = scmp.ge.s32.totalorder %s13852_s21, 1  ;;  %s417_s23 = int_to_ptr.vmem [resolvable:$true] %s416_s23 }
  0x1c   : > { %p14778_p1 = scmp.eq.s32.totalorder %s13977_s24, 0  ;;  %p404_p2 = scmp.lt.s32.totalorder %s13852_s21, 3 }
  0x1d   : > { %s13855_s26 = smov [#allocation8]   ;;  %s13856_s29 = smov [#allocation11]  }
  0x1e   : > { %p13982_p3 = pnand %p10098_p0, %p404_p2  ;;  %s430_s27 = sshll.u32 %s13855_s26, 4  ;;  %s431_s27 = int_to_ptr.vmem [resolvable:$true] %s430_s27 }
  0x1f   : > { %s454_s30 = sshll.u32 %s13856_s29, 4  ;;  %s13399_s17 = scalar_lea.vmem %s417_s23, 36864  ;;  %s13995_s30 = int_to_ptr.vmem [resolvable:$true] %s454_s30 }
  0x20   : > { %s14793_s25 = scalar_select %p13982_p3, 1, 0 }
  0x21   : > { %p11498_p5 = pneg %p13982_p3  ;;  %p13400_p8 = scmp.ne.s32.totalorder %s417_s23, %s13399_s17 }
  0x22   : > { %p13407_p11 = scmp.lt.s32.totalorder %s417_s23, %s417_s23  ;;  %p13408_p12 = scmp.lt.s32.totalorder %s13399_s17, %s13399_s17 }
  0x23   : > { %p13991_p6 = pnand %p11498_p5, %p14778_p1 }
  0x24   : > { %p13409_p13 = por %p13408_p12, %p13407_p11 }
  0x25   : > { %p13999_p7 = pneg %p13991_p6 }
  0x27   : > { %p13402_p9 = pnand %p13400_p8, %p13999_p7 }
  0x29   : > { %p13403_p10 = pneg %p13402_p9 }
  0x2b   : > { %p13410_p0 = pnand %p13409_p13, %p13403_p10 }
  0x2d   : > { %13413 = shalt.err (!%p13410_p0)
}
  0x2e   : > { %s14776_s22 = smov 384   ;;  %s13858_s26 = smov 24  }
  0x2f   : > { %s14796_s2 = sld [smem:[#allocation37_spill]]  ;;  %s13425_s15 = scalar_lea.vmem %s431_s27, 96 }
  0x30   : > { %p13426_p2 = scmp.ne.s32.totalorder %s431_s27, %s13425_s15  ;;  %p13433_p9 = scmp.lt.s32.totalorder %s431_s27, %s431_s27 }
  0x31   : > { %p13434_p10 = scmp.lt.s32.totalorder %s13425_s15, %s13425_s15 }
  0x32   : > { %p13428_p5 = pnand %p13426_p2, %p13999_p7 }
  0x33   : > { %p13435_p11 = por %p13434_p10, %p13433_p9 }
  0x34   : > { %p13429_p8 = pneg %p13428_p5 }
  0x35   : > { %11501 = dma.hbm_to_vmem [thread:$0]  (!%p13991_p6), %s14796_s2, 36864, %s417_s23, [#allocation6], %s14776_s22, %s14776_s22, %s13858_s26  }
  0x36   : > { %p13436_p12 = pnand %p13435_p11, %p13429_p8 }
  0x38   : > { %13439 = shalt.err (!%p13436_p12)
}
  0x39   : > { %s14797_s3 = sld [smem:[#allocation38_spill]]  ;;  %s13451_s14 = scalar_lea.vmem %s13995_s30, 96 }
  0x3a   : > { %p13452_p13 = scmp.ne.s32.totalorder %s13995_s30, %s13451_s14  ;;  %p13459_p5 = scmp.lt.s32.totalorder %s13995_s30, %s13995_s30 }
  0x3b   : > { %p13460_p9 = scmp.lt.s32.totalorder %s13451_s14, %s13451_s14 }
  0x3c   : > { %p13454_p0 = pnand %p13452_p13, %p13999_p7 }
  0x3d   : > { %p13461_p8 = por %p13460_p9, %p13459_p5 }
  0x3e   : > { %p13455_p2 = pneg %p13454_p0 }
  0x3f   : > { %11504 = dma.hbm_to_vmem [thread:$0]  (!%p13991_p6), %s14797_s3, 96, %s431_s27, [#allocation9]  }
  0x40   : > { %p13462_p10 = pnand %p13461_p8, %p13455_p2 }
  0x42   : > { %13465 = shalt.err (!%p13462_p10)
}
  0x43   : > { %s14798_s5 = sld [smem:[#allocation40_spill]]  ;;  %s13859_s23 = smov [#allocation14]  }
  0x44   : > { %s478_s27 = sshll.u32 %s13859_s23, 4  ;;  %s13860_s29 = smov [#allocation17]   ;;  %s479_s27 = int_to_ptr.vmem [resolvable:$true] %s478_s27 }
  0x45   : > { %s502_s17 = sshll.u32 %s13860_s29, 4  ;;  %s13477_s22 = scalar_lea.vmem %s479_s27, 96  ;;  %s503_s17 = int_to_ptr.vmem [resolvable:$true] %s502_s17 }
  0x46   : > { %p13478_p11 = scmp.ne.s32.totalorder %s479_s27, %s13477_s22  ;;  %p13485_p0 = scmp.lt.s32.totalorder %s479_s27, %s479_s27 }
  0x47   : > { %p13486_p2 = scmp.lt.s32.totalorder %s13477_s22, %s13477_s22 }
  0x48   : > { %p13480_p12 = pnand %p13478_p11, %p13999_p7 }
  0x49   : > { %11510 = dma.hbm_to_vmem [thread:$0]  (!%p13991_p6), %s14798_s5, 96, %s13995_s30, [#allocation12]  }
  0x4a   : > { %p13481_p13 = pneg %p13480_p12  ;;  %p13487_p5 = por %p13486_p2, %p13485_p0 }
  0x4c   : > { %p13488_p9 = pnand %p13487_p5, %p13481_p13 }
  0x4e   : > { %13491 = shalt.err (!%p13488_p9)
}
  0x4f   : > { %s14799_s7 = sld [smem:[#allocation42_spill]]  ;;  %s13503_s30 = scalar_lea.vmem %s503_s17, 96 }
  0x50   : > { %p13504_p8 = scmp.ne.s32.totalorder %s503_s17, %s13503_s30  ;;  %p13511_p11 = scmp.lt.s32.totalorder %s503_s17, %s503_s17 }
  0x51   : > { %p13512_p12 = scmp.lt.s32.totalorder %s13503_s30, %s13503_s30 }
  0x52   : > { %p13506_p10 = pnand %p13504_p8, %p13999_p7 }
  0x53   : > { %p13513_p1 = por %p13512_p12, %p13511_p11 }
  0x54   : > { %p13507_p4 = pneg %p13506_p10 }
  0x55   : > { %11516 = dma.hbm_to_vmem [thread:$0]  (!%p13991_p6), %s14799_s7, 96, %s479_s27, [#allocation15]  }
  0x56   : > { %p13514_p3 = pnand %p13513_p1, %p13507_p4 }
  0x58   : > { %13517 = shalt.err (!%p13514_p3)
}
  0x59   : > { %11522 = dma.hbm_to_vmem [thread:$0]  (!%p13991_p6), %s14766_s9, 96, %s503_s17, [#allocation18]  }
  0x5a   : > { %s13861_s23 = smov [#allocation20]   ;;  %s13862_s29 = smov [#allocation10]  }
  0x5b   : > { %s526_s27 = sshll.u32 %s13861_s23, 4  ;;  %s440_s14 = sshll.u32 %s13862_s29, 4  ;;  %s527_s27 = int_to_ptr.vmem [resolvable:$true] %s526_s27  ;;  %s441_s14 = int_to_ptr.vmem [resolvable:$true] %s440_s14 }
  0x5c   : > { %s13529_s12 = scalar_lea.vmem %s527_s27, 16  ;;  %s13536_s30 = scalar_lea.vmem %s527_s27, 32 }
  0x5d   : > { %p13530_p13 = scmp.ne.s32.totalorder %s527_s27, %s13529_s12  ;;  %p13537_p1 = scmp.lt.s32.totalorder %s527_s27, %s527_s27 }
  0x5e   : > { %p13538_p3 = scmp.lt.s32.totalorder %s13536_s30, %s13529_s12 }
  0x5f   : > { %p13532_p0 = pnand %p13530_p13, %p13999_p7 }
  0x60   : > { %p13539_p4 = por %p13538_p3, %p13537_p1 }
  0x61   : > { %p13533_p2 = pneg %p13532_p0 }
  0x63   : > { %p13540_p5 = pnand %p13539_p4, %p13533_p2 }
  0x65   : > { %13543 = shalt.err (!%p13540_p5)
}
  0x66   : > { %11528 = dma.hbm_to_vmem [thread:$0]  (!%p13991_p6), %s14768_s11, 16, %s527_s27, [#allocation21]  }
  0x67   : > { %s13555_s15 = scalar_lea.vmem %s441_s14, 36864  ;;  %p13563_p11 = scmp.lt.s32.totalorder %s441_s14, %s441_s14 }
  0x68   : > { %p13556_p9 = scmp.ne.s32.totalorder %s441_s14, %s13555_s15  ;;  %p13564_p12 = scmp.lt.s32.totalorder %s13555_s15, %s13555_s15 }
  0x6a   : > { %p13558_p8 = pnand %p13556_p9, %p13999_p7  ;;  %p13565_p13 = por %p13564_p12, %p13563_p11 }
  0x6c   : > { %p13559_p10 = pneg %p13558_p8 }
  0x6e   : > { %p13566_p0 = pnand %p13565_p13, %p13559_p10 }
  0x70   : > { %13569 = shalt.err (!%p13566_p0)
}
  0x71   : > { %s14800_s23 = smov 384   ;;  %s14801_s4 = sld [smem:[#allocation39_spill]] }
  0x72   : > { %s13863_s27 = smov [#allocation13]   ;;  %s13864_s22 = smov [#allocation16]  }
  0x73   : > { %s464_s30 = sshll.u32 %s13863_s27, 4  ;;  %s488_s17 = sshll.u32 %s13864_s22, 4  ;;  %s465_s30 = int_to_ptr.vmem [resolvable:$true] %s464_s30  ;;  %s489_s17 = int_to_ptr.vmem [resolvable:$true] %s488_s17 }
  0x74   : > { %s13581_s2 = scalar_lea.vmem %s465_s30, 36864  ;;  %p13589_p4 = scmp.lt.s32.totalorder %s465_s30, %s465_s30 }
  0x75   : > { %p13582_p2 = scmp.ne.s32.totalorder %s465_s30, %s13581_s2  ;;  %p13590_p5 = scmp.lt.s32.totalorder %s13581_s2, %s13581_s2 }
  0x77   : > { %11507 = dma.hbm_to_vmem [thread:$0]  (!%p13991_p6), %s14801_s4, 36864, %s441_s14, [#allocation9], %s14800_s23, %s14800_s23, %s13858_s26  }
  0x78   : > { %p13584_p1 = pnand %p13582_p2, %p13999_p7  ;;  %p13591_p9 = por %p13590_p5, %p13589_p4 }
  0x7a   : > { %p13585_p3 = pneg %p13584_p1 }
  0x7c   : > { %p13592_p8 = pnand %p13591_p9, %p13585_p3 }
  0x7e   : > { %13595 = shalt.err (!%p13592_p8)
}
  0x7f   : > { %s14802_s6 = sld [smem:[#allocation41_spill]]  ;;  %s13607_s29 = scalar_lea.vmem %s489_s17, 36864 }
  0x80   : > { %p13608_p10 = scmp.ne.s32.totalorder %s489_s17, %s13607_s29  ;;  %p13615_p13 = scmp.lt.s32.totalorder %s489_s17, %s489_s17 }
  0x81   : > { %p13616_p0 = scmp.lt.s32.totalorder %s13607_s29, %s13607_s29 }
  0x82   : > { %p13610_p11 = pnand %p13608_p10, %p13999_p7 }
  0x83   : > { %p13617_p2 = por %p13616_p0, %p13615_p13 }
  0x84   : > { %p13611_p12 = pneg %p13610_p11 }
  0x85   : > { %11513 = dma.hbm_to_vmem [thread:$0]  (!%p13991_p6), %s14802_s6, 36864, %s465_s30, [#allocation12], %s14800_s23, %s14800_s23, %s13858_s26  }
  0x86   : > { %p13618_p1 = pnand %p13617_p2, %p13611_p12 }
  0x88   : > { %13621 = shalt.err (!%p13618_p1)
}
  0x89   : > { %s14803_s8 = sld [smem:[#allocation43_spill]]  ;;  %s13865_s27 = smov [#allocation19]  }
  0x8a   : > { %s512_s30 = sshll.u32 %s13865_s27, 4  ;;  %s513_s30 = int_to_ptr.vmem [resolvable:$true] %s512_s30 }
  0x8b   : > { %s13633_s22 = scalar_lea.vmem %s513_s30, 12288  ;;  %p13641_p9 = scmp.lt.s32.totalorder %s513_s30, %s513_s30 }
  0x8c   : > { %p13634_p3 = scmp.ne.s32.totalorder %s513_s30, %s13633_s22  ;;  %p13642_p8 = scmp.lt.s32.totalorder %s13633_s22, %s13633_s22 }
  0x8e   : > { %p13636_p4 = pnand %p13634_p3, %p13999_p7  ;;  %p13643_p10 = por %p13642_p8, %p13641_p9 }
  0x8f   : > { %11519 = dma.hbm_to_vmem [thread:$0]  (!%p13991_p6), %s14803_s8, 36864, %s489_s17, [#allocation15], %s14800_s23, %s14800_s23, %s13858_s26  }
  0x90   : > { %p13637_p5 = pneg %p13636_p4 }
  0x92   : > { %p13644_p11 = pnand %p13643_p10, %p13637_p5 }
  0x94   : > { %13647 = shalt.err (!%p13644_p11)
}
  0x95   : > { %s13866_s14 = smov 128   ;;  %s13867_s15 = smov 8  }
  0x96   : > { %11525 = dma.hbm_to_vmem [thread:$0]  (!%p13991_p6), %s14767_s10, 12288, %s513_s30, [#allocation18], %s13866_s14, %s13866_s14, %s13867_s15  }
  0x97   : > { %s13868_s23 = smov [#allocation22]  }
  0x98   : > { %s540_s17 = sshll.u32 %s13868_s23, 4  ;;  %s541_s17 = int_to_ptr.vmem [resolvable:$true] %s540_s17 }
  0x99   : > { %s13659_s2 = scalar_lea.vmem %s541_s17, 16  ;;  %s13666_s12 = scalar_lea.vmem %s541_s17, 32 }
  0x9a   : > { %p13660_p12 = scmp.ne.s32.totalorder %s541_s17, %s13659_s2  ;;  %p13667_p2 = scmp.lt.s32.totalorder %s541_s17, %s541_s17 }
  0x9b   : > { %p13668_p1 = scmp.lt.s32.totalorder %s13666_s12, %s13659_s2 }
  0x9c   : > { %p13662_p13 = pnand %p13660_p12, %p13999_p7 }
  0x9d   : > { %p13669_p3 = por %p13668_p1, %p13667_p2 }
  0x9e   : > { %p13663_p0 = pneg %p13662_p13 }
  0xa0   : > { %p13670_p4 = pnand %p13669_p3, %p13663_p0 }
  0xa2   : > { %13673 = shalt.err (!%p13670_p4)
}
  0xa3   : > { %11531 = dma.hbm_to_vmem [thread:$0]  (!%p13991_p6), %s14770_s13, 16, %s541_s17, [#allocation21]  }
  0xa4   : > { %s10097_s16 = sadd.s32 4294967294, %s13852_s21   ;;  %s14099_s28 = sadd.s32 1, %s13852_s21  }
  0xa5   : > { %s50_s30 = sadd.s32 1, %s13848_s20  ;;  %s47_s14 = ssub.s32 %s13852_s21, %s14099_s28 }
  0xa6   : > { %p57_p7 = scmp.ne.s32.totalorder %s13848_s20, %s13844_s19  ;;  %p48_p5 = scmp.eq.s32.totalorder %s47_s14, 0 }
  0xa7   : > { %p58_p9 = scmp.eq.s32.totalorder %s13852_s21, 0  ;;  %p63_p8 = scmp.ne.s32.totalorder %s13844_s19, %s13840_s18 }
  0xa8   : > { %p365_p10 = scmp.eq.s32.totalorder %s13977_s24, 1  ;;  %p14804_p12 = scmp.eq.s32.totalorder %s13977_s24, 0 }
  0xa9   : > { %s14111_s15 = scalar_select %p48_p5, %s13848_s20, %s50_s30  }
  0xaa   : > { %p59_p11 = por %p58_p9, %p57_p7  ;;  %p14115_p13 = por %p14804_p12, %p63_p8 }
  0xab   : > { %p14119_p6 = por %p365_p10, %p57_p7  ;;  %p371_p0 = scmp.eq.s32.totalorder %s10097_s16, 1 }
  0xac   : > { %s14805_s29 = scalar_select %p14115_p13, 1, 0 }
  0xad   : > { %s14806_s26 = scalar_select %p14119_p6, 1, 0 }
  0xae   : > { %p11557_p2 = scmp.lt.s32.totalorder %s13852_s21, 2  ;;  %s14125_s23 = sand.u32 1, %s13848_s20  }
  0xaf   : > { %p14127_p1 = por %p371_p0, %p63_p8  ;;  %s11439_s2 = smul.u32 48, %s14125_s23 }
  0xb0   : > { %p14132_p3 = pnand %p11557_p2, %p59_p11  ;;  %s11440_s27 = smul.u32 768, %s13852_s21 }
  0xb1   : > { %s14807_s17 = scalar_select %p14127_p1, 1, 0 }
  0xb2   : > { %s14809_s0 = sld [smem:[#allocation36_spill]]  ;;  %s555_s14 = scalar_lea.vmem [#allocation2], %s11439_s2 }
  0xb3   : > { %s563_s3 = sshll.u32 %s555_s14, 4  ;;  %s552_s5 = scalar_lea.sflag [#allocation3], %s14125_s23  ;;  %s564_s3 = int_to_ptr.vmem [resolvable:$true] %s563_s3 }
  0xb4   : > { %p13676_p7 = pneg %p14132_p3 }
  0xb8   : > { %s14140_s16 = scalar_lea.hbm %s14809_s0, %s11440_s27  ;;  %s13679_s27 = scalar_lea.hbm %s14809_s0, 1536 }
  0xb9   : > { %s13674_s6 = scalar_lea.hbm %s14140_s16, 768  ;;  %p13680_p8 = scmp.lt.s32.totalorder %s14140_s16, %s14809_s0 }
  0xba   : > { %p13675_p4 = scmp.ne.s32.totalorder %s14140_s16, %s13674_s6  ;;  %p13681_p10 = scmp.lt.s32.totalorder %s13679_s27, %s13674_s6 }
  0xbc   : > { %p13677_p5 = pnand %p13676_p7, %p13675_p4  ;;  %p13682_p11 = por %p13681_p10, %p13680_p8 }
  0xbe   : > { %p13678_p9 = pneg %p13677_p5 }
  0xc0   : > { %p13683_p12 = pnand %p13682_p11, %p13678_p9 }
  0xc2   : > { %13686 = shalt.err (!%p13683_p12)
}
  0xc3   : > { %s13687_s2 = scalar_lea.vmem %s564_s3, 768  ;;  %s13869_s14 = smov [#allocation2]  }
  0xc4   : > { %p13688_p0 = scmp.ne.s32.totalorder %s564_s3, %s13687_s2  ;;  %s13692_s4 = sshll.u32 %s13869_s14, 4  ;;  %s13693_s4 = int_to_ptr.vmem [resolvable:$false] %s13692_s4 }
  0xc5   : > { %s13694_s7 = scalar_lea.vmem %s13693_s4, 1536  ;;  %p13695_p5 = scmp.lt.s32.totalorder %s564_s3, %s13693_s4 }
  0xc6   : > { %p13690_p2 = pnand %p13688_p0, %p13676_p7  ;;  %p13696_p1 = scmp.lt.s32.totalorder %s13694_s7, %s13687_s2 }
  0xc8   : > { %p13691_p4 = pneg %p13690_p2  ;;  %p13697_p6 = por %p13696_p1, %p13695_p5 }
  0xca   : > { %p13698_p13 = pnand %p13697_p6, %p13691_p4 }
  0xcc   : > { %13701 = shalt.err (!%p13698_p13)
}
  0xcd   : > { %11535 = dma.hbm_to_vmem [thread:$0]  (!%p14132_p3), %s14140_s16, 768, %s564_s3, %s552_s5  }
  0xce   : > { %s11441_s6 = smul.u32 6, %s14125_s23  ;;  %s14810_s14 = sand.u32 1, %s13852_s21  }
  0xcf   : > { %s11442_s8 = smul.u32 96, %s13852_s21  ;;  %s571_s7 = scalar_lea.sflag [#allocation6], %s14810_s14 }
  0xd0   : > { %s574_s4 = scalar_lea.vmem [#allocation5], %s11441_s6  ;;  %s13707_s23 = scalar_lea.hbm %s14758_s1, 192 }
  0xd1   : > { %s14169_s30 = scalar_lea.hbm %s14758_s1, %s11442_s8  ;;  %s582_s2 = sshll.u32 %s574_s4, 4  ;;  %s583_s2 = int_to_ptr.vmem [resolvable:$true] %s582_s2 }
  0xd2   : > { %s13702_s0 = scalar_lea.hbm %s14169_s30, 96  ;;  %p13708_p9 = scmp.lt.s32.totalorder %s14169_s30, %s14758_s1 }
  0xd3   : > { %p13703_p13 = scmp.ne.s32.totalorder %s14169_s30, %s13702_s0  ;;  %p13709_p8 = scmp.lt.s32.totalorder %s13707_s23, %s13702_s0 }
  0xd5   : > { %p13705_p6 = pnand %p13703_p13, %p13676_p7  ;;  %p13710_p10 = por %p13709_p8, %p13708_p9 }
  0xd7   : > { %p13706_p1 = pneg %p13705_p6 }
  0xd9   : > { %p13711_p11 = pnand %p13710_p10, %p13706_p1 }
  0xdb   : > { %13714 = shalt.err (!%p13711_p11)
}
  0xdc   : > { %s13715_s6 = scalar_lea.vmem %s583_s2, 96  ;;  %s13870_s22 = smov [#allocation5]  }
  0xdd   : > { %p13716_p12 = scmp.ne.s32.totalorder %s583_s2, %s13715_s6  ;;  %s13720_s27 = sshll.u32 %s13870_s22, 4  ;;  %s13721_s27 = int_to_ptr.vmem [resolvable:$false] %s13720_s27 }
  0xde   : > { %s13722_s4 = scalar_lea.vmem %s13721_s27, 192  ;;  %p13723_p4 = scmp.lt.s32.totalorder %s583_s2, %s13721_s27 }
  0xdf   : > { %p13718_p0 = pnand %p13716_p12, %p13676_p7  ;;  %p13724_p5 = scmp.lt.s32.totalorder %s13722_s4, %s13715_s6 }
  0xe1   : > { %p13719_p2 = pneg %p13718_p0  ;;  %p13725_p13 = por %p13724_p5, %p13723_p4 }
  0xe3   : > { %p13726_p6 = pnand %p13725_p13, %p13719_p2 }
  0xe5   : > { %13729 = shalt.err (!%p13726_p6)
}
  0xe6   : > { %11538 = dma.hbm_to_vmem [thread:$0]  (!%p14132_p3), %s14169_s30, 96, %s583_s2, %s571_s7  }
  0xe7   : > { %p14811_p1 = scmp.ne.s32.totalorder %s14793_s25, 0 }
  0xe8   : > { %s14194_s0 = sand.u32 (!%p14811_p1), 1, %s13844_s19   ;;  %p14812_p7 = scmp.ne.s32.totalorder (!%p14811_p1), %s14805_s29, 0 }
  0xe9   : > { %591 = sbr.rel (%p14811_p1) target bundleno = 2368 (0x940), region = 76  ;;  %s594_s3 = scalar_lea.sflag (!%p14811_p1), [#allocation3], %s14194_s0 }
  0xea   : > { %s11443_s14 = smul.u32 (!%p14811_p1), 48, %s14194_s0 }
  0xec   : > { %s14198_s5 = scalar_lea.vmem (!%p14811_p1), [#allocation2], %s11443_s14 }
  0xee   : > { %13799 = dma.done.wait (%p14812_p7), %s594_s3, 768  }
  0xef   : > { %13801 = vsyncadd (%p14812_p7), %s594_s3, 4294966528  ;;  %s602_s25 = sand.u32 1, %s13977_s24   ;;  %s11444_s12 = smul.u32 6, %s14194_s0 }
  0xf0   : > { %s603_s30 = scalar_lea.sflag [#allocation6], %s602_s25 }
  0xf1   : > { %s14208_s2 = scalar_lea.vmem [#allocation5], %s11444_s12 }
  0xf2   : > { %13803 = dma.done.wait (%p14812_p7), %s603_s30, 96  }
  0xf3   : > { %13805 = vsyncadd (%p14812_p7), %s603_s30, 4294967200  ;;  %p14813_p3 = scmp.eq.s32.totalorder %s13977_s24, 0 }
  0xf5   : > { %13807 = dma.done.wait (%p14813_p3), [#allocation6], 36864   ;;  %p14814_p9 = pmov %p14813_p3 }
  0xf6   : > { %p14815_p8 = pmov %p14813_p3 }
  0xf7   : > { %13809 = vsyncadd (%p14814_p9), [#allocation6], 4294930432 }
  0xf8   : > { %13811 = dma.done.wait (%p14815_p8), [#allocation9], 36960   ;;  %p14816_p10 = pmov %p14813_p3 }
  0xf9   : > { %p14817_p11 = pmov %p14813_p3 }
  0xfa   : > { %13813 = vsyncadd (%p14816_p10), [#allocation9], 4294930336 }
  0xfb   : > { %13815 = dma.done.wait (%p14817_p11), [#allocation12], 36960   ;;  %p14818_p12 = pmov %p14813_p3 }
  0xfc   : > { %p14819_p0 = pmov %p14813_p3 }
  0xfd   : > { %13817 = vsyncadd (%p14818_p12), [#allocation12], 4294930336 }
  0xfe   : > { %13819 = dma.done.wait (%p14819_p0), [#allocation15], 36960   ;;  %p14820_p2 = pmov %p14819_p0 }
  0xff   : > { %p14821_p4 = pmov %p14819_p0 }
 0x100   : > { %13821 = vsyncadd (%p14820_p2), [#allocation15], 4294930336 }
 0x101   : > { %13823 = dma.done.wait (%p14821_p4), [#allocation18], 12384   ;;  %p14822_p5 = pmov %p14819_p0 }
 0x102   : > { %p14823_p13 = pmov %p14819_p0 }
 0x103   : > { %13825 = vsyncadd (%p14822_p5), [#allocation18], 4294954912 }
 0x104   : > { %13827 = dma.done.wait (%p14823_p13), [#allocation21], 32   ;;  %p14824_p6 = pmov %p14819_p0 }
 0x105   : > { %v785_v0 = vld [vmem:[#allocation19 + $0xf8] sm:$0xff]  ;;  %v784_v2 = vld [vmem:[#allocation19 + $0xf0] sm:$0xff]  ;;  %v783_v6 = vld [vmem:[#allocation19 + $0xe8] sm:$0xff]  ;;  %s14825_s23 = sld [smem:[#allocation44_spill]]  ;;  %vm13872_vm0 = vmmov 0   ;;  %vm1155_vm1 = vcmask 24576  }
 0x106   : > { %13829 = vsyncadd (%p14824_p6), [#allocation21], 4294967264  ;;  %v769_v1 = vld [vmem:[#allocation19 + $0x78] sm:$0xff]  ;;  %11282 = vmatprep.subr.mxu0 %v785_v0  ;;  %v768_v4 = vld [vmem:[#allocation19 + $0x70] sm:$0xff]  ;;  %vm7624_vm2 = vcmask 1040384   ;;  %s14826_s30 = sld [smem:[#allocation46_spill]] }
 0x107   : > { %v817_v3 = vld [vmem:[#allocation19 + $0x1f8] sm:$0xff]  ;;  %11283 = vmatpush3.msra.mxu0 %v769_v1  ;;  %v816_v7 = vld [vmem:[#allocation19 + $0x1f0] sm:$0xff]  ;;  %v767_v8 = vld [vmem:[#allocation19 + $0x68] sm:$0xff]  ;;  %s9846_s7 = scalar_lea.sflag [#allocation25], %s14194_s0  ;;  %p14827_p7 = scmp.ne.s32.totalorder %s14806_s26, 0 }
 0x108   : > { %v801_v5 = vld [vmem:[#allocation19 + $0x178] sm:$0xff]  ;;  %11317 = vmatprep.subr.mxu1 %v817_v3  ;;  %11284 = vmatprep.subr.mxu0 %v784_v2  ;;  %v800_v9 = vld [vmem:[#allocation19 + $0x170] sm:$0xff]  ;;  %v815_v10 = vld [vmem:[#allocation19 + $0x1e8] sm:$0xff]  ;;  %s13874_s8 = smov [#allocation24]  }
 0x109   : > { %11318 = vmatpush3.msra.mxu1 %v801_v5  ;;  %11285 = vmatpush3.msra.mxu0 %v768_v4  ;;  %v782_v11 = vld [vmem:[#allocation19 + $0xe0] sm:$0xff]  ;;  %v799_v12 = vld [vmem:[#allocation19 + $0x168] sm:$0xff]  ;;  %v781_v15 = vld [vmem:[#allocation19 + $0xd8] sm:$0xff]  ;;  %s13734_s6 = sshll.u32 %s13874_s8, 4  ;;  %s13735_s6 = int_to_ptr.vmem [resolvable:$false] %s13734_s6 }
 0x10a   : > { %11319 = vmatprep.subr.mxu1 %v816_v7  ;;  %11286 = vmatprep.subr.mxu0 %v783_v6  ;;  %v766_v13 = vld [vmem:[#allocation19 + $0x60] sm:$0xff]  ;;  %v765_v17 = vld [vmem:[#allocation19 + $0x58] sm:$0xff]  ;;  %v780_v19 = vld [vmem:[#allocation19 + $0xd0] sm:$0xff]  ;;  %s13736_s22 = scalar_lea.vmem %s13735_s6, 32 }
 0x10b   : > { %11320 = vmatpush3.msra.mxu1 %v800_v9  ;;  %v814_v14 = vld [vmem:[#allocation19 + $0x1e0] sm:$0xff]  ;;  %11287 = vmatpush3.msra.mxu0 %v767_v8  ;;  %v813_v18 = vld [vmem:[#allocation19 + $0x1d8] sm:$0xff]  ;;  %v764_v21 = vld [vmem:[#allocation19 + $0x50] sm:$0xff] }
 0x10c   : > { %11321 = vmatprep.subr.mxu1 %v815_v10  ;;  %v798_v16 = vld [vmem:[#allocation19 + $0x160] sm:$0xff]  ;;  %11288 = vmatprep.subr.mxu0 %v782_v11  ;;  %v797_v20 = vld [vmem:[#allocation19 + $0x158] sm:$0xff]  ;;  %v812_v22 = vld [vmem:[#allocation19 + $0x1d0] sm:$0xff] }
 0x10d   : > { %11322 = vmatpush3.msra.mxu1 %v799_v12  ;;  %11289 = vmatpush3.msra.mxu0 %v766_v13  ;;  %v779_v23 = vld [vmem:[#allocation19 + $0xc8] sm:$0xff]  ;;  %v796_v24 = vld [vmem:[#allocation19 + $0x150] sm:$0xff]  ;;  %v778_v27 = vld [vmem:[#allocation19 + $0xc0] sm:$0xff] }
 0x10e   : > { %11323 = vmatprep.subr.mxu1 %v814_v14  ;;  %11290 = vmatprep.subr.mxu0 %v781_v15  ;;  %v763_v25 = vld [vmem:[#allocation19 + $0x48] sm:$0xff]  ;;  %v762_v29 = vld [vmem:[#allocation19 + $0x40] sm:$0xff]  ;;  %v777_v31 = vld [vmem:[#allocation19 + $0xb8] sm:$0xff] }
 0x10f   : > { %11324 = vmatpush3.msra.mxu1 %v798_v16  ;;  %11291 = vmatpush3.msra.mxu0 %v765_v17  ;;  %v811_v26 = vld [vmem:[#allocation19 + $0x1c8] sm:$0xff]  ;;  %v810_v30 = vld [vmem:[#allocation19 + $0x1c0] sm:$0xff]  ;;  %v761_v33 = vld [vmem:[#allocation19 + $0x38] sm:$0xff] }
 0x110   : > { %11325 = vmatprep.subr.mxu1 %v813_v18  ;;  %11292 = vmatprep.subr.mxu0 %v780_v19  ;;  %v795_v28 = vld [vmem:[#allocation19 + $0x148] sm:$0xff]  ;;  %v794_v32 = vld [vmem:[#allocation19 + $0x140] sm:$0xff]  ;;  %v809_v34 = vld [vmem:[#allocation19 + $0x1b8] sm:$0xff] }
 0x111   : > { %11326 = vmatpush3.msra.mxu1 %v797_v20  ;;  %11293 = vmatpush3.msra.mxu0 %v764_v21  ;;  %v776_v35 = vld [vmem:[#allocation19 + $0xb0] sm:$0xff]  ;;  %v793_v36 = vld [vmem:[#allocation19 + $0x138] sm:$0xff]  ;;  %v775_v39 = vld [vmem:[#allocation19 + $0xa8] sm:$0xff] }
 0x112   : > { %11327 = vmatprep.subr.mxu1 %v812_v22  ;;  %11294 = vmatprep.subr.mxu0 %v779_v23  ;;  %v760_v37 = vld [vmem:[#allocation19 + $0x30] sm:$0xff]  ;;  %v759_v41 = vld [vmem:[#allocation19 + $0x28] sm:$0xff]  ;;  %v774_v43 = vld [vmem:[#allocation19 + $0xa0] sm:$0xff] }
 0x113   : > { %11328 = vmatpush3.msra.mxu1 %v796_v24  ;;  %11295 = vmatpush3.msra.mxu0 %v763_v25  ;;  %v808_v38 = vld [vmem:[#allocation19 + $0x1b0] sm:$0xff]  ;;  %v807_v42 = vld [vmem:[#allocation19 + $0x1a8] sm:$0xff]  ;;  %v758_v46 = vld [vmem:[#allocation19 + $0x20] sm:$0xff] }
 0x114   : > { %11329 = vmatprep.subr.mxu1 %v811_v26  ;;  %11296 = vmatprep.subr.mxu0 %v778_v27  ;;  %v792_v40 = vld [vmem:[#allocation19 + $0x130] sm:$0xff]  ;;  %v791_v44 = vld [vmem:[#allocation19 + $0x128] sm:$0xff]  ;;  %v806_v47 = vld [vmem:[#allocation19 + $0x1a0] sm:$0xff] }
 0x115   : > { %11330 = vmatpush3.msra.mxu1 %v795_v28  ;;  %11297 = vmatpush3.msra.mxu0 %v762_v29  ;;  %v707_v45 = vld [vmem:[%s14198_s5 + $0x8] sm:$0xff]  ;;  %v706_v49 = vld [vmem:[%s14198_s5] sm:$0xff]  ;;  %v709_v53 = vld [vmem:[%s14198_s5 + $0x18] sm:$0xff] }
 0x116   : > { %11331 = vmatprep.subr.mxu1 %v810_v30  ;;  %11298 = vmatprep.subr.mxu0 %v777_v31  ;;  %v718_v48 = vrot.slane %v707_v45, 4  ;;  %v773_v50 = vld [vmem:[#allocation19 + $0x98] sm:$0xff]  ;;  %v790_v51 = vld [vmem:[#allocation19 + $0x120] sm:$0xff]  ;;  %v712_v52 = vrot.slane %v706_v49, 4  ;;  %v730_v57 = vrot.slane %v709_v53, 4  ;;  %v772_v59 = vld [vmem:[#allocation19 + $0x90] sm:$0xff] }
 0x117   : > { %11332 = vmatpush3.msra.mxu1 %v794_v32  ;;  %11299 = vmatpush3.msra.mxu0 %v761_v33  ;;  %v757_v54 = vld [vmem:[#allocation19 + $0x18] sm:$0xff]  ;;  %v756_v63 = vld [vmem:[#allocation19 + $0x10] sm:$0xff]  ;;  %v771_v3 = vld [vmem:[#allocation19 + $0x88] sm:$0xff] }
 0x118   : > { %11333 = vmatprep.subr.mxu1 %v809_v34  ;;  %11300 = vmatprep.subr.mxu0 %v776_v35  ;;  %v805_v55 = vld [vmem:[#allocation19 + $0x198] sm:$0xff]  ;;  %v719_v56 = vadd.f32 %v718_v48, %v707_v45  ;;  %v713_v61 = vadd.f32 %v712_v52, %v706_v49  ;;  %v804_v0 = vld [vmem:[#allocation19 + $0x190] sm:$0xff]  ;;  %v731_v2 = vadd.f32 %v730_v57, %v709_v53  ;;  %v755_v7 = vld [vmem:[#allocation19 + $0x8] sm:$0xff] }
 0x119   : > { %11334 = vmatpush3.msra.mxu1 %v793_v36  ;;  %11301 = vmatpush3.msra.mxu0 %v760_v37  ;;  %v708_v58 = vld [vmem:[%s14198_s5 + $0x10] sm:$0xff]  ;;  %v711_v30 = vld [vmem:[%s14198_s5 + $0x28] sm:$0xff] }
 0x11a   : > { %11335 = vmatprep.subr.mxu1 %v808_v38  ;;  %11302 = vmatprep.subr.mxu0 %v775_v39  ;;  %v789_v60 = vld [vmem:[#allocation19 + $0x118] sm:$0xff]  ;;  %v724_v62 = vrot.slane %v708_v58, 4  ;;  %v720_v1 = vrot.slane %v719_v56, 2  ;;  %v788_v4 = vld [vmem:[#allocation19 + $0x110] sm:$0xff]  ;;  %v714_v5 = vrot.slane %v713_v61, 2  ;;  %v803_v8 = vld [vmem:[#allocation19 + $0x188] sm:$0xff] }
 0x11b   : > { %11336 = vmatpush3.msra.mxu1 %v792_v40  ;;  %11303 = vmatpush3.msra.mxu0 %v759_v41  ;;  %v732_v10 = vrot.slane %v731_v2, 2  ;;  %v770_v11 = vld [vmem:[#allocation19 + $0x80] sm:$0xff]  ;;  %v787_v12 = vld [vmem:[#allocation19 + $0x108] sm:$0xff]  ;;  %v849_v20 = vld [vmem:[#allocation19 + $0x2f8] sm:$0xff]  ;;  %v742_v33 = vrot.slane %v711_v30, 4 }
 0x11c   : > { %11337 = vmatprep.subr.mxu1 %v807_v42  ;;  %11304 = vmatprep.subr.mxu0 %v774_v43  ;;  %v725_v6 = vadd.f32 %v724_v62, %v708_v58  ;;  %v721_v9 = vadd.f32 %v720_v1, %v719_v56  ;;  %v715_v13 = vadd.f32 %v714_v5, %v713_v61  ;;  %v754_v15 = vld [vmem:[#allocation19] sm:$0xff]  ;;  %v833_v29 = vld [vmem:[#allocation19 + $0x278] sm:$0xff]  ;;  %v848_v35 = vld [vmem:[#allocation19 + $0x2f0] sm:$0xff] }
 0x11d   : > { %11338 = vmatpush3.msra.mxu1 %v791_v44  ;;  %11305 = vmatpush3.msra.mxu0 %v758_v46  ;;  %v802_v17 = vld [vmem:[#allocation19 + $0x180] sm:$0xff]  ;;  %v733_v18 = vadd.f32 %v732_v10, %v731_v2  ;;  %v832_v37 = vld [vmem:[#allocation19 + $0x270] sm:$0xff]  ;;  %v743_v38 = vadd.f32 %v742_v33, %v711_v30  ;;  %v847_v39 = vld [vmem:[#allocation19 + $0x2e8] sm:$0xff] }
 0x11e   : > { %11339 = vmatprep.subr.mxu1 %v806_v47  ;;  %11306 = vmatprep.subr.mxu0 %v773_v50  ;;  %v726_v14 = vrot.slane %v725_v6, 2  ;;  %v722_v16 = vrot.slane %v721_v9, 1  ;;  %v716_v19 = vrot.slane %v715_v13, 1  ;;  %v786_v21 = vld [vmem:[#allocation19 + $0x100] sm:$0xff]  ;;  %v831_v41 = vld [vmem:[#allocation19 + $0x268] sm:$0xff]  ;;  %v845_v45 = vld [vmem:[#allocation19 + $0x2d8] sm:$0xff] }
 0x11f   : > { %11340 = vmatpush3.msra.mxu1 %v790_v51  ;;  %11307 = vmatpush3.msra.mxu0 %v757_v54  ;;  %v734_v24 = vrot.slane %v733_v18, 1  ;;  %v710_v40 = vld [vmem:[%s14198_s5 + $0x20] sm:$0xff]  ;;  %v744_v42 = vrot.slane %v743_v38, 2 }
 0x120   : > { %11341 = vmatprep.subr.mxu1 %v805_v55  ;;  %11308 = vmatprep.subr.mxu0 %v772_v59  ;;  %v727_v22 = vadd.f32 %v726_v14, %v725_v6  ;;  %v723_v23 = vadd.f32 %v722_v16, %v721_v9  ;;  %v717_v25 = vadd.f32 %v716_v19, %v715_v13  ;;  %v846_v43 = vld [vmem:[#allocation19 + $0x2e0] sm:$0xff]  ;;  %v736_v47 = vrot.slane %v710_v40, 4  ;;  %v829_v48 = vld [vmem:[#allocation19 + $0x258] sm:$0xff]  ;;  %v844_v49 = vld [vmem:[#allocation19 + $0x2d0] sm:$0xff] }
 0x121   : > { %11342 = vmatpush3.msra.mxu1 %v789_v60  ;;  %11309 = vmatpush3.msra.mxu0 %v756_v63  ;;  %v735_v28 = vadd.f32 %v734_v24, %v733_v18  ;;  %v830_v44 = vld [vmem:[#allocation19 + $0x260] sm:$0xff]  ;;  %v745_v46 = vadd.f32 %v744_v42, %v743_v38  ;;  %v828_v50 = vld [vmem:[#allocation19 + $0x250] sm:$0xff]  ;;  %v843_v52 = vld [vmem:[#allocation19 + $0x2c8] sm:$0xff] }
 0x122   : > { %11343 = vmatprep.subr.mxu1 %v804_v0  ;;  %11310 = vmatprep.subr.mxu0 %v771_v3  ;;  %v728_v26 = vrot.slane %v727_v22, 1  ;;  %v749_v27 = vmul.f32 0.125, %v723_v23  ;;  %v748_v31 = vmul.f32 0.125, %v717_v25  ;;  %v827_v53 = vld [vmem:[#allocation19 + $0x248] sm:$0xff]  ;;  %v737_v55 = vadd.f32 %v736_v47, %v710_v40  ;;  %v842_v56 = vld [vmem:[#allocation19 + $0x2c0] sm:$0xff]  ;;  %v841_v59 = vld [vmem:[#allocation19 + $0x2b8] sm:$0xff] }
 0x123   : > { %11344 = vmatpush3.msra.mxu1 %v788_v4  ;;  %11311 = vmatpush3.msra.mxu0 %v755_v7  ;;  %v751_v34 = vmul.f32 0.125, %v735_v28  ;;  %v746_v51 = vrot.slane %v745_v46, 1  ;;  %v826_v57 = vld [vmem:[#allocation19 + $0x240] sm:$0xff]  ;;  %v825_v60 = vld [vmem:[#allocation19 + $0x238] sm:$0xff]  ;;  %v840_v62 = vld [vmem:[#allocation19 + $0x2b0] sm:$0xff] }
 0x124   : > { %11345 = vmatprep.subr.mxu1 %v803_v8  ;;  %11312 = vmatprep.subr.mxu0 %v770_v11  ;;  %v729_v32 = vadd.f32 %v728_v26, %v727_v22  ;;  %v738_v61 = vrot.slane %v737_v55, 2  ;;  %v824_v63 = vld [vmem:[#allocation19 + $0x230] sm:$0xff]  ;;  %v839_v0 = vld [vmem:[#allocation19 + $0x2a8] sm:$0xff]  ;;  %v838_v3 = vld [vmem:[#allocation19 + $0x2a0] sm:$0xff] }
 0x125   : > { %11346 = vmatpush3.msra.mxu1 %v787_v12  ;;  %11313 = vmatpush3.msra.mxu0 %v754_v15  ;;  %v747_v54 = vadd.f32 %v746_v51, %v745_v46  ;;  %v823_v1 = vld [vmem:[#allocation19 + $0x228] sm:$0xff]  ;;  %v822_v4 = vld [vmem:[#allocation19 + $0x220] sm:$0xff]  ;;  %v837_v5 = vld [vmem:[#allocation19 + $0x298] sm:$0xff] }
 0x126   : > { %11347 = vmatprep.subr.mxu1 %v802_v17  ;;  %11352 = vmatprep.subr.mxu0 %v849_v20  ;;  %v750_v36 = vmul.f32 0.125, %v729_v32  ;;  %v739_v2 = vadd.f32 %v738_v61, %v737_v55  ;;  %v821_v6 = vld [vmem:[#allocation19 + $0x218] sm:$0xff]  ;;  %v836_v8 = vld [vmem:[#allocation19 + $0x290] sm:$0xff]  ;;  %v835_v10 = vld [vmem:[#allocation19 + $0x288] sm:$0xff] }
 0x127   : > { %11348 = vmatpush3.msra.mxu1 %v786_v21  ;;  %915 = vmatprep.mubr.f32.mxu0 %v749_v27  ;;  %v753_v58 = vmul.f32 0.125, %v747_v54  ;;  %v820_v9 = vld [vmem:[#allocation19 + $0x210] sm:$0xff]  ;;  %v819_v11 = vld [vmem:[#allocation19 + $0x208] sm:$0xff]  ;;  %v834_v13 = vld [vmem:[#allocation19 + $0x280] sm:$0xff] }
 0x128   : > { %916 = vmatmul.mubr.f32.vlgmr.msra.gmra.mxu0 %v748_v31  ;;  %985 = vmatprep.mubr.f32.mxu1 %v751_v34  ;;  %v740_v7 = vrot.slane %v739_v2, 1  ;;  %v818_v14 = vld [vmem:[#allocation19 + $0x200] sm:$0xff]  ;;  %v11622_v15 = vld [vmem:[#allocation7 + $0x154] ss:$24 sps:$4 sm:$0xff]   ;;  %v11620_v16 = vld [vmem:[#allocation7 + $0x150] ss:$24 sps:$4 sm:$0xff]  }
 0x129   : > { %11353 = vmatpush3.msra.mxu0 %v833_v29  ;;  %986 = vmatmul.mubr.f32.vlgmr.msra.gmra.mxu1 %v750_v36  ;;  %v11625_v18 = vld [vmem:[#allocation7 + $0x124] ss:$24 sps:$4 sm:$0xff]   ;;  %v11623_v19 = vld [vmem:[#allocation7 + $0x120] ss:$24 sps:$4 sm:$0xff]   ;;  %v11628_v20 = vld [vmem:[#allocation7 + $0xf4] ss:$24 sps:$4 sm:$0xff]  }
 0x12a   : > { %11354 = vmatprep.subr.mxu0 %v848_v35  ;;  %1055 = vmatprep.mubr.f32.mxu0 %v753_v58  ;;  %v741_v12 = vadd.f32 %v740_v7, %v739_v2  ;;  %v11626_v21 = vld [vmem:[#allocation7 + $0xf0] ss:$24 sps:$4 sm:$0xff]   ;;  %v11631_v22 = vld [vmem:[#allocation7 + $0xc4] ss:$24 sps:$4 sm:$0xff]   ;;  %v11629_v23 = vld [vmem:[#allocation7 + $0xc0] ss:$24 sps:$4 sm:$0xff]  }
 0x12b   : > { %11355 = vmatpush3.msra.mxu0 %v832_v37  ;;  %v11634_v24 = vld [vmem:[#allocation7 + $0x94] ss:$24 sps:$4 sm:$0xff]   ;;  %v11632_v25 = vld [vmem:[#allocation7 + $0x90] ss:$24 sps:$4 sm:$0xff]   ;;  %v11637_v26 = vld [vmem:[#allocation7 + $0x64] ss:$24 sps:$4 sm:$0xff]  }
 0x12c   : > { %11356 = vmatprep.subr.mxu0 %v847_v39  ;;  %v752_v17 = vmul.f32 0.125, %v741_v12  ;;  %v11635_v27 = vld [vmem:[#allocation7 + $0x60] ss:$24 sps:$4 sm:$0xff]   ;;  %v11640_v28 = vld [vmem:[#allocation7 + $0x34] ss:$24 sps:$4 sm:$0xff]   ;;  %v13871_v35 = vmov 0.0  }
 0x12d   : > { %11357 = vmatpush3.msra.mxu0 %v831_v41  ;;  %v11638_v29 = vld [vmem:[#allocation7 + $0x30] ss:$24 sps:$4 sm:$0xff]   ;;  %v11643_v30 = vld [vmem:[#allocation7 + $0x4] ss:$24 sps:$4 sm:$0xff]   ;;  %v11641_v31 = vld [vmem:[#allocation7] ss:$24 sps:$4 sm:$0xff]   ;;  %11404 = vmatprep.subr.mxu1 %v13871_v35 }
 0x12e   : > { %11358 = vmatprep.subr.mxu0 %v846_v43  ;;  %v1077_v32 = vld [vmem:[%s14825_s23 + $0x78] sm:$0xff]  ;;  %v1076_v36 = vld [vmem:[%s14825_s23 + $0x70] sm:$0xff]  ;;  %v1075_v38 = vld [vmem:[%s14825_s23 + $0x68] sm:$0xff]  ;;  %11436 = vmatprep.mubr.msk.f32.mxu1 %vm13872_vm0, %v13871_v35 }
 0x12f   : > { %11359 = vmatpush3.msra.mxu0 %v830_v44  ;;  %v11644_v33 = vld [vmem:[#allocation7 + $0x2d0] ss:$24 sps:$4 sm:$0xff]   ;;  %v11646_v34 = vld [vmem:[#allocation7 + $0x2d4] ss:$24 sps:$4 sm:$0xff]   ;;  %11405 = vmatpush3.msra.mxu1 %v1077_v32  ;;  %v11649_v37 = vld [vmem:[#allocation7 + $0x2a4] ss:$24 sps:$4 sm:$0xff]  }
 0x130   : > { %11360 = vmatprep.subr.mxu0 %v845_v45  ;;  %11406 = vmatprep.subr.mxu1 %v13871_v35  ;;  %v11647_v39 = vld [vmem:[#allocation7 + $0x2a0] ss:$24 sps:$4 sm:$0xff]   ;;  %v11652_v41 = vld [vmem:[#allocation7 + $0x274] ss:$24 sps:$4 sm:$0xff]   ;;  %v11650_v43 = vld [vmem:[#allocation7 + $0x270] ss:$24 sps:$4 sm:$0xff]  }
 0x131   : > { %11361 = vmatpush3.msra.mxu0 %v829_v48  ;;  %11407 = vmatpush3.msra.mxu1 %v1076_v36  ;;  %v1074_v40 = vld [vmem:[%s14825_s23 + $0x60] sm:$0xff]  ;;  %v1073_v42 = vld [vmem:[%s14825_s23 + $0x58] sm:$0xff]  ;;  %v1072_v44 = vld [vmem:[%s14825_s23 + $0x50] sm:$0xff] }
 0x132   : > { %11362 = vmatprep.subr.mxu0 %v844_v49  ;;  %11408 = vmatprep.subr.mxu1 %v13871_v35  ;;  %v11655_v45 = vld [vmem:[#allocation7 + $0x244] ss:$24 sps:$4 sm:$0xff]   ;;  %v11653_v47 = vld [vmem:[#allocation7 + $0x240] ss:$24 sps:$4 sm:$0xff]   ;;  %v11658_v49 = vld [vmem:[#allocation7 + $0x214] ss:$24 sps:$4 sm:$0xff]  }
 0x133   : > { %11363 = vmatpush3.msra.mxu0 %v828_v50  ;;  %11409 = vmatpush3.msra.mxu1 %v1075_v38  ;;  %v1071_v46 = vld [vmem:[%s14825_s23 + $0x48] sm:$0xff]  ;;  %v1070_v48 = vld [vmem:[%s14825_s23 + $0x40] sm:$0xff]  ;;  %v1069_v50 = vld [vmem:[%s14825_s23 + $0x38] sm:$0xff] }
 0x134   : > { %11364 = vmatprep.subr.mxu0 %v843_v52  ;;  %11410 = vmatprep.subr.mxu1 %v13871_v35  ;;  %v11656_v51 = vld [vmem:[#allocation7 + $0x210] ss:$24 sps:$4 sm:$0xff]   ;;  %v1067_v54 = vld [vmem:[%s14825_s23 + $0x28] sm:$0xff]  ;;  %v11664_v58 = vld [vmem:[#allocation7 + $0x1b4] ss:$24 sps:$4 sm:$0xff]  }
 0x135   : > { %11365 = vmatpush3.msra.mxu0 %v827_v53  ;;  %11411 = vmatpush3.msra.mxu1 %v1074_v40  ;;  %v1068_v52 = vld [vmem:[%s14825_s23 + $0x30] sm:$0xff]  ;;  %v11659_v55 = vld [vmem:[#allocation7 + $0x1e0] ss:$24 sps:$4 sm:$0xff]  }
 0x136   : > { %11366 = vmatprep.subr.mxu0 %v842_v56  ;;  %11412 = vmatprep.subr.mxu1 %v13871_v35  ;;  %v11661_v53 = vld [vmem:[#allocation7 + $0x1e4] ss:$24 sps:$4 sm:$0xff]   ;;  %v1066_v56 = vld [vmem:[%s14825_s23 + $0x20] sm:$0xff] }
 0x137   : > { %11367 = vmatpush3.msra.mxu0 %v826_v57  ;;  %11413 = vmatpush3.msra.mxu1 %v1073_v42  ;;  %v1065_v57 = vld [vmem:[%s14825_s23 + $0x18] sm:$0xff]  ;;  %v1063_v61 = vld [vmem:[%s14825_s23 + $0x8] sm:$0xff]  ;;  %v13383_v40 = vld [vmem:[%s14198_s5 + $0x20] sm:$0xff] }
 0x138   : > { %11368 = vmatprep.subr.mxu0 %v841_v59  ;;  %11414 = vmatprep.subr.mxu1 %v13871_v35  ;;  %v11662_v59 = vld [vmem:[#allocation7 + $0x1b0] ss:$24 sps:$4 sm:$0xff]   ;;  %v11691_v12 = vld [vmem:[#allocation7 + $0x6c4] ss:$24 sps:$4 sm:$0xff]  }
 0x139   : > { %11369 = vmatpush3.msra.mxu0 %v825_v60  ;;  %11415 = vmatpush3.msra.mxu1 %v1072_v44  ;;  %v1064_v60 = vld [vmem:[%s14825_s23 + $0x10] sm:$0xff]  ;;  %v13380_v2 = vld [vmem:[%s14198_s5 + $0x8] sm:$0xff]  ;;  %v13384_v44 = vld [vmem:[%s14198_s5 + $0x18] sm:$0xff] }
 0x13a   : > { %11370 = vmatprep.subr.mxu0 %v840_v62  ;;  %11416 = vmatprep.subr.mxu1 %v13871_v35  ;;  %v11667_v62 = vld [vmem:[#allocation7 + $0x184] ss:$24 sps:$4 sm:$0xff]  }
 0x13b   : > { %11371 = vmatpush3.msra.mxu0 %v824_v63  ;;  %11417 = vmatpush3.msra.mxu1 %v1071_v46  ;;  %v11665_v63 = vld [vmem:[#allocation7 + $0x180] ss:$24 sps:$4 sm:$0xff]   ;;  %v11751_v32 = vld [vmem:[#allocation7 + $0x7e4] ss:$24 sps:$4 sm:$0xff]  }
 0x13c   : > { %11372 = vmatprep.subr.mxu0 %v839_v0  ;;  %11418 = vmatprep.subr.mxu1 %v13871_v35  ;;  %v1062_v0 = vld [vmem:[%s14825_s23] sm:$0xff]  ;;  %v11763_v36 = vld [vmem:[#allocation7 + $0x784] ss:$24 sps:$4 sm:$0xff]  }
 0x13d   : > { %11373 = vmatpush3.msra.mxu0 %v823_v1  ;;  %11419 = vmatpush3.msra.mxu1 %v1070_v48  ;;  %v11670_v1 = vld [vmem:[#allocation7 + $0x454] ss:$24 sps:$4 sm:$0xff]  }
 0x13e   : > { %11374 = vmatprep.subr.mxu0 %v838_v3  ;;  %11420 = vmatprep.subr.mxu1 %v13871_v35  ;;  %v14310_v3 = vpack.c.bf16 %v13380_v2, %v13380_v2  ;;  %v13382_v38 = vld [vmem:[%s14198_s5 + $0x28] sm:$0xff] }
 0x13f   : > { %11375 = vmatpush3.msra.mxu0 %v822_v4  ;;  %11421 = vmatpush3.msra.mxu1 %v1069_v50  ;;  %v11673_v4 = vld [vmem:[#allocation7 + $0x754] ss:$24 sps:$4 sm:$0xff]  }
 0x140   : > { %11376 = vmatprep.subr.mxu0 %v837_v5  ;;  %11422 = vmatprep.subr.mxu1 %v13871_v35  ;;  %v11671_v5 = vld [vmem:[#allocation7 + $0x750] ss:$24 sps:$4 sm:$0xff]   ;;  %v11769_v42 = vld [vmem:[#allocation7 + $0x45c] ss:$24 sps:$4 sm:$0xff]   ;;  %v11775_v46 = vld [vmem:[#allocation7 + $0x42c] ss:$24 sps:$4 sm:$0xff]  }
 0x141   : > { %11377 = vmatpush3.msra.mxu0 %v821_v6  ;;  %11423 = vmatpush3.msra.mxu1 %v1068_v52  ;;  %v13381_v6 = vld [vmem:[%s14198_s5] sm:$0xff] }
 0x142   : > { %11378 = vmatprep.subr.mxu0 %v836_v8  ;;  %11424 = vmatprep.subr.mxu1 %v13871_v35  ;;  %v14313_v7 = vpack.c.bf16 %v13381_v6, %v13381_v6  ;;  %v11679_v8 = vld [vmem:[#allocation7 + $0x724] ss:$24 sps:$4 sm:$0xff]  }
 0x143   : > { %11379 = vmatpush3.msra.mxu0 %v820_v9  ;;  %11425 = vmatpush3.msra.mxu1 %v1067_v54  ;;  %v11677_v9 = vld [vmem:[#allocation7 + $0x720] ss:$24 sps:$4 sm:$0xff]   ;;  %v11781_v48 = vld [vmem:[#allocation7 + $0x3fc] ss:$24 sps:$4 sm:$0xff]   ;;  %v11787_v50 = vld [vmem:[#allocation7 + $0x3cc] ss:$24 sps:$4 sm:$0xff]  }
 0x144   : > { %11380 = vmatprep.subr.mxu0 %v835_v10  ;;  %11426 = vmatprep.subr.mxu1 %v13871_v35  ;;  %v11685_v10 = vld [vmem:[#allocation7 + $0x6f4] ss:$24 sps:$4 sm:$0xff]  }
 0x145   : > { %11381 = vmatpush3.msra.mxu0 %v819_v11  ;;  %11427 = vmatpush3.msra.mxu1 %v1066_v56  ;;  %v11683_v11 = vld [vmem:[#allocation7 + $0x6f0] ss:$24 sps:$4 sm:$0xff]   ;;  %v11793_v52 = vld [vmem:[#allocation7 + $0x39c] ss:$24 sps:$4 sm:$0xff]   ;;  %v11799_v54 = vld [vmem:[#allocation7 + $0x36c] ss:$24 sps:$4 sm:$0xff]  }
 0x146   : > { %11382 = vmatprep.subr.mxu0 %v834_v13  ;;  %11428 = vmatprep.subr.mxu1 %v13871_v35  ;;  %v11689_v13 = vld [vmem:[#allocation7 + $0x6c0] ss:$24 sps:$4 sm:$0xff]   ;;  %v11805_v56 = vld [vmem:[#allocation7 + $0x33c] ss:$24 sps:$4 sm:$0xff]  }
 0x147   : > { %11383 = vmatpush3.msra.mxu0 %v818_v14  ;;  %11429 = vmatpush3.msra.mxu1 %v1065_v57  ;;  %v11697_v14 = vld [vmem:[#allocation7 + $0x694] ss:$24 sps:$4 sm:$0xff]   ;;  %v11803_v57 = vld [vmem:[#allocation7 + $0x338] ss:$24 sps:$4 sm:$0xff]  }
 0x148   : > { %1056 = vmatmul.mubr.f32.vlgmr.msra.gmra.mxu0 %v752_v17  ;;  %2924 = vmatprep.subr.bf16.mxu0 %v11622_v15  ;;  %v11695_v15 = vld [vmem:[#allocation7 + $0x690] ss:$24 sps:$4 sm:$0xff]   ;;  %v11701_v17 = vld [vmem:[#allocation7 + $0x660] ss:$24 sps:$4 sm:$0xff]  }
 0x149   : > { %2925 = vmatpush1.bf16.msra.mxu0 %v11620_v16  ;;  %11430 = vmatprep.subr.mxu1 %v13871_v35  ;;  %v11703_v16 = vld [vmem:[#allocation7 + $0x664] ss:$24 sps:$4 sm:$0xff]  }
 0x14a   : > { %2926 = vmatprep.subr.bf16.mxu0 %v11625_v18  ;;  %11431 = vmatpush3.msra.mxu1 %v1064_v60  ;;  %v11709_v18 = vld [vmem:[#allocation7 + $0x634] ss:$24 sps:$4 sm:$0xff]  }
 0x14b   : > { %11432 = vmatprep.subr.mxu1 %v13871_v35  ;;  %2956 = vmatprep.mubr.bf16.mxu0 %v14310_v3  ;;  %v11817_v60 = vld [vmem:[#allocation7 + $0x5dc] ss:$24 sps:$4 sm:$0xff]  }
 0x14c   : > { %11433 = vmatpush3.msra.mxu1 %v1063_v61  ;;  %v11815_v61 = vld [vmem:[#allocation7 + $0x5d8] ss:$24 sps:$4 sm:$0xff]  }
 0x14d   : > { %2927 = vmatpush1.bf16.msra.mxu0 %v11623_v19  ;;  %11434 = vmatprep.subr.mxu1 %v13871_v35  ;;  %v11707_v19 = vld [vmem:[#allocation7 + $0x630] ss:$24 sps:$4 sm:$0xff]  }
 0x14e   : > { %2928 = vmatprep.subr.bf16.mxu0 %v11628_v20  ;;  %11435 = vmatpush3.msra.mxu1 %v1062_v0  ;;  %v11715_v20 = vld [vmem:[#allocation7 + $0x604] ss:$24 sps:$4 sm:$0xff]   ;;  %v11755_v35 = vld [vmem:[#allocation7 + $0x7b0] ss:$24 sps:$4 sm:$0xff]  }
 0x14f   : > { %2965 = vmatprep.subr.bf16.mxu1 %v11670_v1  ;;  %v11829_v0 = vld [vmem:[#allocation7 + $0x57c] ss:$24 sps:$4 sm:$0xff]   ;;  %v11827_v1 = vld [vmem:[#allocation7 + $0x578] ss:$24 sps:$4 sm:$0xff]  }
 0x151   : > { %2929 = vmatpush1.bf16.msra.mxu0 %v11626_v21  ;;  %v11713_v21 = vld [vmem:[#allocation7 + $0x600] ss:$24 sps:$4 sm:$0xff]  }
 0x152   : > { %2930 = vmatprep.subr.bf16.mxu0 %v11631_v22  ;;  %v11721_v22 = vld [vmem:[#allocation7 + $0x8d4] ss:$24 sps:$4 sm:$0xff]  }
 0x155   : > { %2931 = vmatpush1.bf16.msra.mxu0 %v11629_v23  ;;  %v11719_v23 = vld [vmem:[#allocation7 + $0x8d0] ss:$24 sps:$4 sm:$0xff]  }
 0x156   : > { %2932 = vmatprep.subr.bf16.mxu0 %v11634_v24  ;;  %v11727_v24 = vld [vmem:[#allocation7 + $0x8a4] ss:$24 sps:$4 sm:$0xff]  }
 0x159   : > { %2933 = vmatpush1.bf16.msra.mxu0 %v11632_v25  ;;  %v11725_v25 = vld [vmem:[#allocation7 + $0x8a0] ss:$24 sps:$4 sm:$0xff]  }
 0x15a   : > { %2934 = vmatprep.subr.bf16.mxu0 %v11637_v26  ;;  %v11733_v26 = vld [vmem:[#allocation7 + $0x874] ss:$24 sps:$4 sm:$0xff]  }
 0x15d   : > { %2935 = vmatpush1.bf16.msra.mxu0 %v11635_v27  ;;  %v11731_v27 = vld [vmem:[#allocation7 + $0x870] ss:$24 sps:$4 sm:$0xff]  }
 0x15e   : > { %2936 = vmatprep.subr.bf16.mxu0 %v11640_v28  ;;  %v11739_v28 = vld [vmem:[#allocation7 + $0x844] ss:$24 sps:$4 sm:$0xff]  }
 0x161   : > { %2937 = vmatpush1.bf16.msra.mxu0 %v11638_v29  ;;  %v11737_v29 = vld [vmem:[#allocation7 + $0x840] ss:$24 sps:$4 sm:$0xff]  }
 0x162   : > { %2938 = vmatprep.subr.bf16.mxu0 %v11643_v30  ;;  %v11745_v30 = vld [vmem:[#allocation7 + $0x814] ss:$24 sps:$4 sm:$0xff]  }
 0x165   : > { %2939 = vmatpush1.bf16.msra.mxu0 %v11641_v31  ;;  %v11743_v31 = vld [vmem:[#allocation7 + $0x810] ss:$24 sps:$4 sm:$0xff]  }
 0x166   : > { %2940 = vmatprep.subr.bf16.mxu0 %v11646_v34  ;;  %v11757_v34 = vld [vmem:[#allocation7 + $0x7b4] ss:$24 sps:$4 sm:$0xff]  }
 0x169   : > { %2941 = vmatpush2.bf16.msra.mxu0 %v11644_v33  ;;  %v11749_v33 = vld [vmem:[#allocation7 + $0x7e0] ss:$24 sps:$4 sm:$0xff]  }
 0x16a   : > { %2942 = vmatprep.subr.bf16.mxu0 %v11649_v37  ;;  %v11761_v37 = vld [vmem:[#allocation7 + $0x780] ss:$24 sps:$4 sm:$0xff]  }
 0x16d   : > { %2943 = vmatpush2.bf16.msra.mxu0 %v11647_v39  ;;  %v14318_v39 = vpack.c.bf16 %v13382_v38, %v13382_v38  ;;  %v11688_v38 = vld [vmem:[#allocation7 + $0x3c4] ss:$24 sps:$4 sm:$0xff]  }
 0x16e   : > { %2944 = vmatprep.subr.bf16.mxu0 %v11652_v41  ;;  %v14321_v41 = vpack.c.bf16 %v13383_v40, %v13383_v40  ;;  %v11869_v40 = vld [vmem:[#allocation7 + $0x130] ss:$24 sps:$4 sm:$0xff]  }
 0x171   : > { %2945 = vmatpush2.bf16.msra.mxu0 %v11650_v43  ;;  %v11767_v43 = vld [vmem:[#allocation7 + $0x458] ss:$24 sps:$4 sm:$0xff]  }
 0x172   : > { %2946 = vmatprep.subr.bf16.mxu0 %v11655_v45  ;;  %v14325_v45 = vpack.c.bf16 %v13384_v44, %v13384_v44  ;;  %v11694_v44 = vld [vmem:[#allocation7 + $0x394] ss:$24 sps:$4 sm:$0xff]  }
 0x175   : > { %2947 = vmatpush2.bf16.msra.mxu0 %v11653_v47  ;;  %v11773_v47 = vld [vmem:[#allocation7 + $0x428] ss:$24 sps:$4 sm:$0xff]  }
 0x176   : > { %2948 = vmatprep.subr.bf16.mxu0 %v11658_v49  ;;  %v11779_v49 = vld [vmem:[#allocation7 + $0x3f8] ss:$24 sps:$4 sm:$0xff]  }
 0x179   : > { %2949 = vmatpush2.bf16.msra.mxu0 %v11656_v51  ;;  %v11785_v51 = vld [vmem:[#allocation7 + $0x3c8] ss:$24 sps:$4 sm:$0xff]  }
 0x17a   : > { %2950 = vmatprep.subr.bf16.mxu0 %v11661_v53  ;;  %v11791_v53 = vld [vmem:[#allocation7 + $0x398] ss:$24 sps:$4 sm:$0xff]  }
 0x17d   : > { %2951 = vmatpush2.bf16.msra.mxu0 %v11659_v55  ;;  %v11797_v55 = vld [vmem:[#allocation7 + $0x368] ss:$24 sps:$4 sm:$0xff]  }
 0x17e   : > { %2952 = vmatprep.subr.bf16.mxu0 %v11664_v58  ;;  %v11811_v58 = vld [vmem:[#allocation7 + $0x30c] ss:$24 sps:$4 sm:$0xff]  }
 0x181   : > { %2953 = vmatpush2.bf16.msra.mxu0 %v11662_v59  ;;  %v11809_v59 = vld [vmem:[#allocation7 + $0x308] ss:$24 sps:$4 sm:$0xff]  }
 0x182   : > { %2954 = vmatprep.subr.bf16.mxu0 %v11667_v62  ;;  %v11823_v62 = vld [vmem:[#allocation7 + $0x5ac] ss:$24 sps:$4 sm:$0xff]  }
 0x185   : > { %2955 = vmatpush2.bf16.msra.mxu0 %v11665_v63  ;;  %v11821_v63 = vld [vmem:[#allocation7 + $0x5a8] ss:$24 sps:$4 sm:$0xff]  }
 0x186   : > { %3006 = vmatprep.subr.bf16.mxu0 %v11673_v4  ;;  %v11835_v4 = vld [vmem:[#allocation7 + $0x54c] ss:$24 sps:$4 sm:$0xff]  }
 0x188   : > { %2957 = vmatmul.mubr.bf16.vlgmr.msra.gmra.mxu0 %v14313_v7 }
 0x189   : > { %3007 = vmatpush1.bf16.msra.mxu0 %v11671_v5  ;;  %3038 = vmatprep.mubr.bf16.mxu0 %v14318_v39  ;;  %v11833_v5 = vld [vmem:[#allocation7 + $0x548] ss:$24 sps:$4 sm:$0xff]  }
 0x18a   : > { %3008 = vmatprep.subr.bf16.mxu0 %v11679_v8 }
 0x18d   : > { %3009 = vmatpush1.bf16.msra.mxu0 %v11677_v9  ;;  %v11841_v9 = vld [vmem:[#allocation7 + $0x51c] ss:$24 sps:$4 sm:$0xff]  }
 0x18e   : > { %3010 = vmatprep.subr.bf16.mxu0 %v11685_v10  ;;  %v850_v10 = vld [vmem:[#allocation20] sm:$0x1] }
 0x191   : > { %3011 = vmatpush1.bf16.msra.mxu0 %v11683_v11  ;;  %v11839_v11 = vld [vmem:[#allocation7 + $0x518] ss:$24 sps:$4 sm:$0xff]  }
 0x192   : > { %3012 = vmatprep.subr.bf16.mxu0 %v11691_v12 }
 0x195   : > { %3013 = vmatpush1.bf16.msra.mxu0 %v11689_v13 }
 0x196   : > { %3014 = vmatprep.subr.bf16.mxu0 %v11697_v14  ;;  %v11847_v14 = vld [vmem:[#allocation7 + $0x4ec] ss:$24 sps:$4 sm:$0xff]  }
 0x199   : > { %3015 = vmatpush1.bf16.msra.mxu0 %v11695_v15  ;;  %v11845_v15 = vld [vmem:[#allocation7 + $0x4e8] ss:$24 sps:$4 sm:$0xff]  }
 0x19a   : > { %3016 = vmatprep.subr.bf16.mxu0 %v11703_v16 }
 0x19d   : > { %3017 = vmatpush1.bf16.msra.mxu0 %v11701_v17 }
 0x19e   : > { %3018 = vmatprep.subr.bf16.mxu0 %v11709_v18 }
 0x1a1   : > { %3019 = vmatpush1.bf16.msra.mxu0 %v11707_v19  ;;  %v11853_v19 = vld [vmem:[#allocation7 + $0x4bc] ss:$24 sps:$4 sm:$0xff]  }
 0x1a2   : > { %3020 = vmatprep.subr.bf16.mxu0 %v11715_v20 }
 0x1a5   : > { %3021 = vmatpush1.bf16.msra.mxu0 %v11713_v21  ;;  %v11851_v21 = vld [vmem:[#allocation7 + $0x4b8] ss:$24 sps:$4 sm:$0xff]  }
 0x1a6   : > { %3022 = vmatprep.subr.bf16.mxu0 %v11721_v22 }
 0x1a9   : > { %3023 = vmatpush2.bf16.msra.mxu0 %v11719_v23 }
 0x1aa   : > { %3024 = vmatprep.subr.bf16.mxu0 %v11727_v24  ;;  %v11668_v24 = vld [vmem:[#allocation7 + $0x450] ss:$24 sps:$4 sm:$0xff]  }
 0x1ad   : > { %3025 = vmatpush2.bf16.msra.mxu0 %v11725_v25 }
 0x1ae   : > { %3026 = vmatprep.subr.bf16.mxu0 %v11733_v26  ;;  %v11859_v26 = vld [vmem:[#allocation7 + $0x48c] ss:$24 sps:$4 sm:$0xff]  }
 0x1b1   : > { %3027 = vmatpush2.bf16.msra.mxu0 %v11731_v27  ;;  %v11857_v27 = vld [vmem:[#allocation7 + $0x488] ss:$24 sps:$4 sm:$0xff]  }
 0x1b2   : > { %3028 = vmatprep.subr.bf16.mxu0 %v11739_v28 }
 0x1b5   : > { %3029 = vmatpush2.bf16.msra.mxu0 %v11737_v29  ;;  %v11676_v29 = vld [vmem:[#allocation7 + $0x424] ss:$24 sps:$4 sm:$0xff]  }
 0x1b6   : > { %3030 = vmatprep.subr.bf16.mxu0 %v11745_v30  ;;  %v11865_v30 = vld [vmem:[#allocation7 + $0x164] ss:$24 sps:$4 sm:$0xff]  }
 0x1b9   : > { %3031 = vmatpush2.bf16.msra.mxu0 %v11743_v31  ;;  %v11674_v31 = vld [vmem:[#allocation7 + $0x420] ss:$24 sps:$4 sm:$0xff]  }
 0x1ba   : > { %3032 = vmatprep.subr.bf16.mxu0 %v11751_v32  ;;  %v11682_v32 = vld [vmem:[#allocation7 + $0x3f4] ss:$24 sps:$4 sm:$0xff]  }
 0x1bd   : > { %3033 = vmatpush2.bf16.msra.mxu0 %v11749_v33  ;;  %v13385_v33 = vld [vmem:[%s14198_s5 + $0x10] sm:$0xff]  ;;  %s705_s5 = scalar_lea.vmem [#allocation24], %s14194_s0 }
 0x1be   : > { %3034 = vmatprep.subr.bf16.mxu0 %v11757_v34  ;;  %v14331_v34 = vpack.c.bf16 %v13385_v33, %v13385_v33  ;;  %v11764_v33 = vld [vmem:[#allocation7 + $0x158] ss:$24 sps:$4 sm:$0xff]   ;;  %s9872_s14 = sshll.u32 %s705_s5, 4  ;;  %s9873_s14 = int_to_ptr.vmem [resolvable:$true] %s9872_s14 }
 0x1bf   : > { %s13730_s16 = scalar_lea.vmem %s9873_s14, 16  ;;  %p13737_p8 = scmp.lt.s32.totalorder %s9873_s14, %s13735_s6 }
 0x1c0   : > { %p13731_p1 = scmp.ne.s32.totalorder %s9873_s14, %s13730_s16  ;;  %p13738_p10 = scmp.lt.s32.totalorder %s13736_s22, %s13730_s16 }
 0x1c1   : > { %3035 = vmatpush2.bf16.msra.mxu0 %v11755_v35  ;;  %v11863_v35 = vld [vmem:[#allocation7 + $0x160] ss:$24 sps:$4 sm:$0xff]  }
 0x1c2   : > { %3036 = vmatprep.subr.bf16.mxu0 %v11763_v36  ;;  %v11871_v36 = vld [vmem:[#allocation7 + $0x134] ss:$24 sps:$4 sm:$0xff]   ;;  %p13732_p3 = pnand %p13731_p1, %p14827_p7  ;;  %p13739_p11 = por %p13738_p10, %p13737_p8 }
 0x1c4   : > { %p13733_p9 = pneg %p13732_p3 }
 0x1c5   : > { %3037 = vmatpush2.bf16.msra.mxu0 %v11761_v37  ;;  %v11680_v37 = vld [vmem:[#allocation7 + $0x3f0] ss:$24 sps:$4 sm:$0xff]  }
 0x1c6   : > { %3088 = vmatprep.subr.bf16.mxu0 %v11769_v42  ;;  %v11877_v42 = vld [vmem:[#allocation7 + $0x104] ss:$24 sps:$4 sm:$0xff]   ;;  %p13740_p12 = pnand %p13739_p11, %p13733_p9 }
 0x1c8   : > { %3039 = vmatmul.mubr.bf16.vlgmr.msra.gmra.mxu0 %v14321_v41 }
 0x1c9   : > { %3089 = vmatpush1.bf16.msra.mxu0 %v11767_v43  ;;  %3120 = vmatprep.mubr.bf16.mxu0 %v14325_v45  ;;  %v11686_v43 = vld [vmem:[#allocation7 + $0x3c0] ss:$24 sps:$4 sm:$0xff]  }
 0x1ca   : > { %3090 = vmatprep.subr.bf16.mxu0 %v11775_v46  ;;  %v11875_v46 = vld [vmem:[#allocation7 + $0x100] ss:$24 sps:$4 sm:$0xff]  }
 0x1cd   : > { %3091 = vmatpush1.bf16.msra.mxu0 %v11773_v47  ;;  %v11883_v47 = vld [vmem:[#allocation7 + $0xd4] ss:$24 sps:$4 sm:$0xff]  }
 0x1ce   : > { %3092 = vmatprep.subr.bf16.mxu0 %v11781_v48  ;;  %v11692_v48 = vld [vmem:[#allocation7 + $0x390] ss:$24 sps:$4 sm:$0xff]  }
 0x1d1   : > { %3093 = vmatpush1.bf16.msra.mxu0 %v11779_v49  ;;  %v11700_v49 = vld [vmem:[#allocation7 + $0x364] ss:$24 sps:$4 sm:$0xff]  }
 0x1d2   : > { %3094 = vmatprep.subr.bf16.mxu0 %v11787_v50  ;;  %v11881_v50 = vld [vmem:[#allocation7 + $0xd0] ss:$24 sps:$4 sm:$0xff]  }
 0x1d5   : > { %3095 = vmatpush1.bf16.msra.mxu0 %v11785_v51  ;;  %v11889_v51 = vld [vmem:[#allocation7 + $0xa4] ss:$24 sps:$4 sm:$0xff]  }
 0x1d6   : > { %3096 = vmatprep.subr.bf16.mxu0 %v11793_v52  ;;  %v11698_v52 = vld [vmem:[#allocation7 + $0x360] ss:$24 sps:$4 sm:$0xff]  }
 0x1d9   : > { %3097 = vmatpush1.bf16.msra.mxu0 %v11791_v53  ;;  %v11706_v53 = vld [vmem:[#allocation7 + $0x334] ss:$24 sps:$4 sm:$0xff]  }
 0x1da   : > { %3098 = vmatprep.subr.bf16.mxu0 %v11799_v54  ;;  %v11887_v54 = vld [vmem:[#allocation7 + $0xa0] ss:$24 sps:$4 sm:$0xff]  }
 0x1dd   : > { %3099 = vmatpush1.bf16.msra.mxu0 %v11797_v55  ;;  %v11895_v55 = vld [vmem:[#allocation7 + $0x74] ss:$24 sps:$4 sm:$0xff]  }
 0x1de   : > { %3100 = vmatprep.subr.bf16.mxu0 %v11805_v56  ;;  %v11704_v56 = vld [vmem:[#allocation7 + $0x330] ss:$24 sps:$4 sm:$0xff]  }
 0x1e1   : > { %3101 = vmatpush1.bf16.msra.mxu0 %v11803_v57  ;;  %v11712_v57 = vld [vmem:[#allocation7 + $0x304] ss:$24 sps:$4 sm:$0xff]  }
 0x1e2   : > { %3102 = vmatprep.subr.bf16.mxu0 %v11811_v58  ;;  %v11893_v58 = vld [vmem:[#allocation7 + $0x70] ss:$24 sps:$4 sm:$0xff]  }
 0x1e5   : > { %3103 = vmatpush1.bf16.msra.mxu0 %v11809_v59  ;;  %v11901_v59 = vld [vmem:[#allocation7 + $0x44] ss:$24 sps:$4 sm:$0xff]  }
 0x1e6   : > { %3104 = vmatprep.subr.bf16.mxu0 %v11817_v60  ;;  %v11710_v60 = vld [vmem:[#allocation7 + $0x300] ss:$24 sps:$4 sm:$0xff]  }
 0x1e8   : > { %v11314_v2 = vpop.f32.mrf.mxu0 }
 0x1e9   : > { %3105 = vmatpush2.bf16.msra.mxu0 %v11815_v61  ;;  %v11349_v8 = vpop.f32.mrf.mxu1  ;;  %v11718_v61 = vld [vmem:[#allocation7 + $0x5d4] ss:$24 sps:$4 sm:$0xff]  }
 0x1ea   : > { %3106 = vmatprep.subr.bf16.mxu0 %v11823_v62  ;;  %v11315_v6 = vpop.f32.mrf.mxu0  ;;  %v11899_v62 = vld [vmem:[#allocation7 + $0x40] ss:$24 sps:$4 sm:$0xff]  }
 0x1eb   : > { %v11316_v12 = vadd.f32 %v11315_v6, %v11314_v2  ;;  %v11350_v13 = vpop.f32.mrf.mxu1  ;;  %v11905_v2 = vld [vmem:[#allocation7 + $0x10] ss:$24 sps:$4 sm:$0xff]   ;;  %v11730_v6 = vld [vmem:[#allocation7 + $0x574] ss:$24 sps:$4 sm:$0xff]  }
 0x1ec   : > { %v11351_v17 = vadd.f32 %v11350_v13, %v11349_v8  ;;  %v11911_v8 = vld [vmem:[#allocation7 + $0x2e0] ss:$24 sps:$4 sm:$0xff]   ;;  %v11925_v13 = vld [vmem:[#allocation7 + $0x284] ss:$24 sps:$4 sm:$0xff]  }
 0x1ed   : > { %3107 = vmatpush2.bf16.msra.mxu0 %v11821_v63  ;;  %v918_v16 = vadd.f32 %v11316_v12, %v850_v10  ;;  %v11907_v63 = vld [vmem:[#allocation7 + $0x14] ss:$24 sps:$4 sm:$0xff]   ;;  %v11728_v10 = vld [vmem:[#allocation7 + $0x570] ss:$24 sps:$4 sm:$0xff]  }
 0x1ee   : > { %3108 = vmatprep.subr.bf16.mxu0 %v11829_v0  ;;  %v11716_v0 = vld [vmem:[#allocation7 + $0x5d0] ss:$24 sps:$4 sm:$0xff]  }
 0x1ef   : > { %v988_v22 = vadd.f32 %v11351_v17, %v918_v16  ;;  %v11917_v12 = vld [vmem:[#allocation7 + $0x2b0] ss:$24 sps:$4 sm:$0xff]   ;;  %v11923_v16 = vld [vmem:[#allocation7 + $0x280] ss:$24 sps:$4 sm:$0xff]   ;;  %v11931_v17 = vld [vmem:[#allocation7 + $0x254] ss:$24 sps:$4 sm:$0xff]  }
 0x1f1   : > { %3109 = vmatpush2.bf16.msra.mxu0 %v11827_v1  ;;  %v11724_v1 = vld [vmem:[#allocation7 + $0x5a4] ss:$24 sps:$4 sm:$0xff]  }
 0x1f2   : > { %3110 = vmatprep.subr.bf16.mxu0 %v11835_v4  ;;  %v11913_v4 = vld [vmem:[#allocation7 + $0x2e4] ss:$24 sps:$4 sm:$0xff]  }
 0x1f5   : > { %3111 = vmatpush2.bf16.msra.mxu0 %v11833_v5  ;;  %v11722_v5 = vld [vmem:[#allocation7 + $0x5a0] ss:$24 sps:$4 sm:$0xff]  }
 0x1f6   : > { %3112 = vmatprep.subr.bf16.mxu0 %v11841_v9  ;;  %v11919_v9 = vld [vmem:[#allocation7 + $0x2b4] ss:$24 sps:$4 sm:$0xff]  }
 0x1f9   : > { %3113 = vmatpush2.bf16.msra.mxu0 %v11839_v11  ;;  %v11736_v11 = vld [vmem:[#allocation7 + $0x544] ss:$24 sps:$4 sm:$0xff]  }
 0x1fa   : > { %3114 = vmatprep.subr.bf16.mxu0 %v11847_v14  ;;  %v11734_v14 = vld [vmem:[#allocation7 + $0x540] ss:$24 sps:$4 sm:$0xff]  }
 0x1fd   : > { %3115 = vmatpush2.bf16.msra.mxu0 %v11845_v15  ;;  %v11742_v15 = vld [vmem:[#allocation7 + $0x514] ss:$24 sps:$4 sm:$0xff]  }
 0x1fe   : > { %3116 = vmatprep.subr.bf16.mxu0 %v11853_v19  ;;  %v11748_v19 = vld [vmem:[#allocation7 + $0x4e4] ss:$24 sps:$4 sm:$0xff]  }
 0x201   : > { %3117 = vmatpush2.bf16.msra.mxu0 %v11851_v21  ;;  %v11937_v21 = vld [vmem:[#allocation7 + $0x224] ss:$24 sps:$4 sm:$0xff]  }
 0x202   : > { %3118 = vmatprep.subr.bf16.mxu0 %v11859_v26  ;;  %v11752_v26 = vld [vmem:[#allocation7 + $0x4b0] ss:$24 sps:$4 sm:$0xff]  }
 0x205   : > { %3119 = vmatpush2.bf16.msra.mxu0 %v11857_v27  ;;  %v11760_v27 = vld [vmem:[#allocation7 + $0x484] ss:$24 sps:$4 sm:$0xff]  }
 0x206   : > { %3170 = vmatprep.subr.bf16.mxu0 %v11865_v30  ;;  %v11758_v30 = vld [vmem:[#allocation7 + $0x480] ss:$24 sps:$4 sm:$0xff]  }
 0x208   : > { %v11384_v18 = vpop.f32.mrf.mxu0  ;;  %3121 = vmatmul.mubr.bf16.vlgmr.msra.gmra.mxu0 %v14331_v34 }
 0x209   : > { %3171 = vmatpush1.bf16.msra.mxu0 %v11863_v35  ;;  %3202 = vmatprep.mubr.bf16.mxu0 %v14310_v3  ;;  %v11955_v35 = vld [vmem:[#allocation7 + $0x194] ss:$24 sps:$4 sm:$0xff]  }
 0x20a   : > { %v11385_v20 = vpop.f32.mrf.mxu0  ;;  %3172 = vmatprep.subr.bf16.mxu0 %v11871_v36  ;;  %v11953_v36 = vld [vmem:[#allocation7 + $0x190] ss:$24 sps:$4 sm:$0xff]  }
 0x20b   : > { %v11386_v23 = vadd.f32 %v11385_v20, %v11384_v18  ;;  %v11740_v18 = vld [vmem:[#allocation7 + $0x510] ss:$24 sps:$4 sm:$0xff]  }
 0x20c   : > { %v11929_v20 = vld [vmem:[#allocation7 + $0x250] ss:$24 sps:$4 sm:$0xff]  }
 0x20d   : > { %v1058_v25 = vadd.f32 %v11386_v23, %v988_v22  ;;  %3173 = vmatpush1.bf16.msra.mxu0 %v11869_v40  ;;  %v11746_v22 = vld [vmem:[#allocation7 + $0x4e0] ss:$24 sps:$4 sm:$0xff]   ;;  %v11754_v23 = vld [vmem:[#allocation7 + $0x4b4] ss:$24 sps:$4 sm:$0xff]   ;;  %v11961_v40 = vld [vmem:[#allocation7 + $0x764] ss:$24 sps:$4 sm:$0xff]  }
 0x20e   : > { %3174 = vmatprep.subr.bf16.mxu0 %v11877_v42  ;;  %v11959_v42 = vld [vmem:[#allocation7 + $0x760] ss:$24 sps:$4 sm:$0xff]  }
 0x20f   : > { %v1061_v28 = vmax.f32 %v1058_v25, 0.0  ;;  %v11943_v25 = vld [vmem:[#allocation7 + $0x1f4] ss:$24 sps:$4 sm:$0xff]  }
 0x211   : > { %11437 = vmatmul.mubr.f32.vlgmr.msra.gmra.mxu1 %v1061_v28  ;;  %3175 = vmatpush1.bf16.msra.mxu0 %v11875_v46  ;;  %v11941_v28 = vld [vmem:[#allocation7 + $0x1f0] ss:$24 sps:$4 sm:$0xff]   ;;  %v11967_v46 = vld [vmem:[#allocation7 + $0x734] ss:$24 sps:$4 sm:$0xff]  }
 0x212   : > { %2966 = vmatpush1.bf16.msra.mxu1 %v11668_v24  ;;  %2997 = vmatprep.mubr.bf16.mxu1 %v14325_v45  ;;  %v11935_v24 = vld [vmem:[#allocation7 + $0x220] ss:$24 sps:$4 sm:$0xff]  }
 0x213   : > { %2967 = vmatprep.subr.bf16.mxu1 %v11676_v29  ;;  %3176 = vmatprep.subr.bf16.mxu0 %v11883_v47  ;;  %v11949_v29 = vld [vmem:[#allocation7 + $0x1c4] ss:$24 sps:$4 sm:$0xff]   ;;  %v11965_v47 = vld [vmem:[#allocation7 + $0x730] ss:$24 sps:$4 sm:$0xff]  }
 0x215   : > { %3177 = vmatpush1.bf16.msra.mxu0 %v11881_v50  ;;  %v11973_v50 = vld [vmem:[#allocation7 + $0x704] ss:$24 sps:$4 sm:$0xff]  }
 0x216   : > { %2968 = vmatpush1.bf16.msra.mxu1 %v11674_v31  ;;  %3178 = vmatprep.subr.bf16.mxu0 %v11889_v51  ;;  %v11766_v31 = vld [vmem:[#allocation7 + $0x15c] ss:$24 sps:$4 sm:$0xff]  }
 0x217   : > { %2969 = vmatprep.subr.bf16.mxu1 %v11682_v32  ;;  %v11947_v32 = vld [vmem:[#allocation7 + $0x1c0] ss:$24 sps:$4 sm:$0xff]   ;;  %v11790_v51 = vld [vmem:[#allocation7 + $0x9c] ss:$24 sps:$4 sm:$0xff]  }
 0x219   : > { %3179 = vmatpush1.bf16.msra.mxu0 %v11887_v54  ;;  %v11977_v54 = vld [vmem:[#allocation7 + $0x6d0] ss:$24 sps:$4 sm:$0xff]  }
 0x21a   : > { %2970 = vmatpush1.bf16.msra.mxu1 %v11680_v37  ;;  %3180 = vmatprep.subr.bf16.mxu0 %v11895_v55  ;;  %v11772_v37 = vld [vmem:[#allocation7 + $0x12c] ss:$24 sps:$4 sm:$0xff]  }
 0x21b   : > { %2971 = vmatprep.subr.bf16.mxu1 %v11688_v38  ;;  %v11770_v38 = vld [vmem:[#allocation7 + $0x128] ss:$24 sps:$4 sm:$0xff]   ;;  %v11796_v55 = vld [vmem:[#allocation7 + $0x6c] ss:$24 sps:$4 sm:$0xff]  }
 0x21d   : > { %3181 = vmatpush1.bf16.msra.mxu0 %v11893_v58  ;;  %v11983_v58 = vld [vmem:[#allocation7 + $0x6a0] ss:$24 sps:$4 sm:$0xff]  }
 0x21e   : > { %2972 = vmatpush1.bf16.msra.mxu1 %v11686_v43  ;;  %3182 = vmatprep.subr.bf16.mxu0 %v11901_v59  ;;  %v11778_v43 = vld [vmem:[#allocation7 + $0xfc] ss:$24 sps:$4 sm:$0xff]  }
 0x21f   : > { %2973 = vmatprep.subr.bf16.mxu1 %v11694_v44  ;;  %v11776_v44 = vld [vmem:[#allocation7 + $0xf8] ss:$24 sps:$4 sm:$0xff]   ;;  %v11802_v59 = vld [vmem:[#allocation7 + $0x3c] ss:$24 sps:$4 sm:$0xff]  }
 0x221   : > { %3183 = vmatpush1.bf16.msra.mxu0 %v11899_v62  ;;  %v11808_v62 = vld [vmem:[#allocation7 + $0xc] ss:$24 sps:$4 sm:$0xff]  }
 0x222   : > { %2974 = vmatpush1.bf16.msra.mxu1 %v11692_v48  ;;  %3184 = vmatprep.subr.bf16.mxu0 %v11907_v63  ;;  %v11784_v48 = vld [vmem:[#allocation7 + $0xcc] ss:$24 sps:$4 sm:$0xff]   ;;  %v11989_v63 = vld [vmem:[#allocation7 + $0x670] ss:$24 sps:$4 sm:$0xff]  }
 0x223   : > { %2975 = vmatprep.subr.bf16.mxu1 %v11700_v49  ;;  %v11782_v49 = vld [vmem:[#allocation7 + $0xc8] ss:$24 sps:$4 sm:$0xff]  }
 0x225   : > { %3185 = vmatpush1.bf16.msra.mxu0 %v11905_v2  ;;  %v11814_v2 = vld [vmem:[#allocation7 + $0x2dc] ss:$24 sps:$4 sm:$0xff]  }
 0x226   : > { %2976 = vmatpush1.bf16.msra.mxu1 %v11698_v52  ;;  %3186 = vmatprep.subr.bf16.mxu0 %v11913_v4  ;;  %v11788_v52 = vld [vmem:[#allocation7 + $0x98] ss:$24 sps:$4 sm:$0xff]  }
 0x227   : > { %2977 = vmatprep.subr.bf16.mxu1 %v11706_v53  ;;  %v11979_v53 = vld [vmem:[#allocation7 + $0x6d4] ss:$24 sps:$4 sm:$0xff]   ;;  %v11995_v4 = vld [vmem:[#allocation7 + $0x640] ss:$24 sps:$4 sm:$0xff]  }
 0x229   : > { %3187 = vmatpush2.bf16.msra.mxu0 %v11911_v8  ;;  %v11820_v8 = vld [vmem:[#allocation7 + $0x2ac] ss:$24 sps:$4 sm:$0xff]  }
 0x22a   : > { %2978 = vmatpush1.bf16.msra.mxu1 %v11704_v56  ;;  %3188 = vmatprep.subr.bf16.mxu0 %v11919_v9  ;;  %v11794_v56 = vld [vmem:[#allocation7 + $0x68] ss:$24 sps:$4 sm:$0xff]  }
 0x22b   : > { %2979 = vmatprep.subr.bf16.mxu1 %v11712_v57  ;;  %v11985_v57 = vld [vmem:[#allocation7 + $0x6a4] ss:$24 sps:$4 sm:$0xff]   ;;  %v12001_v9 = vld [vmem:[#allocation7 + $0x610] ss:$24 sps:$4 sm:$0xff]  }
 0x22d   : > { %3189 = vmatpush2.bf16.msra.mxu0 %v11917_v12  ;;  %v11826_v12 = vld [vmem:[#allocation7 + $0x27c] ss:$24 sps:$4 sm:$0xff]  }
 0x22e   : > { %2980 = vmatpush1.bf16.msra.mxu1 %v11710_v60  ;;  %3190 = vmatprep.subr.bf16.mxu0 %v11925_v13  ;;  %v11991_v60 = vld [vmem:[#allocation7 + $0x674] ss:$24 sps:$4 sm:$0xff]   ;;  %v12007_v13 = vld [vmem:[#allocation7 + $0x8e0] ss:$24 sps:$4 sm:$0xff]  }
 0x22f   : > { %2981 = vmatprep.subr.bf16.mxu1 %v11718_v61  ;;  %v11800_v61 = vld [vmem:[#allocation7 + $0x38] ss:$24 sps:$4 sm:$0xff]  }
 0x231   : > { %3191 = vmatpush2.bf16.msra.mxu0 %v11923_v16  ;;  %v11832_v16 = vld [vmem:[#allocation7 + $0x24c] ss:$24 sps:$4 sm:$0xff]  }
 0x232   : > { %2982 = vmatpush2.bf16.msra.mxu1 %v11716_v0  ;;  %3192 = vmatprep.subr.bf16.mxu0 %v11931_v17  ;;  %v11997_v0 = vld [vmem:[#allocation7 + $0x644] ss:$24 sps:$4 sm:$0xff]   ;;  %v12013_v17 = vld [vmem:[#allocation7 + $0x8b0] ss:$24 sps:$4 sm:$0xff]  }
 0x233   : > { %2983 = vmatprep.subr.bf16.mxu1 %v11724_v1  ;;  %v11806_v1 = vld [vmem:[#allocation7 + $0x8] ss:$24 sps:$4 sm:$0xff]  }
 0x235   : > { %3193 = vmatpush2.bf16.msra.mxu0 %v11929_v20  ;;  %v11838_v20 = vld [vmem:[#allocation7 + $0x21c] ss:$24 sps:$4 sm:$0xff]  }
 0x236   : > { %2984 = vmatpush2.bf16.msra.mxu1 %v11722_v5  ;;  %3194 = vmatprep.subr.bf16.mxu0 %v11937_v21  ;;  %v12003_v5 = vld [vmem:[#allocation7 + $0x614] ss:$24 sps:$4 sm:$0xff]   ;;  %v12019_v21 = vld [vmem:[#allocation7 + $0x880] ss:$24 sps:$4 sm:$0xff]  }
 0x237   : > { %2985 = vmatprep.subr.bf16.mxu1 %v11730_v6  ;;  %v11812_v6 = vld [vmem:[#allocation7 + $0x2d8] ss:$24 sps:$4 sm:$0xff]  }
 0x239   : > { %3195 = vmatpush2.bf16.msra.mxu0 %v11935_v24  ;;  %v11844_v24 = vld [vmem:[#allocation7 + $0x1ec] ss:$24 sps:$4 sm:$0xff]  }
 0x23a   : > { %2986 = vmatpush2.bf16.msra.mxu1 %v11728_v10  ;;  %3196 = vmatprep.subr.bf16.mxu0 %v11943_v25  ;;  %v12009_v10 = vld [vmem:[#allocation7 + $0x8e4] ss:$24 sps:$4 sm:$0xff]   ;;  %v12025_v25 = vld [vmem:[#allocation7 + $0x850] ss:$24 sps:$4 sm:$0xff]  }
 0x23b   : > { %2987 = vmatprep.subr.bf16.mxu1 %v11736_v11  ;;  %v11818_v11 = vld [vmem:[#allocation7 + $0x2a8] ss:$24 sps:$4 sm:$0xff]  }
 0x23d   : > { %3197 = vmatpush2.bf16.msra.mxu0 %v11941_v28  ;;  %v11850_v28 = vld [vmem:[#allocation7 + $0x1bc] ss:$24 sps:$4 sm:$0xff]  }
 0x23e   : > { %2988 = vmatpush2.bf16.msra.mxu1 %v11734_v14  ;;  %3198 = vmatprep.subr.bf16.mxu0 %v11949_v29  ;;  %v12015_v14 = vld [vmem:[#allocation7 + $0x8b4] ss:$24 sps:$4 sm:$0xff]   ;;  %v12031_v29 = vld [vmem:[#allocation7 + $0x820] ss:$24 sps:$4 sm:$0xff]  }
 0x23f   : > { %2989 = vmatprep.subr.bf16.mxu1 %v11742_v15  ;;  %v11824_v15 = vld [vmem:[#allocation7 + $0x278] ss:$24 sps:$4 sm:$0xff]  }
 0x241   : > { %3199 = vmatpush2.bf16.msra.mxu0 %v11947_v32  ;;  %v12037_v32 = vld [vmem:[#allocation7 + $0x7f0] ss:$24 sps:$4 sm:$0xff]  }
 0x242   : > { %2990 = vmatpush2.bf16.msra.mxu1 %v11740_v18  ;;  %3200 = vmatprep.subr.bf16.mxu0 %v11955_v35  ;;  %v12021_v18 = vld [vmem:[#allocation7 + $0x884] ss:$24 sps:$4 sm:$0xff]  }
 0x243   : > { %2991 = vmatprep.subr.bf16.mxu1 %v11748_v19  ;;  %v11830_v19 = vld [vmem:[#allocation7 + $0x248] ss:$24 sps:$4 sm:$0xff]  }
 0x245   : > { %3201 = vmatpush2.bf16.msra.mxu0 %v11953_v36  ;;  %v12045_v36 = vld [vmem:[#allocation7 + $0x7c4] ss:$24 sps:$4 sm:$0xff]  }
 0x246   : > { %2992 = vmatpush2.bf16.msra.mxu1 %v11746_v22  ;;  %3252 = vmatprep.subr.bf16.mxu0 %v11961_v40  ;;  %v12027_v22 = vld [vmem:[#allocation7 + $0x854] ss:$24 sps:$4 sm:$0xff]   ;;  %v12043_v40 = vld [vmem:[#allocation7 + $0x7c0] ss:$24 sps:$4 sm:$0xff]  }
 0x247   : > { %2993 = vmatprep.subr.bf16.mxu1 %v11754_v23  ;;  %v11836_v23 = vld [vmem:[#allocation7 + $0x218] ss:$24 sps:$4 sm:$0xff]  }
 0x248   : > { %3203 = vmatmul.mubr.bf16.vlgmr.msra.gmra.mxu0 %v14313_v7  ;;  %v14339_v35 = vpop.f32.mrf.mxu0 }
 0x249   : > { %3253 = vmatpush1.bf16.msra.mxu0 %v11959_v42  ;;  %3284 = vmatprep.mubr.bf16.mxu0 %v14318_v39 }
 0x24a   : > { %2994 = vmatpush2.bf16.msra.mxu1 %v11752_v26  ;;  %3254 = vmatprep.subr.bf16.mxu0 %v11967_v46  ;;  %v12033_v26 = vld [vmem:[#allocation7 + $0x824] ss:$24 sps:$4 sm:$0xff]   ;;  %v14341_v42 = vpop.f32.mrf.mxu0  ;;  %v12051_v46 = vld [vmem:[#allocation7 + $0x794] ss:$24 sps:$4 sm:$0xff]  }
 0x24b   : > { %2995 = vmatprep.subr.bf16.mxu1 %v11760_v27  ;;  %v11842_v27 = vld [vmem:[#allocation7 + $0x1e8] ss:$24 sps:$4 sm:$0xff]  }
 0x24d   : > { %3255 = vmatpush1.bf16.msra.mxu0 %v11965_v47  ;;  %v12049_v47 = vld [vmem:[#allocation7 + $0x790] ss:$24 sps:$4 sm:$0xff]  }
 0x24e   : > { %2996 = vmatpush2.bf16.msra.mxu1 %v11758_v30  ;;  %3256 = vmatprep.subr.bf16.mxu0 %v11973_v50  ;;  %v12039_v30 = vld [vmem:[#allocation7 + $0x7f4] ss:$24 sps:$4 sm:$0xff]   ;;  %v11866_v50 = vld [vmem:[#allocation7 + $0x728] ss:$24 sps:$4 sm:$0xff]  }
 0x24f   : > { %3047 = vmatprep.subr.bf16.mxu1 %v11766_v31  ;;  %v11848_v31 = vld [vmem:[#allocation7 + $0x1b8] ss:$24 sps:$4 sm:$0xff]  }
 0x251   : > { %2998 = vmatmul.mubr.bf16.vlgmr.msra.gmra.mxu1 %v14331_v34 }
 0x252   : > { %3048 = vmatpush1.bf16.msra.mxu1 %v11764_v33  ;;  %3079 = vmatprep.mubr.bf16.mxu1 %v14310_v3  ;;  %v11971_v3 = vld [vmem:[#allocation7 + $0x700] ss:$24 sps:$4 sm:$0xff]   ;;  %v11856_v33 = vld [vmem:[#allocation7 + $0x18c] ss:$24 sps:$4 sm:$0xff]  }
 0x253   : > { %3049 = vmatprep.subr.bf16.mxu1 %v11772_v37  ;;  %3257 = vmatpush1.bf16.msra.mxu0 %v11971_v3  ;;  %v11854_v37 = vld [vmem:[#allocation7 + $0x188] ss:$24 sps:$4 sm:$0xff]   ;;  %v12057_v3 = vld [vmem:[#allocation10 + $0x454] ss:$24 sps:$4 sm:$0xff]  }
 0x254   : > { %3258 = vmatprep.subr.bf16.mxu0 %v11979_v53  ;;  %v11872_v53 = vld [vmem:[#allocation7 + $0x6f8] ss:$24 sps:$4 sm:$0xff]  }
 0x256   : > { %3050 = vmatpush1.bf16.msra.mxu1 %v11770_v38  ;;  %v11862_v38 = vld [vmem:[#allocation7 + $0x75c] ss:$24 sps:$4 sm:$0xff]  }
 0x257   : > { %3051 = vmatprep.subr.bf16.mxu1 %v11778_v43  ;;  %3259 = vmatpush1.bf16.msra.mxu0 %v11977_v54  ;;  %v11860_v43 = vld [vmem:[#allocation7 + $0x758] ss:$24 sps:$4 sm:$0xff]  }
 0x258   : > { %3260 = vmatprep.subr.bf16.mxu0 %v11985_v57  ;;  %v11880_v57 = vld [vmem:[#allocation7 + $0x6cc] ss:$24 sps:$4 sm:$0xff]  }
 0x25a   : > { %3052 = vmatpush1.bf16.msra.mxu1 %v11776_v44  ;;  %v2962_v44 = vpop.f32.mrf.mxu0 }
 0x25b   : > { %3053 = vmatprep.subr.bf16.mxu1 %v11784_v48  ;;  %3261 = vmatpush1.bf16.msra.mxu0 %v11983_v58  ;;  %v11946_v44 = vld [vmem:[#allocation7 + $0x7bc] ss:$24 sps:$4 sm:$0xff]  }
 0x25c   : > { %3262 = vmatprep.subr.bf16.mxu0 %v11991_v60  ;;  %v2963_v48 = vpop.f32.mrf.mxu0  ;;  %v11886_v60 = vld [vmem:[#allocation7 + $0x69c] ss:$24 sps:$4 sm:$0xff]  }
 0x25d   : > { %v12135_v48 = vld [vmem:[#allocation10 + $0x4e4] ss:$24 sps:$4 sm:$0xff]  }
 0x25e   : > { %3054 = vmatpush1.bf16.msra.mxu1 %v11782_v49  ;;  %v11868_v49 = vld [vmem:[#allocation7 + $0x72c] ss:$24 sps:$4 sm:$0xff]  }
 0x25f   : > { %3055 = vmatprep.subr.bf16.mxu1 %v11790_v51  ;;  %3263 = vmatpush1.bf16.msra.mxu0 %v11989_v63  ;;  %v12055_v51 = vld [vmem:[#allocation10 + $0x450] ss:$24 sps:$4 sm:$0xff]   ;;  %v12075_v63 = vld [vmem:[#allocation10 + $0x3c4] ss:$24 sps:$4 sm:$0xff]  }
 0x260   : > { %3264 = vmatprep.subr.bf16.mxu0 %v11997_v0  ;;  %v11884_v0 = vld [vmem:[#allocation7 + $0x698] ss:$24 sps:$4 sm:$0xff]  }
 0x262   : > { %3056 = vmatpush1.bf16.msra.mxu1 %v11788_v52  ;;  %v11874_v52 = vld [vmem:[#allocation7 + $0x6fc] ss:$24 sps:$4 sm:$0xff]  }
 0x263   : > { %3057 = vmatprep.subr.bf16.mxu1 %v11796_v55  ;;  %3265 = vmatpush1.bf16.msra.mxu0 %v11995_v4  ;;  %v12063_v55 = vld [vmem:[#allocation10 + $0x424] ss:$24 sps:$4 sm:$0xff]   ;;  %v12081_v4 = vld [vmem:[#allocation10 + $0x394] ss:$24 sps:$4 sm:$0xff]  }
 0x264   : > { %3266 = vmatprep.subr.bf16.mxu0 %v12003_v5  ;;  %v11890_v5 = vld [vmem:[#allocation7 + $0x668] ss:$24 sps:$4 sm:$0xff]  }
 0x266   : > { %3058 = vmatpush1.bf16.msra.mxu1 %v11794_v56 }
 0x267   : > { %3059 = vmatprep.subr.bf16.mxu1 %v11802_v59  ;;  %3267 = vmatpush1.bf16.msra.mxu0 %v12001_v9  ;;  %v11878_v59 = vld [vmem:[#allocation7 + $0x6c8] ss:$24 sps:$4 sm:$0xff]  }
 0x268   : > { %3268 = vmatprep.subr.bf16.mxu0 %v12009_v10  ;;  %v12087_v9 = vld [vmem:[#allocation10 + $0x364] ss:$24 sps:$4 sm:$0xff]   ;;  %v11896_v10 = vld [vmem:[#allocation7 + $0x638] ss:$24 sps:$4 sm:$0xff]  }
 0x26a   : > { %3060 = vmatpush1.bf16.msra.mxu1 %v11800_v61  ;;  %v12067_v61 = vld [vmem:[#allocation10 + $0x3f0] ss:$24 sps:$4 sm:$0xff]  }
 0x26b   : > { %3061 = vmatprep.subr.bf16.mxu1 %v11808_v62  ;;  %3269 = vmatpush2.bf16.msra.mxu0 %v12007_v13  ;;  %v12093_v13 = vld [vmem:[#allocation10 + $0x334] ss:$24 sps:$4 sm:$0xff]  }
 0x26c   : > { %3270 = vmatprep.subr.bf16.mxu0 %v12015_v14  ;;  %v11902_v14 = vld [vmem:[#allocation7 + $0x608] ss:$24 sps:$4 sm:$0xff]  }
 0x26e   : > { %3062 = vmatpush1.bf16.msra.mxu1 %v11806_v1  ;;  %v11892_v1 = vld [vmem:[#allocation7 + $0x66c] ss:$24 sps:$4 sm:$0xff]  }
 0x26f   : > { %3063 = vmatprep.subr.bf16.mxu1 %v11814_v2  ;;  %3271 = vmatpush2.bf16.msra.mxu0 %v12013_v17  ;;  %v12073_v2 = vld [vmem:[#allocation10 + $0x3c0] ss:$24 sps:$4 sm:$0xff]   ;;  %v12099_v17 = vld [vmem:[#allocation10 + $0x304] ss:$24 sps:$4 sm:$0xff]  }
 0x270   : > { %3272 = vmatprep.subr.bf16.mxu0 %v12021_v18  ;;  %v11908_v18 = vld [vmem:[#allocation7 + $0x8d8] ss:$24 sps:$4 sm:$0xff]  }
 0x272   : > { %3064 = vmatpush2.bf16.msra.mxu1 %v11812_v6  ;;  %v11898_v6 = vld [vmem:[#allocation7 + $0x63c] ss:$24 sps:$4 sm:$0xff]  }
 0x273   : > { %3065 = vmatprep.subr.bf16.mxu1 %v11820_v8  ;;  %3273 = vmatpush2.bf16.msra.mxu0 %v12019_v21  ;;  %v12079_v8 = vld [vmem:[#allocation10 + $0x390] ss:$24 sps:$4 sm:$0xff]   ;;  %v12105_v21 = vld [vmem:[#allocation10 + $0x5d4] ss:$24 sps:$4 sm:$0xff]  }
 0x274   : > { %3274 = vmatprep.subr.bf16.mxu0 %v12027_v22  ;;  %v11914_v22 = vld [vmem:[#allocation7 + $0x8a8] ss:$24 sps:$4 sm:$0xff]  }
 0x276   : > { %3066 = vmatpush2.bf16.msra.mxu1 %v11818_v11  ;;  %v11904_v11 = vld [vmem:[#allocation7 + $0x60c] ss:$24 sps:$4 sm:$0xff]  }
 0x277   : > { %3067 = vmatprep.subr.bf16.mxu1 %v11826_v12  ;;  %3275 = vmatpush2.bf16.msra.mxu0 %v12025_v25  ;;  %v12085_v12 = vld [vmem:[#allocation10 + $0x360] ss:$24 sps:$4 sm:$0xff]   ;;  %v12111_v25 = vld [vmem:[#allocation10 + $0x5a4] ss:$24 sps:$4 sm:$0xff]  }
 0x278   : > { %3276 = vmatprep.subr.bf16.mxu0 %v12033_v26  ;;  %v11920_v26 = vld [vmem:[#allocation7 + $0x878] ss:$24 sps:$4 sm:$0xff]  }
 0x27a   : > { %3068 = vmatpush2.bf16.msra.mxu1 %v11824_v15  ;;  %v11910_v15 = vld [vmem:[#allocation7 + $0x8dc] ss:$24 sps:$4 sm:$0xff]  }
 0x27b   : > { %3069 = vmatprep.subr.bf16.mxu1 %v11832_v16  ;;  %3277 = vmatpush2.bf16.msra.mxu0 %v12031_v29  ;;  %v12091_v16 = vld [vmem:[#allocation10 + $0x330] ss:$24 sps:$4 sm:$0xff]   ;;  %v12117_v29 = vld [vmem:[#allocation10 + $0x574] ss:$24 sps:$4 sm:$0xff]  }
 0x27c   : > { %3278 = vmatprep.subr.bf16.mxu0 %v12039_v30  ;;  %v11926_v30 = vld [vmem:[#allocation7 + $0x848] ss:$24 sps:$4 sm:$0xff]  }
 0x27e   : > { %3070 = vmatpush2.bf16.msra.mxu1 %v11830_v19  ;;  %v11916_v19 = vld [vmem:[#allocation7 + $0x8ac] ss:$24 sps:$4 sm:$0xff]  }
 0x27f   : > { %3071 = vmatprep.subr.bf16.mxu1 %v11838_v20  ;;  %3279 = vmatpush2.bf16.msra.mxu0 %v12037_v32  ;;  %v12097_v20 = vld [vmem:[#allocation10 + $0x300] ss:$24 sps:$4 sm:$0xff]   ;;  %v12115_v32 = vld [vmem:[#allocation10 + $0x570] ss:$24 sps:$4 sm:$0xff]  }
 0x280   : > { %3280 = vmatprep.subr.bf16.mxu0 %v12045_v36  ;;  %v11932_v36 = vld [vmem:[#allocation7 + $0x818] ss:$24 sps:$4 sm:$0xff]  }
 0x282   : > { %3072 = vmatpush2.bf16.msra.mxu1 %v11836_v23  ;;  %v11922_v23 = vld [vmem:[#allocation7 + $0x87c] ss:$24 sps:$4 sm:$0xff]  }
 0x283   : > { %3073 = vmatprep.subr.bf16.mxu1 %v11844_v24  ;;  %3281 = vmatpush2.bf16.msra.mxu0 %v12043_v40  ;;  %v12103_v24 = vld [vmem:[#allocation10 + $0x5d0] ss:$24 sps:$4 sm:$0xff]   ;;  %v12129_v40 = vld [vmem:[#allocation10 + $0x514] ss:$24 sps:$4 sm:$0xff]  }
 0x284   : > { %3282 = vmatprep.subr.bf16.mxu0 %v12051_v46  ;;  %v12127_v46 = vld [vmem:[#allocation10 + $0x510] ss:$24 sps:$4 sm:$0xff]  }
 0x286   : > { %3074 = vmatpush2.bf16.msra.mxu1 %v11842_v27  ;;  %v11928_v27 = vld [vmem:[#allocation7 + $0x84c] ss:$24 sps:$4 sm:$0xff]  }
 0x287   : > { %3075 = vmatprep.subr.bf16.mxu1 %v11850_v28  ;;  %3283 = vmatpush2.bf16.msra.mxu0 %v12049_v47  ;;  %v12109_v28 = vld [vmem:[#allocation10 + $0x5a0] ss:$24 sps:$4 sm:$0xff]   ;;  %v2894_v47 = vlaneseq }
 0x288   : > { %5137 = vmatprep.subr.bf16.mxu0 %v12057_v3  ;;  %v14345_v54 = vpop.f32.mrf.mxu0  ;;  %v12133_v3 = vld [vmem:[#allocation10 + $0x4e0] ss:$24 sps:$4 sm:$0xff]  }
 0x28a   : > { %3076 = vmatpush2.bf16.msra.mxu1 %v11848_v31  ;;  %3285 = vmatmul.mubr.bf16.vlgmr.msra.gmra.mxu0 %v14321_v41  ;;  %v14348_v56 = vpop.f32.mrf.mxu0  ;;  %v11934_v31 = vld [vmem:[#allocation7 + $0x81c] ss:$24 sps:$4 sm:$0xff]  }
 0x28b   : > { %3077 = vmatprep.subr.bf16.mxu1 %v11856_v33  ;;  %5138 = vmatpush1.bf16.msra.mxu0 %v12055_v51  ;;  %v12123_v33 = vld [vmem:[#allocation10 + $0x544] ss:$24 sps:$4 sm:$0xff]   ;;  %v14351_v51 = vshrl.u32 %v2894_v47, 7 }
 0x28c   : > { %5139 = vmatprep.subr.bf16.mxu0 %v12063_v55  ;;  %v3044_v58 = vpop.f32.mrf.mxu0  ;;  %v11958_v55 = vld [vmem:[#allocation7 + $0x464] ss:$24 sps:$4 sm:$0xff]  }
 0x28d   : > { %v11956_v58 = vld [vmem:[#allocation7 + $0x460] ss:$24 sps:$4 sm:$0xff]  }
 0x28e   : > { %3078 = vmatpush2.bf16.msra.mxu1 %v11854_v37  ;;  %v3045_v62 = vpop.f32.mrf.mxu0  ;;  %v11940_v37 = vld [vmem:[#allocation7 + $0x7ec] ss:$24 sps:$4 sm:$0xff]  }
 0x28f   : > { %3129 = vmatprep.subr.bf16.mxu1 %v11862_v38  ;;  %v12121_v38 = vld [vmem:[#allocation10 + $0x540] ss:$24 sps:$4 sm:$0xff]   ;;  %v14363_v62 = vsub.s32 2, %v14351_v51 }
 0x291   : > { %3080 = vmatmul.mubr.bf16.vlgmr.msra.gmra.mxu1 %v14313_v7  ;;  %v12061_v7 = vld [vmem:[#allocation10 + $0x420] ss:$24 sps:$4 sm:$0xff]  }
 0x292   : > { %3130 = vmatpush1.bf16.msra.mxu1 %v11860_v43  ;;  %3161 = vmatprep.mubr.bf16.mxu1 %v14318_v39  ;;  %v12069_v39 = vld [vmem:[#allocation10 + $0x3f4] ss:$24 sps:$4 sm:$0xff]   ;;  %v11938_v43 = vld [vmem:[#allocation7 + $0x7e8] ss:$24 sps:$4 sm:$0xff]  }
 0x293   : > { %3131 = vmatprep.subr.bf16.mxu1 %v11868_v49  ;;  %5140 = vmatpush1.bf16.msra.mxu0 %v12061_v7  ;;  %v11944_v49 = vld [vmem:[#allocation7 + $0x7b8] ss:$24 sps:$4 sm:$0xff]  }
 0x294   : > { %5141 = vmatprep.subr.bf16.mxu0 %v12069_v39  ;;  %v12139_v7 = vld [vmem:[#allocation10 + $0x4b0] ss:$24 sps:$4 sm:$0xff]   ;;  %v14357_v39 = vsub.s32 3, %v14351_v51 }
 0x296   : > { %3132 = vmatpush1.bf16.msra.mxu1 %v11866_v50  ;;  %v11952_v50 = vld [vmem:[#allocation7 + $0x78c] ss:$24 sps:$4 sm:$0xff]  }
 0x297   : > { %3133 = vmatprep.subr.bf16.mxu1 %v11874_v52  ;;  %5142 = vmatpush1.bf16.msra.mxu0 %v12067_v61  ;;  %v12141_v52 = vld [vmem:[#allocation10 + $0x4b4] ss:$24 sps:$4 sm:$0xff]   ;;  %v12147_v61 = vld [vmem:[#allocation10 + $0x484] ss:$24 sps:$4 sm:$0xff]  }
 0x298   : > { %5143 = vmatprep.subr.bf16.mxu0 %v12075_v63  ;;  %v12145_v63 = vld [vmem:[#allocation10 + $0x480] ss:$24 sps:$4 sm:$0xff]  }
 0x29a   : > { %3134 = vmatpush1.bf16.msra.mxu1 %v11872_v53  ;;  %v11950_v53 = vld [vmem:[#allocation7 + $0x788] ss:$24 sps:$4 sm:$0xff]  }
 0x29b   : > { %3135 = vmatprep.subr.bf16.mxu1 %v11880_v57  ;;  %5144 = vmatpush1.bf16.msra.mxu0 %v12073_v2  ;;  %v14354_v57 = vld [vmem:[%s14208_s2] sm:$0x3f] }
 0x29c   : > { %5145 = vmatprep.subr.bf16.mxu0 %v12081_v4  ;;  %v3311_v4 = vrot.slane %v14354_v57, %v14363_v62 }
 0x29e   : > { %3136 = vmatpush1.bf16.msra.mxu1 %v11878_v59  ;;  %v1078_v59 = vld [vmem:[#allocation22] sm:$0x1] }
 0x29f   : > { %3137 = vmatprep.subr.bf16.mxu1 %v11886_v60  ;;  %5146 = vmatpush1.bf16.msra.mxu0 %v12079_v8  ;;  %v14360_v60 = vsub.s32 1, %v14351_v51 }
 0x2a0   : > { %5147 = vmatprep.subr.bf16.mxu0 %v12087_v9  ;;  %v14374_v9 = vpack.c.bf16 %v3311_v4, %v3311_v4  ;;  %v12024_v4 = vld [vmem:[#allocation7 + $0x554] ss:$24 sps:$4 sm:$0xff]  }
 0x2a1   : > { %v3307_v2 = vrot.slane %v14354_v57, %v14360_v60 }
 0x2a2   : > { %3138 = vmatpush1.bf16.msra.mxu1 %v11884_v0  ;;  %v3315_v0 = vrot.slane %v14354_v57, %v14357_v39 }
 0x2a3   : > { %3139 = vmatprep.subr.bf16.mxu1 %v11892_v1  ;;  %5148 = vmatpush1.bf16.msra.mxu0 %v12085_v12  ;;  %v11964_v1 = vld [vmem:[#allocation7 + $0x434] ss:$24 sps:$4 sm:$0xff]  }
 0x2a4   : > { %5149 = vmatprep.subr.bf16.mxu0 %v12093_v13  ;;  %v12151_v12 = vld [vmem:[#allocation10 + $0x158] ss:$24 sps:$4 sm:$0xff]  }
 0x2a6   : > { %3140 = vmatpush1.bf16.msra.mxu1 %v11890_v5  ;;  %v11962_v5 = vld [vmem:[#allocation7 + $0x430] ss:$24 sps:$4 sm:$0xff]  }
 0x2a7   : > { %3141 = vmatprep.subr.bf16.mxu1 %v11898_v6  ;;  %5150 = vmatpush1.bf16.msra.mxu0 %v12091_v16  ;;  %v14371_v6 = vpack.c.bf16 %v3315_v0, %v3315_v0 }
 0x2a8   : > { %5151 = vmatprep.subr.bf16.mxu0 %v12099_v17  ;;  %v11968_v17 = vld [vmem:[#allocation7 + $0x400] ss:$24 sps:$4 sm:$0xff]  }
 0x2a9   : > { %5169 = vmatprep.mubr.bf16.mxu0 %v14371_v6 }
 0x2aa   : > { %3142 = vmatpush1.bf16.msra.mxu1 %v11896_v10  ;;  %v12153_v10 = vld [vmem:[#allocation10 + $0x15c] ss:$24 sps:$4 sm:$0xff]  }
 0x2ab   : > { %3143 = vmatprep.subr.bf16.mxu1 %v11904_v11  ;;  %5152 = vmatpush1.bf16.msra.mxu0 %v12097_v20  ;;  %v11976_v20 = vld [vmem:[#allocation7 + $0x3d4] ss:$24 sps:$4 sm:$0xff]  }
 0x2ac   : > { %5153 = vmatprep.subr.bf16.mxu0 %v12105_v21 }
 0x2ae   : > { %3144 = vmatpush1.bf16.msra.mxu1 %v11902_v14  ;;  %v11970_v14 = vld [vmem:[#allocation7 + $0x404] ss:$24 sps:$4 sm:$0xff]  }
 0x2af   : > { %3145 = vmatprep.subr.bf16.mxu1 %v11910_v15  ;;  %5154 = vmatpush2.bf16.msra.mxu0 %v12103_v24  ;;  %v14377_v15 = vpack.c.bf16 %v3307_v2, %v3307_v2  ;;  %v11982_v24 = vld [vmem:[#allocation7 + $0x3a4] ss:$24 sps:$4 sm:$0xff]   ;;  %v12016_v2 = vld [vmem:[#allocation7 + $0x580] ss:$24 sps:$4 sm:$0xff]  }
 0x2b0   : > { %5155 = vmatprep.subr.bf16.mxu0 %v12111_v25  ;;  %v12163_v25 = vld [vmem:[#allocation10 + $0xf8] ss:$24 sps:$4 sm:$0xff]  }
 0x2b2   : > { %3146 = vmatpush2.bf16.msra.mxu1 %v11908_v18  ;;  %v12159_v18 = vld [vmem:[#allocation10 + $0x12c] ss:$24 sps:$4 sm:$0xff]  }
 0x2b3   : > { %3147 = vmatprep.subr.bf16.mxu1 %v11916_v19  ;;  %5156 = vmatpush2.bf16.msra.mxu0 %v12109_v28  ;;  %v12157_v19 = vld [vmem:[#allocation10 + $0x128] ss:$24 sps:$4 sm:$0xff]   ;;  %v11980_v28 = vld [vmem:[#allocation7 + $0x3a0] ss:$24 sps:$4 sm:$0xff]  }
 0x2b4   : > { %5157 = vmatprep.subr.bf16.mxu0 %v12117_v29  ;;  %v11988_v29 = vld [vmem:[#allocation7 + $0x374] ss:$24 sps:$4 sm:$0xff]  }
 0x2b6   : > { %3148 = vmatpush2.bf16.msra.mxu1 %v11914_v22  ;;  %v12165_v22 = vld [vmem:[#allocation10 + $0xfc] ss:$24 sps:$4 sm:$0xff]  }
 0x2b7   : > { %3149 = vmatprep.subr.bf16.mxu1 %v11922_v23  ;;  %5158 = vmatpush2.bf16.msra.mxu0 %v12115_v32  ;;  %v11974_v23 = vld [vmem:[#allocation7 + $0x3d0] ss:$24 sps:$4 sm:$0xff]  }
 0x2b8   : > { %5159 = vmatprep.subr.bf16.mxu0 %v12123_v33  ;;  %v11986_v32 = vld [vmem:[#allocation7 + $0x370] ss:$24 sps:$4 sm:$0xff]   ;;  %v11994_v33 = vld [vmem:[#allocation7 + $0x344] ss:$24 sps:$4 sm:$0xff]  }
 0x2ba   : > { %3150 = vmatpush2.bf16.msra.mxu1 %v11920_v26 }
 0x2bb   : > { %3151 = vmatprep.subr.bf16.mxu1 %v11928_v27  ;;  %5160 = vmatpush2.bf16.msra.mxu0 %v12121_v38  ;;  %v12171_v27 = vld [vmem:[#allocation10 + $0xcc] ss:$24 sps:$4 sm:$0xff]  }
 0x2bc   : > { %5161 = vmatprep.subr.bf16.mxu0 %v12129_v40  ;;  %v12183_v40 = vld [vmem:[#allocation10 + $0x6c] ss:$24 sps:$4 sm:$0xff]  }
 0x2be   : > { %3152 = vmatpush2.bf16.msra.mxu1 %v11926_v30  ;;  %v12169_v30 = vld [vmem:[#allocation10 + $0xc8] ss:$24 sps:$4 sm:$0xff]  }
 0x2bf   : > { %3153 = vmatprep.subr.bf16.mxu1 %v11934_v31  ;;  %5162 = vmatpush2.bf16.msra.mxu0 %v12127_v46  ;;  %v12177_v31 = vld [vmem:[#allocation10 + $0x9c] ss:$24 sps:$4 sm:$0xff]   ;;  %v12181_v46 = vld [vmem:[#allocation10 + $0x68] ss:$24 sps:$4 sm:$0xff]  }
 0x2c0   : > { %5163 = vmatprep.subr.bf16.mxu0 %v12135_v48  ;;  %v12189_v48 = vld [vmem:[#allocation10 + $0x3c] ss:$24 sps:$4 sm:$0xff]  }
 0x2c2   : > { %3154 = vmatpush2.bf16.msra.mxu1 %v11932_v36  ;;  %v12175_v36 = vld [vmem:[#allocation10 + $0x98] ss:$24 sps:$4 sm:$0xff]  }
 0x2c3   : > { %3155 = vmatprep.subr.bf16.mxu1 %v11940_v37  ;;  %5164 = vmatpush2.bf16.msra.mxu0 %v12133_v3  ;;  %v12187_v3 = vld [vmem:[#allocation10 + $0x38] ss:$24 sps:$4 sm:$0xff]  }
 0x2c4   : > { %5165 = vmatprep.subr.bf16.mxu0 %v12141_v52  ;;  %v12195_v52 = vld [vmem:[#allocation10 + $0xc] ss:$24 sps:$4 sm:$0xff]  }
 0x2c6   : > { %3156 = vmatpush2.bf16.msra.mxu1 %v11938_v43  ;;  %v11992_v43 = vld [vmem:[#allocation7 + $0x340] ss:$24 sps:$4 sm:$0xff]  }
 0x2c7   : > { %3157 = vmatprep.subr.bf16.mxu1 %v11946_v44  ;;  %5166 = vmatpush2.bf16.msra.mxu0 %v12139_v7  ;;  %v12000_v44 = vld [vmem:[#allocation7 + $0x314] ss:$24 sps:$4 sm:$0xff]  }
 0x2c8   : > { %5167 = vmatprep.subr.bf16.mxu0 %v12147_v61  ;;  %v12193_v7 = vld [vmem:[#allocation10 + $0x8] ss:$24 sps:$4 sm:$0xff]  }
 0x2c9   : > { %v12018_v61 = vld [vmem:[#allocation7 + $0x584] ss:$24 sps:$4 sm:$0xff]  }
 0x2ca   : > { %3158 = vmatpush2.bf16.msra.mxu1 %v11944_v49  ;;  %v11998_v49 = vld [vmem:[#allocation7 + $0x310] ss:$24 sps:$4 sm:$0xff]  }
 0x2cb   : > { %3159 = vmatprep.subr.bf16.mxu1 %v11952_v50  ;;  %5168 = vmatpush2.bf16.msra.mxu0 %v12145_v63  ;;  %v12006_v50 = vld [vmem:[#allocation7 + $0x5e4] ss:$24 sps:$4 sm:$0xff]  }
 0x2cc   : > { %5219 = vmatprep.subr.bf16.mxu0 %v12153_v10  ;;  %v12199_v63 = vld [vmem:[#allocation10 + $0x2d8] ss:$24 sps:$4 sm:$0xff]   ;;  %v12022_v10 = vld [vmem:[#allocation7 + $0x550] ss:$24 sps:$4 sm:$0xff]  }
 0x2ce   : > { %3160 = vmatpush2.bf16.msra.mxu1 %v11950_v53  ;;  %5170 = vmatmul.mubr.bf16.vlgmr.msra.gmra.mxu0 %v14374_v9  ;;  %v12004_v53 = vld [vmem:[#allocation7 + $0x5e0] ss:$24 sps:$4 sm:$0xff]  }
 0x2cf   : > { %3211 = vmatprep.subr.bf16.mxu1 %v11958_v55  ;;  %5220 = vmatpush1.bf16.msra.mxu0 %v12151_v12  ;;  %v12012_v55 = vld [vmem:[#allocation7 + $0x5b4] ss:$24 sps:$4 sm:$0xff]  }
 0x2d0   : > { %5251 = vmatprep.mubr.bf16.mxu0 %v14377_v15  ;;  %5221 = vmatprep.subr.bf16.mxu0 %v12159_v18  ;;  %v12211_v12 = vld [vmem:[#allocation10 + $0x278] ss:$24 sps:$4 sm:$0xff]   ;;  %v12225_v18 = vld [vmem:[#allocation10 + $0x21c] ss:$24 sps:$4 sm:$0xff]  }
 0x2d1   : > { %3162 = vmatmul.mubr.bf16.vlgmr.msra.gmra.mxu1 %v14321_v41  ;;  %v1145_v8 = vpop.f32.mrf.mxu1  ;;  %v14380_v41 = vpop.f32.mrf.mxu0 }
 0x2d2   : > { %v1146_v11 = vadd.f32 %v1145_v8, %v1078_v59  ;;  %3212 = vmatpush1.bf16.msra.mxu1 %v11956_v58  ;;  %3243 = vmatprep.mubr.bf16.mxu1 %v14325_v45  ;;  %v12201_v58 = vld [vmem:[#allocation10 + $0x2dc] ss:$24 sps:$4 sm:$0xff]   ;;  %v12010_v59 = vld [vmem:[#allocation7 + $0x5b0] ss:$24 sps:$4 sm:$0xff]  }
 0x2d3   : > { %v11438_v13 = vpop.f32.mrf.mxu1  ;;  %3213 = vmatprep.subr.bf16.mxu1 %v11964_v1  ;;  %v14384_v45 = vpop.f32.mrf.mxu0  ;;  %5222 = vmatpush1.bf16.msra.mxu0 %v12157_v19  ;;  %v12207_v1 = vld [vmem:[#allocation10 + $0x2ac] ss:$24 sps:$4 sm:$0xff]   ;;  %v12213_v8 = vld [vmem:[#allocation10 + $0x27c] ss:$24 sps:$4 sm:$0xff]  }
 0x2d4   : > { %v10125_v16 = vmul.f32 -1.442695, %v1146_v11  ;;  %5223 = vmatprep.subr.bf16.mxu0 %v12165_v22  ;;  %v12030_v11 = vld [vmem:[#allocation7 + $0x524] ss:$24 sps:$4 sm:$0xff]   ;;  %v12219_v13 = vld [vmem:[#allocation10 + $0x24c] ss:$24 sps:$4 sm:$0xff]  }
 0x2d5   : > { %v3126_v21 = vpop.f32.mrf.mxu0  ;;  %v12034_v19 = vld [vmem:[#allocation7 + $0x4f0] ss:$24 sps:$4 sm:$0xff]   ;;  %v12040_v22 = vld [vmem:[#allocation7 + $0x4c0] ss:$24 sps:$4 sm:$0xff]  }
 0x2d6   : > { %13348 = vpow2.f32 %v10125_v16  ;;  %3214 = vmatpush1.bf16.msra.mxu1 %v11962_v5  ;;  %v12205_v5 = vld [vmem:[#allocation10 + $0x2a8] ss:$24 sps:$4 sm:$0xff]   ;;  %v12223_v21 = vld [vmem:[#allocation10 + $0x218] ss:$24 sps:$4 sm:$0xff]  }
 0x2d7   : > { %3215 = vmatprep.subr.bf16.mxu1 %v11970_v14  ;;  %v3127_v26 = vpop.f32.mrf.mxu0  ;;  %5224 = vmatpush1.bf16.msra.mxu0 %v12163_v25  ;;  %v12028_v14 = vld [vmem:[#allocation7 + $0x520] ss:$24 sps:$4 sm:$0xff]   ;;  %v12036_v16 = vld [vmem:[#allocation7 + $0x4f4] ss:$24 sps:$4 sm:$0xff]   ;;  %v14392_v25 = vsub.s32 0, %v14351_v51 }
 0x2d8   : > { %5225 = vmatprep.subr.bf16.mxu0 %v12171_v27  ;;  %v12048_v26 = vld [vmem:[#allocation7 + $0x494] ss:$24 sps:$4 sm:$0xff]  }
 0x2d9   : > { %v12229_v27 = vld [vmem:[#allocation10 + $0x1e8] ss:$24 sps:$4 sm:$0xff]  }
 0x2da   : > { %3216 = vmatpush1.bf16.msra.mxu1 %v11968_v17  ;;  %v12217_v17 = vld [vmem:[#allocation10 + $0x248] ss:$24 sps:$4 sm:$0xff]  }
 0x2db   : > { %3217 = vmatprep.subr.bf16.mxu1 %v11976_v20  ;;  %5226 = vmatpush1.bf16.msra.mxu0 %v12169_v30  ;;  %v12042_v20 = vld [vmem:[#allocation7 + $0x4c4] ss:$24 sps:$4 sm:$0xff]   ;;  %v12046_v30 = vld [vmem:[#allocation7 + $0x490] ss:$24 sps:$4 sm:$0xff]  }
 0x2dc   : > { %5227 = vmatprep.subr.bf16.mxu0 %v12177_v31  ;;  %v12054_v31 = vld [vmem:[#allocation10 + $0x154] ss:$24 sps:$4 sm:$0xff]  }
 0x2de   : > { %3218 = vmatpush1.bf16.msra.mxu1 %v11974_v23  ;;  %v14389_v23 = vld [vmem:[#allocation8] sm:$0x3f] }
 0x2df   : > { %3219 = vmatprep.subr.bf16.mxu1 %v11982_v24  ;;  %5228 = vmatpush1.bf16.msra.mxu0 %v12175_v36  ;;  %v12231_v24 = vld [vmem:[#allocation10 + $0x1ec] ss:$24 sps:$4 sm:$0xff]   ;;  %v2901_v36 = vrot.slane %v14389_v23, %v14360_v60 }
 0x2e0   : > { %5229 = vmatprep.subr.bf16.mxu0 %v12183_v40 }
 0x2e2   : > { %3220 = vmatpush1.bf16.msra.mxu1 %v11980_v28  ;;  %v12237_v28 = vld [vmem:[#allocation10 + $0x1bc] ss:$24 sps:$4 sm:$0xff]  }
 0x2e3   : > { %v13349_v37 = vpop.eup %13348  ;;  %3221 = vmatprep.subr.bf16.mxu1 %v11988_v29  ;;  %5230 = vmatpush1.bf16.msra.mxu0 %v12181_v46  ;;  %v2897_v29 = vrot.slane %v14389_v23, %v14392_v25  ;;  %v12060_v46 = vld [vmem:[#allocation10 + $0x124] ss:$24 sps:$4 sm:$0xff]  }
 0x2e4   : > { %v1152_v38 = vadd.f32 1.0, %v13349_v37  ;;  %5231 = vmatprep.subr.bf16.mxu0 %v12189_v48  ;;  %v12052_v37 = vld [vmem:[#allocation10 + $0x150] ss:$24 sps:$4 sm:$0xff]  }
 0x2e5   : > { %v2959_v40 = vadd.f32 %v14339_v35, %v2897_v29  ;;  %v12291_v29 = vld [vmem:[#allocation10 + $0x60c] ss:$24 sps:$4 sm:$0xff]  }
 0x2e6   : > { %13350 = vrcp.f32 %v1152_v38  ;;  %3222 = vmatpush1.bf16.msra.mxu1 %v11986_v32  ;;  %v12235_v32 = vld [vmem:[#allocation10 + $0x1b8] ss:$24 sps:$4 sm:$0xff]   ;;  %v12243_v38 = vld [vmem:[#allocation10 + $0x18c] ss:$24 sps:$4 sm:$0xff]  }
 0x2e7   : > { %3223 = vmatprep.subr.bf16.mxu1 %v11994_v33  ;;  %5232 = vmatpush1.bf16.msra.mxu0 %v12187_v3  ;;  %v14397_v33 = vsub.s32 5, %v14351_v51 }
 0x2e8   : > { %5233 = vmatprep.subr.bf16.mxu0 %v12195_v52  ;;  %v12249_v52 = vld [vmem:[#allocation10 + $0x75c] ss:$24 sps:$4 sm:$0xff]  }
 0x2e9   : > { %v3323_v48 = vrot.slane %v14354_v57, %v14397_v33 }
 0x2ea   : > { %3224 = vmatpush1.bf16.msra.mxu1 %v11992_v43  ;;  %v3303_v43 = vrot.slane %v14354_v57, %v14392_v25 }
 0x2eb   : > { %3225 = vmatprep.subr.bf16.mxu1 %v12000_v44  ;;  %5234 = vmatpush1.bf16.msra.mxu0 %v12193_v7  ;;  %v12241_v44 = vld [vmem:[#allocation10 + $0x188] ss:$24 sps:$4 sm:$0xff]   ;;  %v14413_v57 = vpack.c.bf16 %v3323_v48, %v3323_v48 }
 0x2ec   : > { %5235 = vmatprep.subr.bf16.mxu0 %v12201_v58  ;;  %v12066_v58 = vld [vmem:[#allocation10 + $0xf4] ss:$24 sps:$4 sm:$0xff]   ;;  %v12301_v48 = vld [vmem:[#allocation10 + $0x8a8] ss:$24 sps:$4 sm:$0xff]  }
 0x2ee   : > { %3226 = vmatpush1.bf16.msra.mxu1 %v11998_v49  ;;  %v2961_v49 = vadd.f32 %v14341_v42, %v2901_v36  ;;  %v12297_v36 = vld [vmem:[#allocation10 + $0x8dc] ss:$24 sps:$4 sm:$0xff]  }
 0x2ef   : > { %3227 = vmatprep.subr.bf16.mxu1 %v12006_v50  ;;  %5236 = vmatpush2.bf16.msra.mxu0 %v12199_v63  ;;  %v12058_v50 = vld [vmem:[#allocation10 + $0x120] ss:$24 sps:$4 sm:$0xff]  }
 0x2f0   : > { %5237 = vmatprep.subr.bf16.mxu0 %v12207_v1  ;;  %v12253_v63 = vld [vmem:[#allocation10 + $0x728] ss:$24 sps:$4 sm:$0xff]   ;;  %v12072_v1 = vld [vmem:[#allocation10 + $0xc4] ss:$24 sps:$4 sm:$0xff]  }
 0x2f2   : > { %3228 = vmatpush2.bf16.msra.mxu1 %v12004_v53  ;;  %v14411_v53 = vpack.c.bf16 %v3303_v43, %v3303_v43  ;;  %v12303_v43 = vld [vmem:[#allocation10 + $0x8ac] ss:$24 sps:$4 sm:$0xff]  }
 0x2f3   : > { %v13351_v0 = vpop.eup %13350  ;;  %3229 = vmatprep.subr.bf16.mxu1 %v12012_v55  ;;  %5238 = vmatpush2.bf16.msra.mxu0 %v12205_v5  ;;  %v12247_v55 = vld [vmem:[#allocation10 + $0x758] ss:$24 sps:$4 sm:$0xff]   ;;  %v12078_v5 = vld [vmem:[#allocation10 + $0x94] ss:$24 sps:$4 sm:$0xff]  }
 0x2f4   : > { %1156 = vst.msk [vmem:[%s705_s5] sm:$0x1] %vm1155_vm1, %v13351_v0  ;;  %5239 = vmatprep.subr.bf16.mxu0 %v12213_v8  ;;  %v12259_v8 = vld [vmem:[#allocation10 + $0x6f8] ss:$24 sps:$4 sm:$0xff]  }
 0x2f6   : > { %3230 = vmatpush2.bf16.msra.mxu1 %v12010_v59  ;;  %v12064_v59 = vld [vmem:[#allocation10 + $0xf0] ss:$24 sps:$4 sm:$0xff]  }
 0x2f7   : > { %3231 = vmatprep.subr.bf16.mxu1 %v12018_v61  ;;  %5240 = vmatpush2.bf16.msra.mxu0 %v12211_v12  ;;  %v12255_v61 = vld [vmem:[#allocation10 + $0x72c] ss:$24 sps:$4 sm:$0xff]  }
 0x2f8   : > { %5241 = vmatprep.subr.bf16.mxu0 %v12219_v13  ;;  %v12084_v12 = vld [vmem:[#allocation10 + $0x64] ss:$24 sps:$4 sm:$0xff]   ;;  %v12265_v13 = vld [vmem:[#allocation10 + $0x6c8] ss:$24 sps:$4 sm:$0xff]  }
 0x2fa   : > { %3232 = vmatpush2.bf16.msra.mxu1 %v12016_v2  ;;  %v12261_v2 = vld [vmem:[#allocation10 + $0x6fc] ss:$24 sps:$4 sm:$0xff]  }
 0x2fb   : > { %3233 = vmatprep.subr.bf16.mxu1 %v12024_v4  ;;  %5242 = vmatpush2.bf16.msra.mxu0 %v12217_v17  ;;  %v12070_v4 = vld [vmem:[#allocation10 + $0xc0] ss:$24 sps:$4 sm:$0xff]   ;;  %v12090_v17 = vld [vmem:[#allocation10 + $0x34] ss:$24 sps:$4 sm:$0xff]  }
 0x2fc   : > { %5243 = vmatprep.subr.bf16.mxu0 %v12225_v18  ;;  %v12271_v18 = vld [vmem:[#allocation10 + $0x698] ss:$24 sps:$4 sm:$0xff]  }
 0x2fe   : > { %3234 = vmatpush2.bf16.msra.mxu1 %v12022_v10  ;;  %v12267_v10 = vld [vmem:[#allocation10 + $0x6cc] ss:$24 sps:$4 sm:$0xff]  }
 0x2ff   : > { %3235 = vmatprep.subr.bf16.mxu1 %v12030_v11  ;;  %5244 = vmatpush2.bf16.msra.mxu0 %v12223_v21  ;;  %v12076_v11 = vld [vmem:[#allocation10 + $0x90] ss:$24 sps:$4 sm:$0xff]   ;;  %v12096_v21 = vld [vmem:[#allocation10 + $0x4] ss:$24 sps:$4 sm:$0xff]  }
 0x300   : > { %5245 = vmatprep.subr.bf16.mxu0 %v12231_v24  ;;  %v12285_v24 = vld [vmem:[#allocation10 + $0x63c] ss:$24 sps:$4 sm:$0xff]  }
 0x302   : > { %3236 = vmatpush2.bf16.msra.mxu1 %v12028_v14  ;;  %v12273_v14 = vld [vmem:[#allocation10 + $0x69c] ss:$24 sps:$4 sm:$0xff]  }
 0x303   : > { %3237 = vmatprep.subr.bf16.mxu1 %v12036_v16  ;;  %5246 = vmatpush2.bf16.msra.mxu0 %v12229_v27  ;;  %v12082_v16 = vld [vmem:[#allocation10 + $0x60] ss:$24 sps:$4 sm:$0xff]   ;;  %v12102_v27 = vld [vmem:[#allocation10 + $0x2d4] ss:$24 sps:$4 sm:$0xff]  }
 0x304   : > { %5247 = vmatprep.subr.bf16.mxu0 %v12237_v28  ;;  %v12283_v28 = vld [vmem:[#allocation10 + $0x638] ss:$24 sps:$4 sm:$0xff]  }
 0x306   : > { %3238 = vmatpush2.bf16.msra.mxu1 %v12034_v19  ;;  %v12279_v19 = vld [vmem:[#allocation10 + $0x66c] ss:$24 sps:$4 sm:$0xff]  }
 0x307   : > { %3239 = vmatprep.subr.bf16.mxu1 %v12042_v20  ;;  %5248 = vmatpush2.bf16.msra.mxu0 %v12235_v32  ;;  %v12088_v20 = vld [vmem:[#allocation10 + $0x30] ss:$24 sps:$4 sm:$0xff]  }
 0x308   : > { %5249 = vmatprep.subr.bf16.mxu0 %v12243_v38  ;;  %v12289_v32 = vld [vmem:[#allocation10 + $0x608] ss:$24 sps:$4 sm:$0xff]   ;;  %v12114_v38 = vld [vmem:[#allocation10 + $0x274] ss:$24 sps:$4 sm:$0xff]  }
 0x30a   : > { %3240 = vmatpush2.bf16.msra.mxu1 %v12040_v22  ;;  %v12277_v22 = vld [vmem:[#allocation10 + $0x668] ss:$24 sps:$4 sm:$0xff]  }
 0x30b   : > { %3241 = vmatprep.subr.bf16.mxu1 %v12048_v26  ;;  %5250 = vmatpush2.bf16.msra.mxu0 %v12241_v44  ;;  %v12094_v26 = vld [vmem:[#allocation10] ss:$24 sps:$4 sm:$0xff]   ;;  %v12112_v44 = vld [vmem:[#allocation10 + $0x270] ss:$24 sps:$4 sm:$0xff]  }
 0x30c   : > { %5301 = vmatprep.subr.bf16.mxu0 %v12249_v52  ;;  %v12307_v52 = vld [vmem:[#allocation10 + $0x878] ss:$24 sps:$4 sm:$0xff]  }
 0x30e   : > { %3242 = vmatpush2.bf16.msra.mxu1 %v12046_v30  ;;  %5252 = vmatmul.mubr.bf16.vlgmr.msra.gmra.mxu0 %v14411_v53  ;;  %v12100_v30 = vld [vmem:[#allocation10 + $0x2d0] ss:$24 sps:$4 sm:$0xff]  }
 0x30f   : > { %5096 = vmatprep.subr.bf16.mxu1 %v12054_v31  ;;  %5302 = vmatpush1.bf16.msra.mxu0 %v12247_v55  ;;  %v12108_v31 = vld [vmem:[#allocation10 + $0x2a4] ss:$24 sps:$4 sm:$0xff]  }
 0x310   : > { %5333 = vmatprep.mubr.bf16.mxu0 %v14413_v57  ;;  %5303 = vmatprep.subr.bf16.mxu0 %v12255_v61  ;;  %v12315_v55 = vld [vmem:[#allocation10 + $0x84c] ss:$24 sps:$4 sm:$0xff]   ;;  %v12130_v61 = vld [vmem:[#allocation10 + $0x1e0] ss:$24 sps:$4 sm:$0xff]  }
 0x311   : > { %v2999_v3 = vpop.f32.mrf.mxu1  ;;  %3244 = vmatmul.mubr.bf16.vlgmr.msra.gmra.mxu1 %v14331_v34 }
 0x312   : > { %v14408_v35 = vadd.f32 %v2999_v3, %v2959_v40  ;;  %5097 = vmatpush1.bf16.msra.mxu1 %v12052_v37  ;;  %5128 = vmatprep.mubr.bf16.mxu1 %v14377_v15  ;;  %v12106_v37 = vld [vmem:[#allocation10 + $0x2a0] ss:$24 sps:$4 sm:$0xff]   ;;  %v12126_v3 = vld [vmem:[#allocation10 + $0x214] ss:$24 sps:$4 sm:$0xff]  }
 0x313   : > { %v3001_v7 = vpop.f32.mrf.mxu1  ;;  %5098 = vmatprep.subr.bf16.mxu1 %v12060_v46  ;;  %5304 = vmatpush1.bf16.msra.mxu0 %v12253_v63  ;;  %v12295_v40 = vld [vmem:[#allocation10 + $0x8d8] ss:$24 sps:$4 sm:$0xff]   ;;  %v12120_v46 = vld [vmem:[#allocation10 + $0x244] ss:$24 sps:$4 sm:$0xff]   ;;  %v12138_v63 = vld [vmem:[#allocation10 + $0x1b4] ss:$24 sps:$4 sm:$0xff]  }
 0x314   : > { %v14415_v42 = vadd.f32 %v3001_v7, %v2961_v49  ;;  %5305 = vmatprep.subr.bf16.mxu0 %v12261_v2  ;;  %v12309_v49 = vld [vmem:[#allocation10 + $0x87c] ss:$24 sps:$4 sm:$0xff]   ;;  %v12124_v7 = vld [vmem:[#allocation10 + $0x210] ss:$24 sps:$4 sm:$0xff]  }
 0x315   : > { %v3003_v34 = vpop.f32.mrf.mxu1  ;;  %v12136_v2 = vld [vmem:[#allocation10 + $0x1b0] ss:$24 sps:$4 sm:$0xff]  }
 0x316   : > { %5099 = vmatpush1.bf16.msra.mxu1 %v12058_v50  ;;  %v12118_v50 = vld [vmem:[#allocation10 + $0x240] ss:$24 sps:$4 sm:$0xff]   ;;  %v12321_v34 = vld [vmem:[#allocation10 + $0x81c] ss:$24 sps:$4 sm:$0xff]  }
 0x317   : > { %v3004_v0 = vpop.f32.mrf.mxu1  ;;  %5100 = vmatprep.subr.bf16.mxu1 %v12066_v58  ;;  %5306 = vmatpush1.bf16.msra.mxu0 %v12259_v8  ;;  %v12132_v58 = vld [vmem:[#allocation10 + $0x1e4] ss:$24 sps:$4 sm:$0xff]   ;;  %v14419_v8 = vpop.f32.mrf.mxu0 }
 0x318   : > { %5307 = vmatprep.subr.bf16.mxu0 %v12267_v10  ;;  %v12319_v0 = vld [vmem:[#allocation10 + $0x818] ss:$24 sps:$4 sm:$0xff]  }
 0x319   : > { %v12142_v10 = vld [vmem:[#allocation10 + $0x180] ss:$24 sps:$4 sm:$0xff]  }
 0x31a   : > { %5101 = vmatpush1.bf16.msra.mxu1 %v12064_v59  ;;  %v12313_v59 = vld [vmem:[#allocation10 + $0x848] ss:$24 sps:$4 sm:$0xff]  }
 0x31b   : > { %5102 = vmatprep.subr.bf16.mxu1 %v12072_v1  ;;  %5308 = vmatpush1.bf16.msra.mxu0 %v12265_v13  ;;  %v12327_v1 = vld [vmem:[#allocation10 + $0x7ec] ss:$24 sps:$4 sm:$0xff]   ;;  %v14422_v13 = vsub.s32 4, %v14351_v51 }
 0x31c   : > { %5309 = vmatprep.subr.bf16.mxu0 %v12273_v14  ;;  %v12331_v14 = vld [vmem:[#allocation10 + $0x7b8] ss:$24 sps:$4 sm:$0xff]  }
 0x31e   : > { %5103 = vmatpush1.bf16.msra.mxu1 %v12070_v4  ;;  %v12144_v4 = vld [vmem:[#allocation10 + $0x184] ss:$24 sps:$4 sm:$0xff]  }
 0x31f   : > { %5104 = vmatprep.subr.bf16.mxu1 %v12078_v5  ;;  %5310 = vmatpush1.bf16.msra.mxu0 %v12271_v18  ;;  %v12325_v5 = vld [vmem:[#allocation10 + $0x7e8] ss:$24 sps:$4 sm:$0xff]   ;;  %v12339_v18 = vld [vmem:[#allocation10 + $0x78c] ss:$24 sps:$4 sm:$0xff]  }
 0x320   : > { %5311 = vmatprep.subr.bf16.mxu0 %v12279_v19  ;;  %v12148_v19 = vld [vmem:[#allocation10 + $0x750] ss:$24 sps:$4 sm:$0xff]  }
 0x322   : > { %5105 = vmatpush1.bf16.msra.mxu1 %v12076_v11  ;;  %v12333_v11 = vld [vmem:[#allocation10 + $0x7bc] ss:$24 sps:$4 sm:$0xff]  }
 0x323   : > { %5106 = vmatprep.subr.bf16.mxu1 %v12084_v12  ;;  %5312 = vmatpush1.bf16.msra.mxu0 %v12277_v22  ;;  %v12150_v12 = vld [vmem:[#allocation10 + $0x754] ss:$24 sps:$4 sm:$0xff]   ;;  %v12337_v22 = vld [vmem:[#allocation10 + $0x788] ss:$24 sps:$4 sm:$0xff]  }
 0x324   : > { %5313 = vmatprep.subr.bf16.mxu0 %v12285_v24 }
 0x326   : > { %5107 = vmatpush1.bf16.msra.mxu1 %v12082_v16  ;;  %v14424_v16 = vpop.f32.mrf.mxu0 }
 0x327   : > { %5108 = vmatprep.subr.bf16.mxu1 %v12090_v17  ;;  %5314 = vmatpush1.bf16.msra.mxu0 %v12283_v28  ;;  %v12345_v28 = vld [vmem:[#allocation10 + $0x464] ss:$24 sps:$4 sm:$0xff]  }
 0x328   : > { %5315 = vmatprep.subr.bf16.mxu0 %v12291_v29  ;;  %v3208_v17 = vpop.f32.mrf.mxu0  ;;  %v12154_v29 = vld [vmem:[#allocation10 + $0x720] ss:$24 sps:$4 sm:$0xff]  }
 0x329   : > { %v12190_v17 = vld [vmem:[#allocation10 + $0x600] ss:$24 sps:$4 sm:$0xff]  }
 0x32a   : > { %5109 = vmatpush1.bf16.msra.mxu1 %v12088_v20  ;;  %v13386_v20 = vld [vmem:[%s14208_s2] sm:$0x3f]  ;;  %v3209_v24 = vpop.f32.mrf.mxu0  ;;  %s11279_s2 = sshll.u32 %s13977_s24, 4 }
 0x32b   : > { %5110 = vmatprep.subr.bf16.mxu1 %v12096_v21  ;;  %5316 = vmatpush1.bf16.msra.mxu0 %v12289_v32  ;;  %v3319_v21 = vrot.slane %v13386_v20, %v14422_v13  ;;  %v12387_v20 = vld [vmem:[#allocation10 + $0x314] ss:$24 sps:$4 sm:$0xff]   ;;  %v12204_v24 = vld [vmem:[#allocation10 + $0x8a4] ss:$24 sps:$4 sm:$0xff]   ;;  %s9870_s29 = scalar_lea.hbm %s14826_s30, %s11279_s2 }
 0x32c   : > { %5317 = vmatprep.subr.bf16.mxu0 %v12297_v36  ;;  %v12162_v36 = vld [vmem:[#allocation10 + $0x6f4] ss:$24 sps:$4 sm:$0xff]  }
 0x32e   : > { %5111 = vmatpush1.bf16.msra.mxu1 %v12094_v26  ;;  %v12156_v26 = vld [vmem:[#allocation10 + $0x724] ss:$24 sps:$4 sm:$0xff]  }
 0x32f   : > { %5112 = vmatprep.subr.bf16.mxu1 %v12102_v27  ;;  %5318 = vmatpush2.bf16.msra.mxu0 %v12295_v40  ;;  %v12351_v40 = vld [vmem:[#allocation10 + $0x434] ss:$24 sps:$4 sm:$0xff]  }
 0x330   : > { %5319 = vmatprep.subr.bf16.mxu0 %v12303_v43  ;;  %v12160_v43 = vld [vmem:[#allocation10 + $0x6f0] ss:$24 sps:$4 sm:$0xff]  }
 0x332   : > { %5113 = vmatpush2.bf16.msra.mxu1 %v12100_v30  ;;  %v14432_v30 = vpack.c.bf16 %v3319_v21, %v3319_v21  ;;  %v12196_v21 = vld [vmem:[#allocation10 + $0x8d0] ss:$24 sps:$4 sm:$0xff]  }
 0x333   : > { %5114 = vmatprep.subr.bf16.mxu1 %v12108_v31  ;;  %5320 = vmatpush2.bf16.msra.mxu0 %v12301_v48  ;;  %v12343_v31 = vld [vmem:[#allocation10 + $0x460] ss:$24 sps:$4 sm:$0xff]  }
 0x334   : > { %5321 = vmatprep.subr.bf16.mxu0 %v12309_v49  ;;  %v12168_v49 = vld [vmem:[#allocation10 + $0x6c4] ss:$24 sps:$4 sm:$0xff]  }
 0x336   : > { %5115 = vmatpush2.bf16.msra.mxu1 %v12106_v37 }
 0x337   : > { %5116 = vmatprep.subr.bf16.mxu1 %v12114_v38  ;;  %5322 = vmatpush2.bf16.msra.mxu0 %v12307_v52  ;;  %v12166_v52 = vld [vmem:[#allocation10 + $0x6c0] ss:$24 sps:$4 sm:$0xff]  }
 0x338   : > { %5323 = vmatprep.subr.bf16.mxu0 %v12315_v55  ;;  %v12355_v55 = vld [vmem:[#allocation10 + $0x400] ss:$24 sps:$4 sm:$0xff]  }
 0x33a   : > { %5117 = vmatpush2.bf16.msra.mxu1 %v12112_v44 }
 0x33b   : > { %5118 = vmatprep.subr.bf16.mxu1 %v12120_v46  ;;  %5324 = vmatpush2.bf16.msra.mxu0 %v12313_v59  ;;  %v12349_v46 = vld [vmem:[#allocation10 + $0x430] ss:$24 sps:$4 sm:$0xff]   ;;  %v12363_v59 = vld [vmem:[#allocation10 + $0x3d4] ss:$24 sps:$4 sm:$0xff]  }
 0x33c   : > { %5325 = vmatprep.subr.bf16.mxu0 %v12321_v34  ;;  %v12172_v34 = vld [vmem:[#allocation10 + $0x690] ss:$24 sps:$4 sm:$0xff]  }
 0x33e   : > { %5119 = vmatpush2.bf16.msra.mxu1 %v12118_v50 }
 0x33f   : > { %5120 = vmatprep.subr.bf16.mxu1 %v12126_v3  ;;  %5326 = vmatpush2.bf16.msra.mxu0 %v12319_v0  ;;  %v12357_v3 = vld [vmem:[#allocation10 + $0x404] ss:$24 sps:$4 sm:$0xff]  }
 0x340   : > { %5327 = vmatprep.subr.bf16.mxu0 %v12327_v1  ;;  %v12369_v0 = vld [vmem:[#allocation10 + $0x3a4] ss:$24 sps:$4 sm:$0xff]   ;;  %v12178_v1 = vld [vmem:[#allocation10 + $0x660] ss:$24 sps:$4 sm:$0xff]  }
 0x342   : > { %5121 = vmatpush2.bf16.msra.mxu1 %v12124_v7 }
 0x343   : > { %5122 = vmatprep.subr.bf16.mxu1 %v12132_v58  ;;  %5328 = vmatpush2.bf16.msra.mxu0 %v12325_v5  ;;  %v12174_v58 = vld [vmem:[#allocation10 + $0x694] ss:$24 sps:$4 sm:$0xff]  }
 0x344   : > { %5329 = vmatprep.subr.bf16.mxu0 %v12333_v11  ;;  %v12375_v5 = vld [vmem:[#allocation10 + $0x374] ss:$24 sps:$4 sm:$0xff]   ;;  %v12373_v11 = vld [vmem:[#allocation10 + $0x370] ss:$24 sps:$4 sm:$0xff]  }
 0x346   : > { %5123 = vmatpush2.bf16.msra.mxu1 %v12130_v61  ;;  %v12361_v61 = vld [vmem:[#allocation10 + $0x3d0] ss:$24 sps:$4 sm:$0xff]  }
 0x347   : > { %5124 = vmatprep.subr.bf16.mxu1 %v12138_v63  ;;  %5330 = vmatpush2.bf16.msra.mxu0 %v12331_v14  ;;  %v12180_v63 = vld [vmem:[#allocation10 + $0x664] ss:$24 sps:$4 sm:$0xff]  }
 0x348   : > { %5331 = vmatprep.subr.bf16.mxu0 %v12339_v18  ;;  %v12381_v14 = vld [vmem:[#allocation10 + $0x344] ss:$24 sps:$4 sm:$0xff]   ;;  %v12379_v18 = vld [vmem:[#allocation10 + $0x340] ss:$24 sps:$4 sm:$0xff]  }
 0x34a   : > { %5125 = vmatpush2.bf16.msra.mxu1 %v12136_v2  ;;  %v14436_v37 = vpop.f32.mrf.mxu0  ;;  %v12367_v2 = vld [vmem:[#allocation10 + $0x3a0] ss:$24 sps:$4 sm:$0xff]  }
 0x34b   : > { %5126 = vmatprep.subr.bf16.mxu1 %v12144_v4  ;;  %5332 = vmatpush2.bf16.msra.mxu0 %v12337_v22  ;;  %v12186_v4 = vld [vmem:[#allocation10 + $0x634] ss:$24 sps:$4 sm:$0xff]   ;;  %v12385_v22 = vld [vmem:[#allocation10 + $0x310] ss:$24 sps:$4 sm:$0xff]  }
 0x34c   : > { %5383 = vmatprep.subr.bf16.mxu0 %v12345_v28  ;;  %v14440_v44 = vpop.f32.mrf.mxu0  ;;  %v12202_v28 = vld [vmem:[#allocation10 + $0x8a0] ss:$24 sps:$4 sm:$0xff]  }
 0x34e   : > { %5127 = vmatpush2.bf16.msra.mxu1 %v12142_v10  ;;  %5334 = vmatmul.mubr.bf16.vlgmr.msra.gmra.mxu0 %v14432_v30  ;;  %v3290_v50 = vpop.f32.mrf.mxu0  ;;  %v12184_v10 = vld [vmem:[#allocation10 + $0x630] ss:$24 sps:$4 sm:$0xff]  }
 0x34f   : > { %5178 = vmatprep.subr.bf16.mxu1 %v12150_v12  ;;  %5384 = vmatpush1.bf16.msra.mxu0 %v12343_v31  ;;  %v12192_v12 = vld [vmem:[#allocation10 + $0x604] ss:$24 sps:$4 sm:$0xff]   ;;  %v12210_v31 = vld [vmem:[#allocation10 + $0x874] ss:$24 sps:$4 sm:$0xff]  }
 0x350   : > { %5415 = vmatprep.mubr.bf16.mxu0 %v14371_v6  ;;  %5385 = vmatprep.subr.bf16.mxu0 %v12351_v40  ;;  %v3291_v7 = vpop.f32.mrf.mxu0  ;;  %v12397_v40 = vld [vmem:[#allocation10 + $0x5b0] ss:$24 sps:$4 sm:$0xff]   ;;  %v12222_v50 = vld [vmem:[#allocation10 + $0x814] ss:$24 sps:$4 sm:$0xff]  }
 0x351   : > { %v14428_v27 = vpop.f32.mrf.mxu1  ;;  %5129 = vmatmul.mubr.bf16.vlgmr.msra.gmra.mxu1 %v14411_v53  ;;  %v12228_v7 = vld [vmem:[#allocation10 + $0x7e4] ss:$24 sps:$4 sm:$0xff]  }
 0x352   : > { %5179 = vmatpush1.bf16.msra.mxu1 %v12148_v19  ;;  %5210 = vmatprep.mubr.bf16.mxu1 %v14413_v57  ;;  %v12198_v19 = vld [vmem:[#allocation10 + $0x8d4] ss:$24 sps:$4 sm:$0xff]  }
 0x353   : > { %v14434_v32 = vpop.f32.mrf.mxu1  ;;  %5180 = vmatprep.subr.bf16.mxu1 %v12156_v26  ;;  %5386 = vmatpush1.bf16.msra.mxu0 %v12349_v46  ;;  %v12393_v26 = vld [vmem:[#allocation10 + $0x5e4] ss:$24 sps:$4 sm:$0xff]  }
 0x354   : > { %5387 = vmatprep.subr.bf16.mxu0 %v12357_v3  ;;  %v12405_v46 = vld [vmem:[#allocation10 + $0x584] ss:$24 sps:$4 sm:$0xff]   ;;  %v12411_v3 = vld [vmem:[#allocation10 + $0x554] ss:$24 sps:$4 sm:$0xff]  }
 0x355   : > { %v3085_v38 = vpop.f32.mrf.mxu1 }
 0x356   : > { %5181 = vmatpush1.bf16.msra.mxu1 %v12154_v29  ;;  %v12391_v29 = vld [vmem:[#allocation10 + $0x5e0] ss:$24 sps:$4 sm:$0xff]   ;;  %v12208_v38 = vld [vmem:[#allocation10 + $0x870] ss:$24 sps:$4 sm:$0xff]  }
 0x357   : > { %v3086_v48 = vpop.f32.mrf.mxu1  ;;  %5182 = vmatprep.subr.bf16.mxu1 %v12162_v36  ;;  %5388 = vmatpush1.bf16.msra.mxu0 %v12355_v55  ;;  %v12399_v36 = vld [vmem:[#allocation10 + $0x5b4] ss:$24 sps:$4 sm:$0xff]   ;;  %v12409_v55 = vld [vmem:[#allocation10 + $0x550] ss:$24 sps:$4 sm:$0xff]  }
 0x358   : > { %5389 = vmatprep.subr.bf16.mxu0 %v12363_v59  ;;  %v12214_v48 = vld [vmem:[#allocation10 + $0x840] ss:$24 sps:$4 sm:$0xff]  }
 0x359   : > { %v12226_v59 = vld [vmem:[#allocation10 + $0x7e0] ss:$24 sps:$4 sm:$0xff]  }
 0x35a   : > { %5183 = vmatpush1.bf16.msra.mxu1 %v12160_v43  ;;  %v12216_v43 = vld [vmem:[#allocation10 + $0x844] ss:$24 sps:$4 sm:$0xff]  }
 0x35b   : > { %5184 = vmatprep.subr.bf16.mxu1 %v12168_v49  ;;  %5390 = vmatpush1.bf16.msra.mxu0 %v12361_v61  ;;  %v12403_v49 = vld [vmem:[#allocation10 + $0x580] ss:$24 sps:$4 sm:$0xff]   ;;  %v12234_v61 = vld [vmem:[#allocation10 + $0x7b4] ss:$24 sps:$4 sm:$0xff]  }
 0x35c   : > { %5391 = vmatprep.subr.bf16.mxu0 %v12369_v0  ;;  %v12232_v0 = vld [vmem:[#allocation10 + $0x7b0] ss:$24 sps:$4 sm:$0xff]  }
 0x35e   : > { %5185 = vmatpush1.bf16.msra.mxu1 %v12166_v52  ;;  %v12220_v52 = vld [vmem:[#allocation10 + $0x810] ss:$24 sps:$4 sm:$0xff]  }
 0x35f   : > { %5186 = vmatprep.subr.bf16.mxu1 %v12174_v58  ;;  %5392 = vmatpush1.bf16.msra.mxu0 %v12367_v2  ;;  %v12417_v58 = vld [vmem:[#allocation10 + $0x524] ss:$24 sps:$4 sm:$0xff]  }
 0x360   : > { %5393 = vmatprep.subr.bf16.mxu0 %v12375_v5  ;;  %v12240_v2 = vld [vmem:[#allocation10 + $0x784] ss:$24 sps:$4 sm:$0xff]  }
 0x361   : > { %v12429_v5 = vld [vmem:[#allocation10 + $0x4c4] ss:$24 sps:$4 sm:$0xff]  }
 0x362   : > { %5187 = vmatpush1.bf16.msra.mxu1 %v12172_v34  ;;  %v12415_v34 = vld [vmem:[#allocation10 + $0x520] ss:$24 sps:$4 sm:$0xff]  }
 0x363   : > { %5188 = vmatprep.subr.bf16.mxu1 %v12180_v63  ;;  %5394 = vmatpush1.bf16.msra.mxu0 %v12373_v11  ;;  %v12423_v63 = vld [vmem:[#allocation10 + $0x4f4] ss:$24 sps:$4 sm:$0xff]   ;;  %v12238_v11 = vld [vmem:[#allocation10 + $0x780] ss:$24 sps:$4 sm:$0xff]  }
 0x364   : > { %5395 = vmatprep.subr.bf16.mxu0 %v12381_v14  ;;  %v12246_v14 = vld [vmem:[#allocation10 + $0x45c] ss:$24 sps:$4 sm:$0xff]  }
 0x366   : > { %5189 = vmatpush1.bf16.msra.mxu1 %v12178_v1  ;;  %v12421_v1 = vld [vmem:[#allocation10 + $0x4f0] ss:$24 sps:$4 sm:$0xff]  }
 0x367   : > { %5190 = vmatprep.subr.bf16.mxu1 %v12186_v4  ;;  %5396 = vmatpush1.bf16.msra.mxu0 %v12379_v18  ;;  %v2905_v4 = vrot.slane %v14389_v23, %v14363_v62  ;;  %v12435_v18 = vld [vmem:[#allocation10 + $0x494] ss:$24 sps:$4 sm:$0xff]  }
 0x368   : > { %5397 = vmatprep.subr.bf16.mxu0 %v12387_v20  ;;  %v12244_v20 = vld [vmem:[#allocation10 + $0x458] ss:$24 sps:$4 sm:$0xff]  }
 0x36a   : > { %5191 = vmatpush1.bf16.msra.mxu1 %v12184_v10  ;;  %v2909_v10 = vrot.slane %v14389_v23, %v14357_v39 }
 0x36b   : > { %5192 = vmatprep.subr.bf16.mxu1 %v12192_v12  ;;  %5398 = vmatpush1.bf16.msra.mxu0 %v12385_v22  ;;  %v12427_v12 = vld [vmem:[#allocation10 + $0x4c0] ss:$24 sps:$4 sm:$0xff]   ;;  %v12252_v22 = vld [vmem:[#allocation10 + $0x42c] ss:$24 sps:$4 sm:$0xff]  }
 0x36c   : > { %5399 = vmatprep.subr.bf16.mxu0 %v12393_v26 }
 0x36e   : > { %5193 = vmatpush1.bf16.msra.mxu1 %v12190_v17  ;;  %v3082_v17 = vadd.f32 %v14428_v27, %v2905_v4  ;;  %v12250_v27 = vld [vmem:[#allocation10 + $0x428] ss:$24 sps:$4 sm:$0xff]   ;;  %v12300_v4 = vld [vmem:[#allocation10 + $0x5ac] ss:$24 sps:$4 sm:$0xff]  }
 0x36f   : > { %5194 = vmatprep.subr.bf16.mxu1 %v12198_v19  ;;  %5400 = vmatpush2.bf16.msra.mxu0 %v12391_v29  ;;  %v3084_v19 = vadd.f32 %v14434_v32, %v2909_v10  ;;  %v12258_v29 = vld [vmem:[#allocation10 + $0x3fc] ss:$24 sps:$4 sm:$0xff]   ;;  %v12298_v10 = vld [vmem:[#allocation10 + $0x5a8] ss:$24 sps:$4 sm:$0xff]  }
 0x370   : > { %5401 = vmatprep.subr.bf16.mxu0 %v12399_v36  ;;  %v3123_v23 = vadd.f32 %v14380_v41, %v3082_v17  ;;  %v12304_v17 = vld [vmem:[#allocation10 + $0x578] ss:$24 sps:$4 sm:$0xff]  }
 0x371   : > { %v3125_v26 = vadd.f32 %v14384_v45, %v3084_v19  ;;  %v12312_v19 = vld [vmem:[#allocation10 + $0x54c] ss:$24 sps:$4 sm:$0xff]  }
 0x372   : > { %5195 = vmatpush2.bf16.msra.mxu1 %v12196_v21  ;;  %v12433_v21 = vld [vmem:[#allocation10 + $0x490] ss:$24 sps:$4 sm:$0xff]  }
 0x373   : > { %5196 = vmatprep.subr.bf16.mxu1 %v12204_v24  ;;  %5402 = vmatpush2.bf16.msra.mxu0 %v12397_v40 }
 0x374   : > { %5403 = vmatprep.subr.bf16.mxu0 %v12405_v46 }
 0x376   : > { %5197 = vmatpush2.bf16.msra.mxu1 %v12202_v28 }
 0x377   : > { %5198 = vmatprep.subr.bf16.mxu1 %v12210_v31  ;;  %5404 = vmatpush2.bf16.msra.mxu0 %v12403_v49  ;;  %v12270_v49 = vld [vmem:[#allocation10 + $0x39c] ss:$24 sps:$4 sm:$0xff]  }
 0x378   : > { %5405 = vmatprep.subr.bf16.mxu0 %v12411_v3  ;;  %v12276_v3 = vld [vmem:[#allocation10 + $0x36c] ss:$24 sps:$4 sm:$0xff]  }
 0x37a   : > { %5199 = vmatpush2.bf16.msra.mxu1 %v12208_v38  ;;  %v12256_v38 = vld [vmem:[#allocation10 + $0x3f8] ss:$24 sps:$4 sm:$0xff]  }
 0x37b   : > { %5200 = vmatprep.subr.bf16.mxu1 %v12216_v43  ;;  %5406 = vmatpush2.bf16.msra.mxu0 %v12409_v55  ;;  %v12264_v43 = vld [vmem:[#allocation10 + $0x3cc] ss:$24 sps:$4 sm:$0xff]   ;;  %v12282_v55 = vld [vmem:[#allocation10 + $0x33c] ss:$24 sps:$4 sm:$0xff]  }
 0x37c   : > { %5407 = vmatprep.subr.bf16.mxu0 %v12417_v58  ;;  %v12288_v58 = vld [vmem:[#allocation10 + $0x30c] ss:$24 sps:$4 sm:$0xff]  }
 0x37e   : > { %5201 = vmatpush2.bf16.msra.mxu1 %v12214_v48 }
 0x37f   : > { %5202 = vmatprep.subr.bf16.mxu1 %v12222_v50  ;;  %5408 = vmatpush2.bf16.msra.mxu0 %v12415_v34  ;;  %v12268_v50 = vld [vmem:[#allocation10 + $0x398] ss:$24 sps:$4 sm:$0xff]   ;;  %v12286_v34 = vld [vmem:[#allocation10 + $0x308] ss:$24 sps:$4 sm:$0xff]  }
 0x380   : > { %5409 = vmatprep.subr.bf16.mxu0 %v12423_v63  ;;  %v12294_v63 = vld [vmem:[#allocation10 + $0x5dc] ss:$24 sps:$4 sm:$0xff]  }
 0x382   : > { %5203 = vmatpush2.bf16.msra.mxu1 %v12220_v52  ;;  %v12274_v52 = vld [vmem:[#allocation10 + $0x368] ss:$24 sps:$4 sm:$0xff]  }
 0x383   : > { %5204 = vmatprep.subr.bf16.mxu1 %v12228_v7  ;;  %5410 = vmatpush2.bf16.msra.mxu0 %v12421_v1  ;;  %v12280_v7 = vld [vmem:[#allocation10 + $0x338] ss:$24 sps:$4 sm:$0xff]  }
 0x384   : > { %5411 = vmatprep.subr.bf16.mxu0 %v12429_v5  ;;  %v12292_v1 = vld [vmem:[#allocation10 + $0x5d8] ss:$24 sps:$4 sm:$0xff]  }
 0x385   : > { %v12471_v5 = vld [vmem:[#allocation13 + $0xf4] ss:$24 sps:$4 sm:$0xff]  }
 0x386   : > { %5205 = vmatpush2.bf16.msra.mxu1 %v12226_v59  ;;  %v12459_v59 = vld [vmem:[#allocation13 + $0x154] ss:$24 sps:$4 sm:$0xff]  }
 0x387   : > { %5206 = vmatprep.subr.bf16.mxu1 %v12234_v61  ;;  %5412 = vmatpush2.bf16.msra.mxu0 %v12427_v12  ;;  %v12457_v61 = vld [vmem:[#allocation13 + $0x150] ss:$24 sps:$4 sm:$0xff]  }
 0x388   : > { %5413 = vmatprep.subr.bf16.mxu0 %v12435_v18  ;;  %v12306_v12 = vld [vmem:[#allocation10 + $0x57c] ss:$24 sps:$4 sm:$0xff]  }
 0x389   : > { %v12475_v18 = vld [vmem:[#allocation13 + $0xc0] ss:$24 sps:$4 sm:$0xff]  }
 0x38a   : > { %5207 = vmatpush2.bf16.msra.mxu1 %v12232_v0  ;;  %v12465_v0 = vld [vmem:[#allocation13 + $0x124] ss:$24 sps:$4 sm:$0xff]  }
 0x38b   : > { %5208 = vmatprep.subr.bf16.mxu1 %v12240_v2  ;;  %5414 = vmatpush2.bf16.msra.mxu0 %v12433_v21  ;;  %v12463_v2 = vld [vmem:[#allocation13 + $0x120] ss:$24 sps:$4 sm:$0xff]  }
 0x38c   : > { %7249 = vmatprep.subr.bf16.mxu0 %v12459_v59  ;;  %v12310_v21 = vld [vmem:[#allocation10 + $0x548] ss:$24 sps:$4 sm:$0xff]  }
 0x38d   : > { %v12513_v59 = vld [vmem:[#allocation13 + $0x2a4] ss:$24 sps:$4 sm:$0xff]  }
 0x38e   : > { %5209 = vmatpush2.bf16.msra.mxu1 %v12238_v11  ;;  %v14456_v36 = vpop.f32.mrf.mxu0  ;;  %5416 = vmatmul.mubr.bf16.vlgmr.msra.gmra.mxu0 %v14374_v9  ;;  %v12469_v11 = vld [vmem:[#allocation13 + $0xf0] ss:$24 sps:$4 sm:$0xff]  }
 0x38f   : > { %5260 = vmatprep.subr.bf16.mxu1 %v12246_v14  ;;  %7250 = vmatpush1.bf16.msra.mxu0 %v12457_v61  ;;  %v12477_v14 = vld [vmem:[#allocation13 + $0xc4] ss:$24 sps:$4 sm:$0xff]  }
 0x390   : > { %v14459_v40 = vpop.f32.mrf.mxu0  ;;  %7251 = vmatprep.subr.bf16.mxu0 %v12465_v0  ;;  %v12340_v61 = vld [vmem:[#allocation10 + $0x160] ss:$24 sps:$4 sm:$0xff]   ;;  %v12348_v0 = vld [vmem:[#allocation10 + $0x134] ss:$24 sps:$4 sm:$0xff]  }
 0x391   : > { %v3163_v24 = vpop.f32.mrf.mxu1  ;;  %5211 = vmatmul.mubr.bf16.vlgmr.msra.gmra.mxu1 %v14432_v30 }
 0x392   : > { %v14451_v28 = vadd.f32 %v3163_v24, %v3123_v23  ;;  %5261 = vmatpush1.bf16.msra.mxu1 %v12244_v20  ;;  %5292 = vmatprep.mubr.bf16.mxu1 %v14371_v6  ;;  %v5175_v46 = vpop.f32.mrf.mxu0  ;;  %v12262_v6 = vld [vmem:[#allocation10 + $0x3c8] ss:$24 sps:$4 sm:$0xff]   ;;  %v12483_v20 = vld [vmem:[#allocation13 + $0x94] ss:$24 sps:$4 sm:$0xff]  }
 0x393   : > { %v3165_v32 = vpop.f32.mrf.mxu1  ;;  %5262 = vmatprep.subr.bf16.mxu1 %v12252_v22  ;;  %7252 = vmatpush1.bf16.msra.mxu0 %v12463_v2  ;;  %v12481_v22 = vld [vmem:[#allocation13 + $0x90] ss:$24 sps:$4 sm:$0xff]   ;;  %v12489_v24 = vld [vmem:[#allocation13 + $0x64] ss:$24 sps:$4 sm:$0xff]  }
 0x394   : > { %v14454_v31 = vadd.f32 %v3165_v32, %v3125_v26  ;;  %v5176_v48 = vpop.f32.mrf.mxu0  ;;  %7253 = vmatprep.subr.bf16.mxu0 %v12471_v5  ;;  %v12318_v23 = vld [vmem:[#allocation10 + $0x51c] ss:$24 sps:$4 sm:$0xff]   ;;  %v12316_v26 = vld [vmem:[#allocation10 + $0x518] ss:$24 sps:$4 sm:$0xff]   ;;  %v12324_v32 = vld [vmem:[#allocation10 + $0x4ec] ss:$24 sps:$4 sm:$0xff]  }
 0x395   : > { %v3167_v41 = vpop.f32.mrf.mxu1  ;;  %v12328_v46 = vld [vmem:[#allocation10 + $0x4b8] ss:$24 sps:$4 sm:$0xff]   ;;  %v12336_v48 = vld [vmem:[#allocation10 + $0x48c] ss:$24 sps:$4 sm:$0xff]  }
 0x396   : > { %5263 = vmatpush1.bf16.msra.mxu1 %v12250_v27  ;;  %v12487_v27 = vld [vmem:[#allocation13 + $0x60] ss:$24 sps:$4 sm:$0xff]  }
 0x397   : > { %v3168_v45 = vpop.f32.mrf.mxu1  ;;  %5264 = vmatprep.subr.bf16.mxu1 %v12258_v29  ;;  %7254 = vmatpush1.bf16.msra.mxu0 %v12469_v11  ;;  %v12495_v29 = vld [vmem:[#allocation13 + $0x34] ss:$24 sps:$4 sm:$0xff]   ;;  %v12322_v41 = vld [vmem:[#allocation10 + $0x4e8] ss:$24 sps:$4 sm:$0xff]  }
 0x398   : > { %7255 = vmatprep.subr.bf16.mxu0 %v12477_v14  ;;  %v12330_v45 = vld [vmem:[#allocation10 + $0x4bc] ss:$24 sps:$4 sm:$0xff]  }
 0x39a   : > { %5265 = vmatpush1.bf16.msra.mxu1 %v12256_v38  ;;  %v12493_v38 = vld [vmem:[#allocation13 + $0x30] ss:$24 sps:$4 sm:$0xff]  }
 0x39b   : > { %5266 = vmatprep.subr.bf16.mxu1 %v12264_v43  ;;  %7256 = vmatpush1.bf16.msra.mxu0 %v12475_v18  ;;  %v12501_v43 = vld [vmem:[#allocation13 + $0x4] ss:$24 sps:$4 sm:$0xff]  }
 0x39c   : > { %7257 = vmatprep.subr.bf16.mxu0 %v12483_v20  ;;  %v12352_v18 = vld [vmem:[#allocation10 + $0x100] ss:$24 sps:$4 sm:$0xff]   ;;  %v12360_v20 = vld [vmem:[#allocation10 + $0xd4] ss:$24 sps:$4 sm:$0xff]  }
 0x39e   : > { %5267 = vmatpush1.bf16.msra.mxu1 %v12262_v6  ;;  %v12499_v6 = vld [vmem:[#allocation13] ss:$24 sps:$4 sm:$0xff]  }
 0x39f   : > { %5268 = vmatprep.subr.bf16.mxu1 %v12270_v49  ;;  %7258 = vmatpush1.bf16.msra.mxu0 %v12481_v22  ;;  %v12507_v49 = vld [vmem:[#allocation13 + $0x2d4] ss:$24 sps:$4 sm:$0xff]   ;;  %v12525_v22 = vld [vmem:[#allocation13 + $0x1e4] ss:$24 sps:$4 sm:$0xff]  }
 0x3a0   : > { %7259 = vmatprep.subr.bf16.mxu0 %v12489_v24  ;;  %v12366_v24 = vld [vmem:[#allocation10 + $0xa4] ss:$24 sps:$4 sm:$0xff]  }
 0x3a2   : > { %5269 = vmatpush1.bf16.msra.mxu1 %v12268_v50  ;;  %v13387_v50 = vld [vmem:[#allocation8] sm:$0x3f] }
 0x3a3   : > { %5270 = vmatprep.subr.bf16.mxu1 %v12276_v3  ;;  %7260 = vmatpush1.bf16.msra.mxu0 %v12487_v27  ;;  %v2913_v3 = vrot.slane %v13387_v50, %v14422_v13  ;;  %v12528_v27 = vld [vmem:[#allocation13 + $0x1b4] ss:$24 sps:$4 sm:$0xff]  }
 0x3a4   : > { %7261 = vmatprep.subr.bf16.mxu0 %v12495_v29  ;;  %v12372_v29 = vld [vmem:[#allocation10 + $0x74] ss:$24 sps:$4 sm:$0xff]  }
 0x3a6   : > { %5271 = vmatpush1.bf16.msra.mxu1 %v12274_v52  ;;  %v12334_v52 = vld [vmem:[#allocation10 + $0x488] ss:$24 sps:$4 sm:$0xff]  }
 0x3a7   : > { %5272 = vmatprep.subr.bf16.mxu1 %v12282_v55  ;;  %7262 = vmatpush1.bf16.msra.mxu0 %v12493_v38  ;;  %v12505_v55 = vld [vmem:[#allocation13 + $0x2d0] ss:$24 sps:$4 sm:$0xff]   ;;  %v12531_v38 = vld [vmem:[#allocation13 + $0x184] ss:$24 sps:$4 sm:$0xff]  }
 0x3a8   : > { %7263 = vmatprep.subr.bf16.mxu0 %v12501_v43  ;;  %v12378_v43 = vld [vmem:[#allocation10 + $0x44] ss:$24 sps:$4 sm:$0xff]  }
 0x3aa   : > { %5273 = vmatpush1.bf16.msra.mxu1 %v12280_v7  ;;  %v12342_v7 = vld [vmem:[#allocation10 + $0x164] ss:$24 sps:$4 sm:$0xff]  }
 0x3ab   : > { %5274 = vmatprep.subr.bf16.mxu1 %v12288_v58  ;;  %7264 = vmatpush1.bf16.msra.mxu0 %v12499_v6  ;;  %v2917_v58 = vrot.slane %v13387_v50, %v14397_v33  ;;  %v12376_v6 = vld [vmem:[#allocation10 + $0x40] ss:$24 sps:$4 sm:$0xff]   ;;  %v12390_v50 = vld [vmem:[#allocation10 + $0x2e4] ss:$24 sps:$4 sm:$0xff]  }
 0x3ac   : > { %7265 = vmatprep.subr.bf16.mxu0 %v12507_v49  ;;  %v12382_v49 = vld [vmem:[#allocation10 + $0x10] ss:$24 sps:$4 sm:$0xff]  }
 0x3ae   : > { %5275 = vmatpush1.bf16.msra.mxu1 %v12286_v34  ;;  %v3205_v34 = vadd.f32 %v14419_v8, %v2913_v3  ;;  %v12514_v8 = vld [vmem:[#allocation13 + $0x270] ss:$24 sps:$4 sm:$0xff]  }
 0x3af   : > { %5276 = vmatprep.subr.bf16.mxu1 %v12294_v63  ;;  %7266 = vmatpush2.bf16.msra.mxu0 %v12505_v55  ;;  %v12511_v63 = vld [vmem:[#allocation13 + $0x2a0] ss:$24 sps:$4 sm:$0xff]   ;;  %v12396_v55 = vld [vmem:[#allocation10 + $0x2b4] ss:$24 sps:$4 sm:$0xff]  }
 0x3b0   : > { %7267 = vmatprep.subr.bf16.mxu0 %v12513_v59  ;;  %v12388_v3 = vld [vmem:[#allocation10 + $0x2e0] ss:$24 sps:$4 sm:$0xff]  }
 0x3b2   : > { %5277 = vmatpush2.bf16.msra.mxu1 %v12292_v1  ;;  %v3207_v1 = vadd.f32 %v14424_v16, %v2917_v58  ;;  %v12394_v58 = vld [vmem:[#allocation10 + $0x2b0] ss:$24 sps:$4 sm:$0xff]  }
 0x3b3   : > { %5278 = vmatprep.subr.bf16.mxu1 %v12300_v4  ;;  %7268 = vmatpush2.bf16.msra.mxu0 %v12511_v63  ;;  %v12516_v4 = vld [vmem:[#allocation13 + $0x274] ss:$24 sps:$4 sm:$0xff]  }
 0x3b4   : > { %7269 = vmatprep.subr.bf16.mxu0 %v12516_v4  ;;  %v12400_v63 = vld [vmem:[#allocation10 + $0x280] ss:$24 sps:$4 sm:$0xff]  }
 0x3b5   : > { %v12412_v4 = vld [vmem:[#allocation10 + $0x220] ss:$24 sps:$4 sm:$0xff]  }
 0x3b6   : > { %5279 = vmatpush2.bf16.msra.mxu1 %v12298_v10  ;;  %v12346_v10 = vld [vmem:[#allocation10 + $0x130] ss:$24 sps:$4 sm:$0xff]  }
 0x3b7   : > { %5280 = vmatprep.subr.bf16.mxu1 %v12306_v12  ;;  %v12354_v12 = vld [vmem:[#allocation10 + $0x104] ss:$24 sps:$4 sm:$0xff]   ;;  %7270 = vmatpush2.bf16.msra.mxu0 %v12514_v8  ;;  %v12418_v8 = vld [vmem:[#allocation10 + $0x1f0] ss:$24 sps:$4 sm:$0xff]  }
 0x3ba   : > { %5281 = vmatpush2.bf16.msra.mxu1 %v12304_v17  ;;  %v12519_v17 = vld [vmem:[#allocation13 + $0x244] ss:$24 sps:$4 sm:$0xff]  }
 0x3bb   : > { %5282 = vmatprep.subr.bf16.mxu1 %v12312_v19  ;;  %7271 = vmatprep.subr.bf16.mxu0 %v12519_v17  ;;  %v12430_v17 = vld [vmem:[#allocation10 + $0x190] ss:$24 sps:$4 sm:$0xff]  }
 0x3be   : > { %5283 = vmatpush2.bf16.msra.mxu1 %v12310_v21  ;;  %v12522_v21 = vld [vmem:[#allocation13 + $0x214] ss:$24 sps:$4 sm:$0xff]  }
 0x3bf   : > { %5284 = vmatprep.subr.bf16.mxu1 %v12318_v23  ;;  %v12358_v23 = vld [vmem:[#allocation10 + $0xd0] ss:$24 sps:$4 sm:$0xff]  }
 0x3c2   : > { %5285 = vmatpush2.bf16.msra.mxu1 %v12316_v26  ;;  %v12523_v26 = vld [vmem:[#allocation13 + $0x1e0] ss:$24 sps:$4 sm:$0xff]  }
 0x3c3   : > { %5286 = vmatprep.subr.bf16.mxu1 %v12324_v32  ;;  %v12364_v32 = vld [vmem:[#allocation10 + $0xa0] ss:$24 sps:$4 sm:$0xff]  }
 0x3c6   : > { %5287 = vmatpush2.bf16.msra.mxu1 %v12322_v41  ;;  %v12526_v41 = vld [vmem:[#allocation13 + $0x1b0] ss:$24 sps:$4 sm:$0xff]  }
 0x3c7   : > { %5288 = vmatprep.subr.bf16.mxu1 %v12330_v45  ;;  %v12370_v45 = vld [vmem:[#allocation10 + $0x70] ss:$24 sps:$4 sm:$0xff]  }
 0x3ca   : > { %5289 = vmatpush2.bf16.msra.mxu1 %v12328_v46  ;;  %v12529_v46 = vld [vmem:[#allocation13 + $0x180] ss:$24 sps:$4 sm:$0xff]  }
 0x3cb   : > { %5290 = vmatprep.subr.bf16.mxu1 %v12336_v48  ;;  %v12384_v48 = vld [vmem:[#allocation10 + $0x14] ss:$24 sps:$4 sm:$0xff]  }
 0x3ce   : > { %5291 = vmatpush2.bf16.msra.mxu1 %v12334_v52  ;;  %v14471_v52 = vpop.f32.mrf.mxu0 }
 0x3cf   : > { %5342 = vmatprep.subr.bf16.mxu1 %v12342_v7 }
 0x3d0   : > { %v14473_v7 = vpop.f32.mrf.mxu0 }
 0x3d1   : > { %v3245_v2 = vpop.f32.mrf.mxu1  ;;  %5293 = vmatmul.mubr.bf16.vlgmr.msra.gmra.mxu1 %v14374_v9  ;;  %v12517_v9 = vld [vmem:[#allocation13 + $0x240] ss:$24 sps:$4 sm:$0xff]  }
 0x3d2   : > { %v14466_v5 = vadd.f32 %v3245_v2, %v3205_v34  ;;  %5343 = vmatpush1.bf16.msra.mxu1 %v12340_v61  ;;  %5374 = vmatprep.mubr.bf16.mxu1 %v14377_v15  ;;  %v12520_v15 = vld [vmem:[#allocation13 + $0x210] ss:$24 sps:$4 sm:$0xff]   ;;  %v5257_v59 = vpop.f32.mrf.mxu0  ;;  %v12402_v34 = vld [vmem:[#allocation10 + $0x284] ss:$24 sps:$4 sm:$0xff]  }
 0x3d3   : > { %v3247_v11 = vpop.f32.mrf.mxu1  ;;  %5344 = vmatprep.subr.bf16.mxu1 %v12348_v0  ;;  %7272 = vmatpush2.bf16.msra.mxu0 %v12517_v9  ;;  %v12408_v0 = vld [vmem:[#allocation10 + $0x254] ss:$24 sps:$4 sm:$0xff]   ;;  %v12414_v2 = vld [vmem:[#allocation10 + $0x224] ss:$24 sps:$4 sm:$0xff]   ;;  %v12436_v9 = vld [vmem:[#allocation10 + $0x760] ss:$24 sps:$4 sm:$0xff]  }
 0x3d4   : > { %v14469_v14 = vadd.f32 %v3247_v11, %v3207_v1  ;;  %7273 = vmatprep.subr.bf16.mxu0 %v12522_v21  ;;  %v5258_v61 = vpop.f32.mrf.mxu0  ;;  %v12406_v1 = vld [vmem:[#allocation10 + $0x250] ss:$24 sps:$4 sm:$0xff]   ;;  %v12426_v11 = vld [vmem:[#allocation10 + $0x1c4] ss:$24 sps:$4 sm:$0xff]  }
 0x3d5   : > { %v3249_v16 = vpop.f32.mrf.mxu1  ;;  %v12439_v21 = vld [vmem:[#allocation10 + $0x730] ss:$24 sps:$4 sm:$0xff]   ;;  %v12478_v61 = vld [vmem:[#allocation10 + $0x880] ss:$24 sps:$4 sm:$0xff]  }
 0x3d6   : > { %5345 = vmatpush1.bf16.msra.mxu1 %v12346_v10  ;;  %v12420_v10 = vld [vmem:[#allocation10 + $0x1f4] ss:$24 sps:$4 sm:$0xff]   ;;  %v12472_v59 = vld [vmem:[#allocation10 + $0x8b0] ss:$24 sps:$4 sm:$0xff]  }
 0x3d7   : > { %v3250_v19 = vpop.f32.mrf.mxu1  ;;  %5346 = vmatprep.subr.bf16.mxu1 %v12354_v12  ;;  %7274 = vmatpush2.bf16.msra.mxu0 %v12520_v15  ;;  %v12424_v12 = vld [vmem:[#allocation10 + $0x1c0] ss:$24 sps:$4 sm:$0xff]   ;;  %v12432_v16 = vld [vmem:[#allocation10 + $0x194] ss:$24 sps:$4 sm:$0xff]  }
 0x3d8   : > { %7275 = vmatprep.subr.bf16.mxu0 %v12525_v22  ;;  %v12441_v19 = vld [vmem:[#allocation10 + $0x734] ss:$24 sps:$4 sm:$0xff]   ;;  %v12444_v22 = vld [vmem:[#allocation10 + $0x704] ss:$24 sps:$4 sm:$0xff]  }
 0x3da   : > { %5347 = vmatpush1.bf16.msra.mxu1 %v12352_v18  ;;  %v12438_v18 = vld [vmem:[#allocation10 + $0x764] ss:$24 sps:$4 sm:$0xff]  }
 0x3db   : > { %5348 = vmatprep.subr.bf16.mxu1 %v12360_v20  ;;  %7276 = vmatpush2.bf16.msra.mxu0 %v12523_v26  ;;  %v12442_v26 = vld [vmem:[#allocation10 + $0x700] ss:$24 sps:$4 sm:$0xff]  }
 0x3dc   : > { %7277 = vmatprep.subr.bf16.mxu0 %v12528_v27 }
 0x3de   : > { %5349 = vmatpush1.bf16.msra.mxu1 %v12358_v23 }
 0x3df   : > { %5350 = vmatprep.subr.bf16.mxu1 %v12366_v24  ;;  %7278 = vmatpush2.bf16.msra.mxu0 %v12526_v41 }
 0x3e0   : > { %7279 = vmatprep.subr.bf16.mxu0 %v12531_v38 }
 0x3e2   : > { %5351 = vmatpush1.bf16.msra.mxu1 %v12364_v32 }
 0x3e3   : > { %5352 = vmatprep.subr.bf16.mxu1 %v12372_v29  ;;  %7280 = vmatpush2.bf16.msra.mxu0 %v12529_v46  ;;  %v12447_v29 = vld [vmem:[#allocation10 + $0x6d4] ss:$24 sps:$4 sm:$0xff]   ;;  %v12451_v46 = vld [vmem:[#allocation10 + $0x670] ss:$24 sps:$4 sm:$0xff]  }
 0x3e6   : > { %5353 = vmatpush1.bf16.msra.mxu1 %v12370_v45  ;;  %v12448_v45 = vld [vmem:[#allocation10 + $0x6a0] ss:$24 sps:$4 sm:$0xff]  }
 0x3e7   : > { %5354 = vmatprep.subr.bf16.mxu1 %v12378_v43  ;;  %v12453_v43 = vld [vmem:[#allocation10 + $0x674] ss:$24 sps:$4 sm:$0xff]  }
 0x3ea   : > { %5355 = vmatpush1.bf16.msra.mxu1 %v12376_v6  ;;  %v12456_v6 = vld [vmem:[#allocation10 + $0x644] ss:$24 sps:$4 sm:$0xff]  }
 0x3eb   : > { %5356 = vmatprep.subr.bf16.mxu1 %v12384_v48  ;;  %v12454_v48 = vld [vmem:[#allocation10 + $0x640] ss:$24 sps:$4 sm:$0xff]  }
 0x3ee   : > { %5357 = vmatpush1.bf16.msra.mxu1 %v12382_v49  ;;  %v12462_v49 = vld [vmem:[#allocation10 + $0x614] ss:$24 sps:$4 sm:$0xff]  }
 0x3ef   : > { %5358 = vmatprep.subr.bf16.mxu1 %v12390_v50  ;;  %v12460_v50 = vld [vmem:[#allocation10 + $0x610] ss:$24 sps:$4 sm:$0xff]  }
 0x3f2   : > { %5359 = vmatpush2.bf16.msra.mxu1 %v12388_v3  ;;  %v12468_v3 = vld [vmem:[#allocation10 + $0x8e4] ss:$24 sps:$4 sm:$0xff]  }
 0x3f3   : > { %5360 = vmatprep.subr.bf16.mxu1 %v12396_v55  ;;  %v12466_v55 = vld [vmem:[#allocation10 + $0x8e0] ss:$24 sps:$4 sm:$0xff]  }
 0x3f6   : > { %5361 = vmatpush2.bf16.msra.mxu1 %v12394_v58  ;;  %v12474_v58 = vld [vmem:[#allocation10 + $0x8b4] ss:$24 sps:$4 sm:$0xff]  }
 0x3f7   : > { %5362 = vmatprep.subr.bf16.mxu1 %v12402_v34  ;;  %v12480_v34 = vld [vmem:[#allocation10 + $0x884] ss:$24 sps:$4 sm:$0xff]  }
 0x3fa   : > { %5363 = vmatpush2.bf16.msra.mxu1 %v12400_v63  ;;  %v12486_v63 = vld [vmem:[#allocation10 + $0x854] ss:$24 sps:$4 sm:$0xff]  }
 0x3fb   : > { %5364 = vmatprep.subr.bf16.mxu1 %v12408_v0  ;;  %v12484_v0 = vld [vmem:[#allocation10 + $0x850] ss:$24 sps:$4 sm:$0xff]  }
 0x3fe   : > { %5365 = vmatpush2.bf16.msra.mxu1 %v12406_v1  ;;  %v12492_v1 = vld [vmem:[#allocation10 + $0x824] ss:$24 sps:$4 sm:$0xff]  }
 0x3ff   : > { %5366 = vmatprep.subr.bf16.mxu1 %v12414_v2  ;;  %v12490_v2 = vld [vmem:[#allocation10 + $0x820] ss:$24 sps:$4 sm:$0xff]  }
 0x402   : > { %5367 = vmatpush2.bf16.msra.mxu1 %v12412_v4  ;;  %v12498_v4 = vld [vmem:[#allocation10 + $0x7f4] ss:$24 sps:$4 sm:$0xff]  }
 0x403   : > { %5368 = vmatprep.subr.bf16.mxu1 %v12420_v10  ;;  %v12496_v10 = vld [vmem:[#allocation10 + $0x7f0] ss:$24 sps:$4 sm:$0xff]  }
 0x406   : > { %5369 = vmatpush2.bf16.msra.mxu1 %v12418_v8  ;;  %v12504_v8 = vld [vmem:[#allocation10 + $0x7c4] ss:$24 sps:$4 sm:$0xff]  }
 0x407   : > { %5370 = vmatprep.subr.bf16.mxu1 %v12426_v11  ;;  %v14485_v11 = vld [vmem:[#allocation11] sm:$0x3f] }
 0x40a   : > { %5371 = vmatpush2.bf16.msra.mxu1 %v12424_v12  ;;  %v12502_v12 = vld [vmem:[#allocation10 + $0x7c0] ss:$24 sps:$4 sm:$0xff]  }
 0x40b   : > { %5372 = vmatprep.subr.bf16.mxu1 %v12432_v16  ;;  %v12510_v16 = vld [vmem:[#allocation10 + $0x794] ss:$24 sps:$4 sm:$0xff]  }
 0x40e   : > { %5373 = vmatpush2.bf16.msra.mxu1 %v12430_v17  ;;  %v14481_v23 = vpop.f32.mrf.mxu0  ;;  %v5069_v17 = vrot.slane %v14485_v11, %v14392_v25 }
 0x40f   : > { %5424 = vmatprep.subr.bf16.mxu1 %v12438_v18  ;;  %v5073_v18 = vrot.slane %v14485_v11, %v14360_v60 }
 0x410   : > { %v14483_v27 = vpop.f32.mrf.mxu0 }
 0x411   : > { %v14475_v20 = vpop.f32.mrf.mxu1  ;;  %5375 = vmatmul.mubr.bf16.vlgmr.msra.gmra.mxu1 %v14411_v53  ;;  %v12445_v53 = vld [vmem:[#allocation10 + $0x6d0] ss:$24 sps:$4 sm:$0xff]  }
 0x412   : > { %5425 = vmatpush1.bf16.msra.mxu1 %v12436_v9  ;;  %5456 = vmatprep.mubr.bf16.mxu1 %v14413_v57  ;;  %v5339_v41 = vpop.f32.mrf.mxu0  ;;  %v12450_v57 = vld [vmem:[#allocation10 + $0x6a4] ss:$24 sps:$4 sm:$0xff]   ;;  %v12508_v9 = vld [vmem:[#allocation10 + $0x790] ss:$24 sps:$4 sm:$0xff]  }
 0x413   : > { %v14479_v15 = vpop.f32.mrf.mxu1  ;;  %5426 = vmatprep.subr.bf16.mxu1 %v12441_v19  ;;  %v12534_v19 = vld [vmem:[#allocation13 + $0x454] ss:$24 sps:$4 sm:$0xff]   ;;  %v3043_v41 = vadd.f32 %v14348_v56, %v14415_v42  ;;  %v12538_v56 = vld [vmem:[#allocation13 + $0x3f0] ss:$24 sps:$4 sm:$0xff]  }
 0x414   : > { %v5340_v38 = vpop.f32.mrf.mxu0 }
 0x415   : > { %v5134_v24 = vpop.f32.mrf.mxu1 }
 0x416   : > { %5427 = vmatpush1.bf16.msra.mxu1 %v12439_v21  ;;  %v5131_v21 = vadd.f32 %v14475_v20, %v5069_v17  ;;  %v12532_v24 = vld [vmem:[#allocation13 + $0x450] ss:$24 sps:$4 sm:$0xff]   ;;  %v12553_v17 = vld [vmem:[#allocation13 + $0x300] ss:$24 sps:$4 sm:$0xff]  }
 0x417   : > { %v5135_v32 = vpop.f32.mrf.mxu1  ;;  %5428 = vmatprep.subr.bf16.mxu1 %v12444_v22  ;;  %v5133_v22 = vadd.f32 %v14479_v15, %v5073_v18  ;;  %v12535_v15 = vld [vmem:[#allocation13 + $0x420] ss:$24 sps:$4 sm:$0xff]   ;;  %v12628_v18 = vld [vmem:[#allocation13 + $0x750] ss:$24 sps:$4 sm:$0xff]  }
 0x418   : > { %v12537_v32 = vld [vmem:[#allocation13 + $0x424] ss:$24 sps:$4 sm:$0xff]  }
 0x419   : > { %v5174_v38 = vadd.f32 %v14459_v40, %v5133_v22  ;;  %v12543_v40 = vld [vmem:[#allocation13 + $0x3c4] ss:$24 sps:$4 sm:$0xff]   ;;  %v12634_v22 = vld [vmem:[#allocation13 + $0x720] ss:$24 sps:$4 sm:$0xff]  }
 0x41a   : > { %5429 = vmatpush1.bf16.msra.mxu1 %v12442_v26  ;;  %v3041_v26 = vadd.f32 %v14345_v54, %v14408_v35 }
 0x41b   : > { %5430 = vmatprep.subr.bf16.mxu1 %v12447_v29  ;;  %v5172_v29 = vadd.f32 %v14456_v36, %v5131_v21  ;;  %v12556_v21 = vld [vmem:[#allocation13 + $0x5d0] ss:$24 sps:$4 sm:$0xff]  }
 0x41c   : > { %13352 = vtanh.f32 %v3041_v26  ;;  %v12642_v26 = vld [vmem:[#allocation13 + $0x6f4] ss:$24 sps:$4 sm:$0xff]  }
 0x41e   : > { %5431 = vmatpush1.bf16.msra.mxu1 %v12445_v53 }
 0x41f   : > { %5432 = vmatprep.subr.bf16.mxu1 %v12450_v57 }
 0x422   : > { %5433 = vmatpush1.bf16.msra.mxu1 %v12448_v45  ;;  %v12540_v45 = vld [vmem:[#allocation13 + $0x3f4] ss:$24 sps:$4 sm:$0xff]  }
 0x423   : > { %5434 = vmatprep.subr.bf16.mxu1 %v12453_v43 }
 0x426   : > { %5435 = vmatpush1.bf16.msra.mxu1 %v12451_v46  ;;  %v12541_v46 = vld [vmem:[#allocation13 + $0x3c0] ss:$24 sps:$4 sm:$0xff]  }
 0x427   : > { %5436 = vmatprep.subr.bf16.mxu1 %v12456_v6 }
 0x42a   : > { %5437 = vmatpush1.bf16.msra.mxu1 %v12454_v48  ;;  %v12546_v48 = vld [vmem:[#allocation13 + $0x394] ss:$24 sps:$4 sm:$0xff]  }
 0x42b   : > { %5438 = vmatprep.subr.bf16.mxu1 %v12462_v49  ;;  %v12544_v49 = vld [vmem:[#allocation13 + $0x390] ss:$24 sps:$4 sm:$0xff]  }
 0x42e   : > { %5439 = vmatpush1.bf16.msra.mxu1 %v12460_v50  ;;  %v12549_v50 = vld [vmem:[#allocation13 + $0x364] ss:$24 sps:$4 sm:$0xff]  }
 0x42f   : > { %5440 = vmatprep.subr.bf16.mxu1 %v12468_v3  ;;  %v13353_v3 = vpop.eup %13352 }
 0x432   : > { %5441 = vmatpush2.bf16.msra.mxu1 %v12466_v55 }
 0x433   : > { %5442 = vmatprep.subr.bf16.mxu1 %v12474_v58 }
 0x436   : > { %5443 = vmatpush2.bf16.msra.mxu1 %v12472_v59 }
 0x437   : > { %5444 = vmatprep.subr.bf16.mxu1 %v12480_v34  ;;  %v12547_v34 = vld [vmem:[#allocation13 + $0x360] ss:$24 sps:$4 sm:$0xff]  }
 0x43a   : > { %5445 = vmatpush2.bf16.msra.mxu1 %v12478_v61 }
 0x43b   : > { %5446 = vmatprep.subr.bf16.mxu1 %v12486_v63  ;;  %v12552_v63 = vld [vmem:[#allocation13 + $0x334] ss:$24 sps:$4 sm:$0xff]  }
 0x43e   : > { %5447 = vmatpush2.bf16.msra.mxu1 %v12484_v0 }
 0x43f   : > { %5448 = vmatprep.subr.bf16.mxu1 %v12492_v1 }
 0x442   : > { %5449 = vmatpush2.bf16.msra.mxu1 %v12490_v2 }
 0x443   : > { %5450 = vmatprep.subr.bf16.mxu1 %v12498_v4  ;;  %v12550_v4 = vld [vmem:[#allocation13 + $0x330] ss:$24 sps:$4 sm:$0xff]  }
 0x446   : > { %5451 = vmatpush2.bf16.msra.mxu1 %v12496_v10  ;;  %v12555_v10 = vld [vmem:[#allocation13 + $0x304] ss:$24 sps:$4 sm:$0xff]  }
 0x447   : > { %5452 = vmatprep.subr.bf16.mxu1 %v12504_v8 }
 0x44a   : > { %5453 = vmatpush2.bf16.msra.mxu1 %v12502_v12 }
 0x44b   : > { %5454 = vmatprep.subr.bf16.mxu1 %v12510_v16  ;;  %v12630_v16 = vld [vmem:[#allocation13 + $0x754] ss:$24 sps:$4 sm:$0xff]  }
 0x44c   : > { %7331 = vmatprep.subr.bf16.mxu0 %v12630_v16 }
 0x44e   : > { %5455 = vmatpush2.bf16.msra.mxu1 %v12508_v9  ;;  %v14500_v35 = vpop.f32.mrf.mxu0  ;;  %v12558_v9 = vld [vmem:[#allocation13 + $0x5d4] ss:$24 sps:$4 sm:$0xff]  }
 0x44f   : > { %7290 = vmatprep.subr.bf16.mxu1 %v12534_v19  ;;  %v12636_v19 = vld [vmem:[#allocation13 + $0x724] ss:$24 sps:$4 sm:$0xff]  }
 0x450   : > { %v14502_v42 = vpop.f32.mrf.mxu0 }
 0x451   : > { %v5212_v53 = vpop.f32.mrf.mxu1  ;;  %5457 = vmatmul.mubr.bf16.vlgmr.msra.gmra.mxu1 %v14432_v30 }
 0x452   : > { %v5213_v20 = vadd.f32 %v5212_v53, %v5172_v29  ;;  %7291 = vmatpush1.bf16.msra.mxu1 %v12532_v24  ;;  %v5421_v43 = vpop.f32.mrf.mxu0  ;;  %v12561_v24 = vld [vmem:[#allocation13 + $0x5a4] ss:$24 sps:$4 sm:$0xff]   ;;  %v12640_v29 = vld [vmem:[#allocation13 + $0x6f0] ss:$24 sps:$4 sm:$0xff]  }
 0x453   : > { %v5214_v57 = vpop.f32.mrf.mxu1  ;;  %7292 = vmatprep.subr.bf16.mxu1 %v12537_v32  ;;  %v12559_v32 = vld [vmem:[#allocation13 + $0x5a0] ss:$24 sps:$4 sm:$0xff]   ;;  %v12648_v53 = vld [vmem:[#allocation13 + $0x6c4] ss:$24 sps:$4 sm:$0xff]  }
 0x454   : > { %13354 = vtanh.f32 %v5213_v20  ;;  %v5215_v54 = vadd.f32 %v5214_v57, %v5174_v38  ;;  %v5422_v6 = vpop.f32.mrf.mxu0  ;;  %v12562_v38 = vld [vmem:[#allocation13 + $0x570] ss:$24 sps:$4 sm:$0xff]   ;;  %v12646_v20 = vld [vmem:[#allocation13 + $0x6c0] ss:$24 sps:$4 sm:$0xff]   ;;  %v12654_v57 = vld [vmem:[#allocation13 + $0x694] ss:$24 sps:$4 sm:$0xff]  }
 0x455   : > { %13356 = vtanh.f32 %v3043_v41  ;;  %v5216_v36 = vpop.f32.mrf.mxu1  ;;  %v12564_v41 = vld [vmem:[#allocation13 + $0x574] ss:$24 sps:$4 sm:$0xff]   ;;  %v12573_v43 = vld [vmem:[#allocation13 + $0x4e4] ss:$24 sps:$4 sm:$0xff]   ;;  %v12571_v6 = vld [vmem:[#allocation13 + $0x4e0] ss:$24 sps:$4 sm:$0xff]  }
 0x456   : > { %13358 = vtanh.f32 %v5215_v54  ;;  %7293 = vmatpush1.bf16.msra.mxu1 %v12535_v15  ;;  %v12567_v15 = vld [vmem:[#allocation13 + $0x544] ss:$24 sps:$4 sm:$0xff]   ;;  %v12652_v54 = vld [vmem:[#allocation13 + $0x690] ss:$24 sps:$4 sm:$0xff]   ;;  %v12570_v36 = vld [vmem:[#allocation13 + $0x514] ss:$24 sps:$4 sm:$0xff]  }
 0x457   : > { %v5217_v30 = vpop.f32.mrf.mxu1  ;;  %7294 = vmatprep.subr.bf16.mxu1 %v12540_v45  ;;  %v12565_v45 = vld [vmem:[#allocation13 + $0x540] ss:$24 sps:$4 sm:$0xff]   ;;  %13360 = vtanh.f32 %v14451_v28  ;;  %v12714_v28 = vld [vmem:[#allocation13 + $0x7b4] ss:$24 sps:$4 sm:$0xff]  }
 0x458   : > { %v12568_v30 = vld [vmem:[#allocation13 + $0x510] ss:$24 sps:$4 sm:$0xff]  }
 0x45a   : > { %7295 = vmatpush1.bf16.msra.mxu1 %v12538_v56  ;;  %v12660_v56 = vld [vmem:[#allocation13 + $0x664] ss:$24 sps:$4 sm:$0xff]  }
 0x45b   : > { %7296 = vmatprep.subr.bf16.mxu1 %v12543_v40  ;;  %v12658_v40 = vld [vmem:[#allocation13 + $0x660] ss:$24 sps:$4 sm:$0xff]  }
 0x45e   : > { %7297 = vmatpush1.bf16.msra.mxu1 %v12541_v46  ;;  %v12666_v46 = vld [vmem:[#allocation13 + $0x634] ss:$24 sps:$4 sm:$0xff]  }
 0x45f   : > { %7298 = vmatprep.subr.bf16.mxu1 %v12546_v48  ;;  %v12664_v48 = vld [vmem:[#allocation13 + $0x630] ss:$24 sps:$4 sm:$0xff]  }
 0x461   : > { %v13355_v55 = vpop.eup %13354 }
 0x462   : > { %v13357_v58 = vpop.eup %13356  ;;  %v5471_v59 = vsub.f32 %v13353_v3, %v13355_v55  ;;  %7299 = vmatpush1.bf16.msra.mxu1 %v12544_v49  ;;  %v12576_v49 = vld [vmem:[#allocation13 + $0x4b4] ss:$24 sps:$4 sm:$0xff]   ;;  %v12574_v3 = vld [vmem:[#allocation13 + $0x4b0] ss:$24 sps:$4 sm:$0xff]   ;;  %v12670_v55 = vld [vmem:[#allocation13 + $0x600] ss:$24 sps:$4 sm:$0xff]  }
 0x463   : > { %v13359_v61 = vpop.eup %13358  ;;  %7300 = vmatprep.subr.bf16.mxu1 %v12549_v50  ;;  %v12672_v50 = vld [vmem:[#allocation13 + $0x604] ss:$24 sps:$4 sm:$0xff]  }
 0x464   : > { %v5472_v0 = vsub.f32 %v13357_v58, %v13359_v61  ;;  %v5477_v1 = vmul.f32 %v5471_v59, %v5471_v59  ;;  %v12579_v58 = vld [vmem:[#allocation13 + $0x484] ss:$24 sps:$4 sm:$0xff]   ;;  %v12678_v59 = vld [vmem:[#allocation13 + $0x8d4] ss:$24 sps:$4 sm:$0xff]   ;;  %v12577_v61 = vld [vmem:[#allocation13 + $0x480] ss:$24 sps:$4 sm:$0xff]  }
 0x466   : > { %v5478_v2 = vmul.f32 %v5472_v0, %v5472_v0  ;;  %7301 = vmatpush1.bf16.msra.mxu1 %v12547_v34  ;;  %v14506_v12 = vpack.c.bf16 %v5477_v1, %v5477_v1  ;;  %v5077_v34 = vrot.slane %v14485_v11, %v14363_v62  ;;  %v12582_v0 = vld [vmem:[#allocation13 + $0x15c] ss:$24 sps:$4 sm:$0xff]   ;;  %v5081_v1 = vrot.slane %v14485_v11, %v14357_v39 }
 0x467   : > { %7302 = vmatprep.subr.bf16.mxu1 %v12552_v63  ;;  %v12676_v63 = vld [vmem:[#allocation13 + $0x8d0] ss:$24 sps:$4 sm:$0xff]  }
 0x468   : > { %v14504_v8 = vpack.c.bf16 %v5478_v2, %v5478_v2  ;;  %v12684_v2 = vld [vmem:[#allocation13 + $0x8a4] ss:$24 sps:$4 sm:$0xff]   ;;  %v5256_v16 = vadd.f32 %v14473_v7, %v5081_v1 }
 0x469   : > { %v12600_v1 = vld [vmem:[#allocation13 + $0x3c] ss:$24 sps:$4 sm:$0xff]  }
 0x46a   : > { %7281 = vmatprep.mubr.bf16.mxu0 %v14504_v8  ;;  %7303 = vmatpush1.bf16.msra.mxu1 %v12550_v4  ;;  %v5254_v4 = vadd.f32 %v14471_v52, %v5077_v34  ;;  %v12696_v52 = vld [vmem:[#allocation13 + $0x844] ss:$24 sps:$4 sm:$0xff]  }
 0x46b   : > { %7282 = vmatmul.mubr.bf16.vlgmr.msra.gmra.mxu0 %v14506_v12  ;;  %7304 = vmatprep.subr.bf16.mxu1 %v12555_v10  ;;  %v12682_v10 = vld [vmem:[#allocation13 + $0x8a0] ss:$24 sps:$4 sm:$0xff]   ;;  %v12594_v34 = vld [vmem:[#allocation13 + $0x9c] ss:$24 sps:$4 sm:$0xff]  }
 0x46c   : > { %7332 = vmatpush1.bf16.msra.mxu0 %v12628_v18  ;;  %v12690_v18 = vld [vmem:[#allocation13 + $0x874] ss:$24 sps:$4 sm:$0xff]  }
 0x46d   : > { %7333 = vmatprep.subr.bf16.mxu0 %v12636_v19  ;;  %v12688_v19 = vld [vmem:[#allocation13 + $0x870] ss:$24 sps:$4 sm:$0xff]  }
 0x46e   : > { %7305 = vmatpush1.bf16.msra.mxu1 %v12553_v17 }
 0x46f   : > { %7306 = vmatprep.subr.bf16.mxu1 %v12558_v9 }
 0x470   : > { %7334 = vmatpush1.bf16.msra.mxu0 %v12634_v22 }
 0x471   : > { %7335 = vmatprep.subr.bf16.mxu0 %v12642_v26 }
 0x472   : > { %7307 = vmatpush2.bf16.msra.mxu1 %v12556_v21 }
 0x473   : > { %7308 = vmatprep.subr.bf16.mxu1 %v12561_v24 }
 0x474   : > { %7336 = vmatpush1.bf16.msra.mxu0 %v12640_v29  ;;  %v12694_v29 = vld [vmem:[#allocation13 + $0x840] ss:$24 sps:$4 sm:$0xff]  }
 0x475   : > { %7337 = vmatprep.subr.bf16.mxu0 %v12648_v53  ;;  %v12700_v53 = vld [vmem:[#allocation13 + $0x810] ss:$24 sps:$4 sm:$0xff]  }
 0x476   : > { %7309 = vmatpush2.bf16.msra.mxu1 %v12559_v32 }
 0x477   : > { %7310 = vmatprep.subr.bf16.mxu1 %v12564_v41  ;;  %v12702_v41 = vld [vmem:[#allocation13 + $0x814] ss:$24 sps:$4 sm:$0xff]  }
 0x478   : > { %7338 = vmatpush1.bf16.msra.mxu0 %v12646_v20  ;;  %v13361_v20 = vpop.eup %13360 }
 0x479   : > { %7339 = vmatprep.subr.bf16.mxu0 %v12654_v57 }
 0x47a   : > { %7311 = vmatpush2.bf16.msra.mxu1 %v12562_v38  ;;  %v12706_v38 = vld [vmem:[#allocation13 + $0x7e0] ss:$24 sps:$4 sm:$0xff]  }
 0x47b   : > { %7312 = vmatprep.subr.bf16.mxu1 %v12567_v15  ;;  %v12712_v15 = vld [vmem:[#allocation13 + $0x7b0] ss:$24 sps:$4 sm:$0xff]  }
 0x47c   : > { %7340 = vmatpush1.bf16.msra.mxu0 %v12652_v54  ;;  %v12720_v54 = vld [vmem:[#allocation13 + $0x784] ss:$24 sps:$4 sm:$0xff]  }
 0x47d   : > { %7341 = vmatprep.subr.bf16.mxu0 %v12660_v56  ;;  %v12718_v56 = vld [vmem:[#allocation13 + $0x780] ss:$24 sps:$4 sm:$0xff]  }
 0x47e   : > { %7313 = vmatpush2.bf16.msra.mxu1 %v12565_v45 }
 0x47f   : > { %7314 = vmatprep.subr.bf16.mxu1 %v12570_v36 }
 0x480   : > { %7342 = vmatpush1.bf16.msra.mxu0 %v12658_v40 }
 0x481   : > { %7343 = vmatprep.subr.bf16.mxu0 %v12666_v46 }
 0x482   : > { %7315 = vmatpush2.bf16.msra.mxu1 %v12568_v30 }
 0x483   : > { %7316 = vmatprep.subr.bf16.mxu1 %v12573_v43  ;;  %v12726_v43 = vld [vmem:[#allocation13 + $0x45c] ss:$24 sps:$4 sm:$0xff]  }
 0x484   : > { %7344 = vmatpush1.bf16.msra.mxu0 %v12664_v48 }
 0x485   : > { %7345 = vmatprep.subr.bf16.mxu0 %v12672_v50  ;;  %v12583_v50 = vld [vmem:[#allocation13 + $0x128] ss:$24 sps:$4 sm:$0xff]  }
 0x486   : > { %7317 = vmatpush2.bf16.msra.mxu1 %v12571_v6  ;;  %v12580_v6 = vld [vmem:[#allocation13 + $0x158] ss:$24 sps:$4 sm:$0xff]  }
 0x487   : > { %7318 = vmatprep.subr.bf16.mxu1 %v12576_v49  ;;  %v12585_v49 = vld [vmem:[#allocation13 + $0x12c] ss:$24 sps:$4 sm:$0xff]  }
 0x488   : > { %7346 = vmatpush1.bf16.msra.mxu0 %v12670_v55  ;;  %v12586_v55 = vld [vmem:[#allocation13 + $0xf8] ss:$24 sps:$4 sm:$0xff]  }
 0x489   : > { %7347 = vmatprep.subr.bf16.mxu0 %v12678_v59  ;;  %v12589_v59 = vld [vmem:[#allocation13 + $0xc8] ss:$24 sps:$4 sm:$0xff]  }
 0x48a   : > { %7319 = vmatpush2.bf16.msra.mxu1 %v12574_v3  ;;  %v12588_v3 = vld [vmem:[#allocation13 + $0xfc] ss:$24 sps:$4 sm:$0xff]  }
 0x48b   : > { %7320 = vmatprep.subr.bf16.mxu1 %v12579_v58  ;;  %v12591_v58 = vld [vmem:[#allocation13 + $0xcc] ss:$24 sps:$4 sm:$0xff]  }
 0x48c   : > { %7348 = vmatpush2.bf16.msra.mxu0 %v12676_v63  ;;  %v12597_v63 = vld [vmem:[#allocation13 + $0x6c] ss:$24 sps:$4 sm:$0xff]  }
 0x48d   : > { %7349 = vmatprep.subr.bf16.mxu0 %v12684_v2  ;;  %v12598_v2 = vld [vmem:[#allocation13 + $0x38] ss:$24 sps:$4 sm:$0xff]  }
 0x48e   : > { %7321 = vmatpush2.bf16.msra.mxu1 %v12577_v61  ;;  %v12592_v61 = vld [vmem:[#allocation13 + $0x98] ss:$24 sps:$4 sm:$0xff]  }
 0x48f   : > { %7372 = vmatprep.subr.bf16.mxu1 %v12582_v0  ;;  %v12595_v0 = vld [vmem:[#allocation13 + $0x68] ss:$24 sps:$4 sm:$0xff]  }
 0x490   : > { %7350 = vmatpush2.bf16.msra.mxu0 %v12682_v10  ;;  %v12601_v10 = vld [vmem:[#allocation13 + $0x8] ss:$24 sps:$4 sm:$0xff]  }
 0x491   : > { %v5294_v17 = vpop.f32.mrf.mxu1  ;;  %7351 = vmatprep.subr.bf16.mxu0 %v12690_v18  ;;  %v12609_v18 = vld [vmem:[#allocation13 + $0x2ac] ss:$24 sps:$4 sm:$0xff]  }
 0x492   : > { %v5295_v9 = vadd.f32 %v5294_v17, %v5254_v4  ;;  %v12603_v4 = vld [vmem:[#allocation13 + $0xc] ss:$24 sps:$4 sm:$0xff]   ;;  %v12604_v17 = vld [vmem:[#allocation13 + $0x2d8] ss:$24 sps:$4 sm:$0xff]  }
 0x493   : > { %v5296_v21 = vpop.f32.mrf.mxu1 }
 0x494   : > { %v5297_v22 = vadd.f32 %v5296_v21, %v5256_v16  ;;  %v5336_v24 = vadd.f32 %v14481_v23, %v5295_v9  ;;  %7352 = vmatpush2.bf16.msra.mxu0 %v12688_v19  ;;  %v12708_v23 = vld [vmem:[#allocation13 + $0x7e4] ss:$24 sps:$4 sm:$0xff]   ;;  %v12607_v9 = vld [vmem:[#allocation13 + $0x2a8] ss:$24 sps:$4 sm:$0xff]  }
 0x495   : > { %v5298_v26 = vpop.f32.mrf.mxu1  ;;  %7353 = vmatprep.subr.bf16.mxu0 %v12696_v52  ;;  %v12606_v16 = vld [vmem:[#allocation13 + $0x2dc] ss:$24 sps:$4 sm:$0xff]  }
 0x496   : > { %13362 = vtanh.f32 %v5336_v24  ;;  %v5338_v32 = vadd.f32 %v14483_v27, %v5297_v22  ;;  %v12612_v19 = vld [vmem:[#allocation13 + $0x27c] ss:$24 sps:$4 sm:$0xff]   ;;  %v12610_v22 = vld [vmem:[#allocation13 + $0x278] ss:$24 sps:$4 sm:$0xff]   ;;  %v12615_v26 = vld [vmem:[#allocation13 + $0x24c] ss:$24 sps:$4 sm:$0xff]  }
 0x497   : > { %13364 = vtanh.f32 %v14454_v31  ;;  %v5299_v7 = vpop.f32.mrf.mxu1 }
 0x498   : > { %13366 = vtanh.f32 %v5338_v32  ;;  %7354 = vmatpush2.bf16.msra.mxu0 %v12694_v29  ;;  %v12613_v32 = vld [vmem:[#allocation13 + $0x248] ss:$24 sps:$4 sm:$0xff]   ;;  %v12618_v7 = vld [vmem:[#allocation13 + $0x21c] ss:$24 sps:$4 sm:$0xff]  }
 0x499   : > { %7355 = vmatprep.subr.bf16.mxu0 %v12702_v41  ;;  %v12616_v41 = vld [vmem:[#allocation13 + $0x218] ss:$24 sps:$4 sm:$0xff]  }
 0x49c   : > { %7356 = vmatpush2.bf16.msra.mxu0 %v12700_v53  ;;  %v12621_v53 = vld [vmem:[#allocation13 + $0x1ec] ss:$24 sps:$4 sm:$0xff]  }
 0x49d   : > { %7357 = vmatprep.subr.bf16.mxu0 %v12708_v23  ;;  %v12619_v23 = vld [vmem:[#allocation13 + $0x1e8] ss:$24 sps:$4 sm:$0xff]  }
 0x4a0   : > { %7358 = vmatpush2.bf16.msra.mxu0 %v12706_v38  ;;  %v12624_v38 = vld [vmem:[#allocation13 + $0x1bc] ss:$24 sps:$4 sm:$0xff]  }
 0x4a1   : > { %7359 = vmatprep.subr.bf16.mxu0 %v12714_v28  ;;  %v12622_v28 = vld [vmem:[#allocation13 + $0x1b8] ss:$24 sps:$4 sm:$0xff]  }
 0x4a3   : > { %v13363_v57 = vpop.eup %13362 }
 0x4a4   : > { %v13365_v27 = vpop.eup %13364  ;;  %v5473_v45 = vsub.f32 %v13361_v20, %v13363_v57  ;;  %7360 = vmatpush2.bf16.msra.mxu0 %v12712_v15  ;;  %v12627_v20 = vld [vmem:[#allocation13 + $0x18c] ss:$24 sps:$4 sm:$0xff]   ;;  %v12625_v15 = vld [vmem:[#allocation13 + $0x188] ss:$24 sps:$4 sm:$0xff]   ;;  %v12633_v57 = vld [vmem:[#allocation13 + $0x75c] ss:$24 sps:$4 sm:$0xff]  }
 0x4a5   : > { %v13367_v31 = vpop.eup %13366  ;;  %7361 = vmatprep.subr.bf16.mxu0 %v12720_v54  ;;  %v12645_v54 = vld [vmem:[#allocation13 + $0x6fc] ss:$24 sps:$4 sm:$0xff]  }
 0x4a6   : > { %v5474_v36 = vsub.f32 %v13365_v27, %v13367_v31  ;;  %v5479_v30 = vmul.f32 %v5473_v45, %v5473_v45  ;;  %v12631_v27 = vld [vmem:[#allocation13 + $0x758] ss:$24 sps:$4 sm:$0xff]   ;;  %v12639_v45 = vld [vmem:[#allocation13 + $0x72c] ss:$24 sps:$4 sm:$0xff]   ;;  %v12637_v31 = vld [vmem:[#allocation13 + $0x728] ss:$24 sps:$4 sm:$0xff]  }
 0x4a8   : > { %v5480_v40 = vmul.f32 %v5474_v36, %v5474_v36  ;;  %7362 = vmatpush2.bf16.msra.mxu0 %v12718_v56  ;;  %v14522_v48 = vpack.c.bf16 %v5479_v30, %v5479_v30  ;;  %v12643_v36 = vld [vmem:[#allocation13 + $0x6f8] ss:$24 sps:$4 sm:$0xff]   ;;  %v12651_v56 = vld [vmem:[#allocation13 + $0x6cc] ss:$24 sps:$4 sm:$0xff]   ;;  %v12649_v30 = vld [vmem:[#allocation13 + $0x6c8] ss:$24 sps:$4 sm:$0xff]  }
 0x4a9   : > { %7413 = vmatprep.subr.bf16.mxu0 %v12726_v43  ;;  %v12655_v43 = vld [vmem:[#allocation13 + $0x698] ss:$24 sps:$4 sm:$0xff]  }
 0x4aa   : > { %v14520_v46 = vpack.c.bf16 %v5480_v40, %v5480_v40  ;;  %v12657_v40 = vld [vmem:[#allocation13 + $0x69c] ss:$24 sps:$4 sm:$0xff]  }
 0x4ac   : > { %7322 = vmatprep.mubr.bf16.mxu1 %v14520_v46 }
 0x4ad   : > { %7323 = vmatmul.mubr.bf16.vlgmr.msra.gmra.mxu1 %v14522_v48 }
 0x4ae   : > { %7373 = vmatpush1.bf16.msra.mxu1 %v12580_v6  ;;  %7404 = vmatprep.mubr.bf16.mxu1 %v14504_v8  ;;  %v12663_v6 = vld [vmem:[#allocation13 + $0x66c] ss:$24 sps:$4 sm:$0xff]  }
 0x4af   : > { %7374 = vmatprep.subr.bf16.mxu1 %v12585_v49  ;;  %v12661_v49 = vld [vmem:[#allocation13 + $0x668] ss:$24 sps:$4 sm:$0xff]  }
 0x4b2   : > { %7375 = vmatpush1.bf16.msra.mxu1 %v12583_v50  ;;  %v12669_v50 = vld [vmem:[#allocation13 + $0x63c] ss:$24 sps:$4 sm:$0xff]  }
 0x4b3   : > { %7376 = vmatprep.subr.bf16.mxu1 %v12588_v3  ;;  %v12667_v3 = vld [vmem:[#allocation13 + $0x638] ss:$24 sps:$4 sm:$0xff]  }
 0x4b6   : > { %7377 = vmatpush1.bf16.msra.mxu1 %v12586_v55  ;;  %v12675_v55 = vld [vmem:[#allocation13 + $0x60c] ss:$24 sps:$4 sm:$0xff]  }
 0x4b7   : > { %7378 = vmatprep.subr.bf16.mxu1 %v12591_v58  ;;  %v12673_v58 = vld [vmem:[#allocation13 + $0x608] ss:$24 sps:$4 sm:$0xff]  }
 0x4ba   : > { %7379 = vmatpush1.bf16.msra.mxu1 %v12589_v59  ;;  %v12681_v59 = vld [vmem:[#allocation13 + $0x8dc] ss:$24 sps:$4 sm:$0xff]  }
 0x4bb   : > { %7380 = vmatprep.subr.bf16.mxu1 %v12594_v34  ;;  %v5085_v34 = vrot.slane %v14485_v11, %v14422_v13 }
 0x4be   : > { %7381 = vmatpush1.bf16.msra.mxu1 %v12592_v61  ;;  %v5089_v61 = vrot.slane %v14485_v11, %v14397_v33  ;;  %v3289_v11 = vadd.f32 %v14440_v44, %v14469_v14  ;;  %v12705_v44 = vld [vmem:[#allocation13 + $0x81c] ss:$24 sps:$4 sm:$0xff]   ;;  %v12703_v14 = vld [vmem:[#allocation13 + $0x818] ss:$24 sps:$4 sm:$0xff]  }
 0x4bf   : > { %7382 = vmatprep.subr.bf16.mxu1 %v12597_v63  ;;  %v12679_v63 = vld [vmem:[#allocation13 + $0x8d8] ss:$24 sps:$4 sm:$0xff]  }
 0x4c2   : > { %7383 = vmatpush1.bf16.msra.mxu1 %v12595_v0  ;;  %v12687_v0 = vld [vmem:[#allocation13 + $0x8ac] ss:$24 sps:$4 sm:$0xff]  }
 0x4c3   : > { %7384 = vmatprep.subr.bf16.mxu1 %v12600_v1 }
 0x4c6   : > { %7385 = vmatpush1.bf16.msra.mxu1 %v12598_v2 }
 0x4c7   : > { %7386 = vmatprep.subr.bf16.mxu1 %v12603_v4  ;;  %v12685_v4 = vld [vmem:[#allocation13 + $0x8a8] ss:$24 sps:$4 sm:$0xff]  }
 0x4ca   : > { %7387 = vmatpush1.bf16.msra.mxu1 %v12601_v10  ;;  %v3287_v10 = vadd.f32 %v14436_v37, %v14466_v5  ;;  %v12697_v5 = vld [vmem:[#allocation13 + $0x848] ss:$24 sps:$4 sm:$0xff]  }
 0x4cb   : > { %7388 = vmatprep.subr.bf16.mxu1 %v12606_v16  ;;  %v12693_v16 = vld [vmem:[#allocation13 + $0x87c] ss:$24 sps:$4 sm:$0xff]  }
 0x4cc   : > { %13368 = vtanh.f32 %v3287_v10  ;;  %v12748_v10 = vld [vmem:[#allocation13 + $0x398] ss:$24 sps:$4 sm:$0xff]  }
 0x4ce   : > { %7389 = vmatpush2.bf16.msra.mxu1 %v12604_v17 }
 0x4cf   : > { %7390 = vmatprep.subr.bf16.mxu1 %v12609_v18 }
 0x4d1   : > { %v14527_v21 = vpop.f32.mrf.mxu1 }
 0x4d2   : > { %7391 = vmatpush2.bf16.msra.mxu1 %v12607_v9  ;;  %v5377_v1 = vadd.f32 %v14527_v21, %v5085_v34  ;;  %v12691_v21 = vld [vmem:[#allocation13 + $0x878] ss:$24 sps:$4 sm:$0xff]  }
 0x4d3   : > { %v14529_v24 = vpop.f32.mrf.mxu1  ;;  %7392 = vmatprep.subr.bf16.mxu1 %v12612_v19 }
 0x4d4   : > { %v5379_v2 = vadd.f32 %v14529_v24, %v5089_v61  ;;  %v5418_v17 = vadd.f32 %v14500_v35, %v5377_v1  ;;  %v12699_v24 = vld [vmem:[#allocation13 + $0x84c] ss:$24 sps:$4 sm:$0xff]   ;;  %v12742_v1 = vld [vmem:[#allocation13 + $0x3c8] ss:$24 sps:$4 sm:$0xff]  }
 0x4d5   : > { %v5380_v52 = vpop.f32.mrf.mxu1  ;;  %v12744_v61 = vld [vmem:[#allocation13 + $0x3cc] ss:$24 sps:$4 sm:$0xff]  }
 0x4d6   : > { %7393 = vmatpush2.bf16.msra.mxu1 %v12610_v22  ;;  %v5420_v9 = vadd.f32 %v14502_v42, %v5379_v2  ;;  %v12711_v42 = vld [vmem:[#allocation13 + $0x7ec] ss:$24 sps:$4 sm:$0xff]   ;;  %v12709_v52 = vld [vmem:[#allocation13 + $0x7e8] ss:$24 sps:$4 sm:$0xff]   ;;  %v12750_v2 = vld [vmem:[#allocation13 + $0x39c] ss:$24 sps:$4 sm:$0xff]  }
 0x4d7   : > { %v5381_v29 = vpop.f32.mrf.mxu1  ;;  %7394 = vmatprep.subr.bf16.mxu1 %v12615_v26 }
 0x4d9   : > { %v13369_v29 = vpop.eup %13368 }
 0x4da   : > { %7395 = vmatpush2.bf16.msra.mxu1 %v12613_v32  ;;  %v12717_v32 = vld [vmem:[#allocation13 + $0x7bc] ss:$24 sps:$4 sm:$0xff]  }
 0x4db   : > { %7396 = vmatprep.subr.bf16.mxu1 %v12618_v7 }
 0x4de   : > { %7397 = vmatpush2.bf16.msra.mxu1 %v12616_v41 }
 0x4df   : > { %7398 = vmatprep.subr.bf16.mxu1 %v12621_v53  ;;  %v12715_v53 = vld [vmem:[#allocation13 + $0x7b8] ss:$24 sps:$4 sm:$0xff]  }
 0x4e2   : > { %7399 = vmatpush2.bf16.msra.mxu1 %v12619_v23 }
 0x4e3   : > { %7400 = vmatprep.subr.bf16.mxu1 %v12624_v38 }
 0x4e6   : > { %7401 = vmatpush2.bf16.msra.mxu1 %v12622_v28  ;;  %v12723_v28 = vld [vmem:[#allocation13 + $0x78c] ss:$24 sps:$4 sm:$0xff]  }
 0x4e7   : > { %7402 = vmatprep.subr.bf16.mxu1 %v12627_v20 }
 0x4ea   : > { %7403 = vmatpush2.bf16.msra.mxu1 %v12625_v15 }
 0x4eb   : > { %7454 = vmatprep.subr.bf16.mxu1 %v12633_v57  ;;  %v12721_v57 = vld [vmem:[#allocation13 + $0x788] ss:$24 sps:$4 sm:$0xff]  }
 0x4ed   : > { %7405 = vmatmul.mubr.bf16.vlgmr.msra.gmra.mxu1 %v14506_v12 }
 0x4ee   : > { %7455 = vmatpush1.bf16.msra.mxu1 %v12631_v27 }
 0x4ef   : > { %7456 = vmatprep.subr.bf16.mxu1 %v12639_v45 }
 0x4f2   : > { %7457 = vmatpush1.bf16.msra.mxu1 %v12637_v31  ;;  %v12724_v31 = vld [vmem:[#allocation13 + $0x458] ss:$24 sps:$4 sm:$0xff]  }
 0x4f3   : > { %7458 = vmatprep.subr.bf16.mxu1 %v12645_v54 }
 0x4f6   : > { %7459 = vmatpush1.bf16.msra.mxu1 %v12643_v36  ;;  %v12729_v36 = vld [vmem:[#allocation13 + $0x464] ss:$24 sps:$4 sm:$0xff]  }
 0x4f7   : > { %7460 = vmatprep.subr.bf16.mxu1 %v12651_v56  ;;  %v12727_v56 = vld [vmem:[#allocation13 + $0x460] ss:$24 sps:$4 sm:$0xff]  }
 0x4fa   : > { %7461 = vmatpush1.bf16.msra.mxu1 %v12649_v30 }
 0x4fb   : > { %7462 = vmatprep.subr.bf16.mxu1 %v12657_v40  ;;  %v12732_v40 = vld [vmem:[#allocation13 + $0x42c] ss:$24 sps:$4 sm:$0xff]  }
 0x4fe   : > { %7463 = vmatpush1.bf16.msra.mxu1 %v12655_v43  ;;  %v12735_v43 = vld [vmem:[#allocation13 + $0x434] ss:$24 sps:$4 sm:$0xff]  }
 0x4ff   : > { %7464 = vmatprep.subr.bf16.mxu1 %v12663_v6  ;;  %v12730_v6 = vld [vmem:[#allocation13 + $0x428] ss:$24 sps:$4 sm:$0xff]  }
 0x502   : > { %7465 = vmatpush1.bf16.msra.mxu1 %v12661_v49 }
 0x503   : > { %7466 = vmatprep.subr.bf16.mxu1 %v12669_v50  ;;  %v12738_v50 = vld [vmem:[#allocation13 + $0x3fc] ss:$24 sps:$4 sm:$0xff]  }
 0x506   : > { %7467 = vmatpush1.bf16.msra.mxu1 %v12667_v3  ;;  %v12733_v3 = vld [vmem:[#allocation13 + $0x430] ss:$24 sps:$4 sm:$0xff]  }
 0x507   : > { %7468 = vmatprep.subr.bf16.mxu1 %v12675_v55 }
 0x50a   : > { %7469 = vmatpush1.bf16.msra.mxu1 %v12673_v58  ;;  %v12741_v58 = vld [vmem:[#allocation13 + $0x404] ss:$24 sps:$4 sm:$0xff]  }
 0x50b   : > { %7470 = vmatprep.subr.bf16.mxu1 %v12681_v59  ;;  %v12736_v59 = vld [vmem:[#allocation13 + $0x3f8] ss:$24 sps:$4 sm:$0xff]  }
 0x50e   : > { %7471 = vmatpush2.bf16.msra.mxu1 %v12679_v63  ;;  %v12739_v63 = vld [vmem:[#allocation13 + $0x400] ss:$24 sps:$4 sm:$0xff]  }
 0x50f   : > { %7472 = vmatprep.subr.bf16.mxu1 %v12687_v0  ;;  %v12747_v0 = vld [vmem:[#allocation13 + $0x3d4] ss:$24 sps:$4 sm:$0xff]  }
 0x511   : > { %v5458_v18 = vpop.f32.mrf.mxu1 }
 0x512   : > { %v5459_v19 = vadd.f32 %v5458_v18, %v5418_v17  ;;  %7473 = vmatpush2.bf16.msra.mxu1 %v12685_v4  ;;  %v12753_v4 = vld [vmem:[#allocation13 + $0x3a4] ss:$24 sps:$4 sm:$0xff]   ;;  %v12751_v17 = vld [vmem:[#allocation13 + $0x3a0] ss:$24 sps:$4 sm:$0xff]  }
 0x513   : > { %v5460_v22 = vpop.f32.mrf.mxu1  ;;  %7474 = vmatprep.subr.bf16.mxu1 %v12693_v16  ;;  %v12756_v16 = vld [vmem:[#allocation13 + $0x36c] ss:$24 sps:$4 sm:$0xff]   ;;  %v12754_v18 = vld [vmem:[#allocation13 + $0x368] ss:$24 sps:$4 sm:$0xff]  }
 0x514   : > { %13370 = vtanh.f32 %v5459_v19  ;;  %v5461_v26 = vadd.f32 %v5460_v22, %v5420_v9  ;;  %v12762_v9 = vld [vmem:[#allocation13 + $0x33c] ss:$24 sps:$4 sm:$0xff]   ;;  %v12757_v19 = vld [vmem:[#allocation13 + $0x370] ss:$24 sps:$4 sm:$0xff]  }
 0x515   : > { %13372 = vtanh.f32 %v3289_v11  ;;  %v5462_v37 = vpop.f32.mrf.mxu1  ;;  %v12759_v11 = vld [vmem:[#allocation13 + $0x374] ss:$24 sps:$4 sm:$0xff]   ;;  %v12760_v22 = vld [vmem:[#allocation13 + $0x338] ss:$24 sps:$4 sm:$0xff]  }
 0x516   : > { %13374 = vtanh.f32 %v5461_v26  ;;  %7475 = vmatpush2.bf16.msra.mxu1 %v12691_v21  ;;  %v12765_v21 = vld [vmem:[#allocation13 + $0x344] ss:$24 sps:$4 sm:$0xff]   ;;  %v12763_v26 = vld [vmem:[#allocation13 + $0x340] ss:$24 sps:$4 sm:$0xff]   ;;  %v12771_v37 = vld [vmem:[#allocation13 + $0x314] ss:$24 sps:$4 sm:$0xff]  }
 0x517   : > { %v5463_v35 = vpop.f32.mrf.mxu1  ;;  %7476 = vmatprep.subr.bf16.mxu1 %v12699_v24  ;;  %v12768_v24 = vld [vmem:[#allocation13 + $0x30c] ss:$24 sps:$4 sm:$0xff]  }
 0x518   : > { %v12774_v35 = vld [vmem:[#allocation13 + $0x5dc] ss:$24 sps:$4 sm:$0xff]  }
 0x51a   : > { %7477 = vmatpush2.bf16.msra.mxu1 %v12697_v5  ;;  %v12766_v5 = vld [vmem:[#allocation13 + $0x308] ss:$24 sps:$4 sm:$0xff]  }
 0x51b   : > { %7478 = vmatprep.subr.bf16.mxu1 %v12705_v44  ;;  %v12769_v44 = vld [vmem:[#allocation13 + $0x310] ss:$24 sps:$4 sm:$0xff]  }
 0x51e   : > { %7479 = vmatpush2.bf16.msra.mxu1 %v12703_v14  ;;  %v12777_v14 = vld [vmem:[#allocation13 + $0x5e4] ss:$24 sps:$4 sm:$0xff]  }
 0x51f   : > { %7480 = vmatprep.subr.bf16.mxu1 %v12711_v42  ;;  %v12772_v42 = vld [vmem:[#allocation13 + $0x5d8] ss:$24 sps:$4 sm:$0xff]  }
 0x521   : > { %v13371_v7 = vpop.eup %13370 }
 0x522   : > { %v13373_v41 = vpop.eup %13372  ;;  %7481 = vmatpush2.bf16.msra.mxu1 %v12709_v52  ;;  %v5475_v23 = vsub.f32 %v13369_v29, %v13371_v7  ;;  %v12780_v52 = vld [vmem:[#allocation13 + $0x5ac] ss:$24 sps:$4 sm:$0xff]   ;;  %v12778_v7 = vld [vmem:[#allocation13 + $0x5a8] ss:$24 sps:$4 sm:$0xff]  }
 0x523   : > { %v13375_v38 = vpop.eup %13374  ;;  %7482 = vmatprep.subr.bf16.mxu1 %v12717_v32  ;;  %v12775_v32 = vld [vmem:[#allocation13 + $0x5e0] ss:$24 sps:$4 sm:$0xff]   ;;  %v12783_v29 = vld [vmem:[#allocation13 + $0x5b4] ss:$24 sps:$4 sm:$0xff]  }
 0x524   : > { %v5476_v20 = vsub.f32 %v13373_v41, %v13375_v38  ;;  %v5481_v15 = vmul.f32 %v5475_v23, %v5475_v23  ;;  %v12786_v41 = vld [vmem:[#allocation13 + $0x57c] ss:$24 sps:$4 sm:$0xff]   ;;  %v12784_v38 = vld [vmem:[#allocation13 + $0x578] ss:$24 sps:$4 sm:$0xff]  }
 0x525   : > { %v12789_v23 = vld [vmem:[#allocation13 + $0x584] ss:$24 sps:$4 sm:$0xff]  }
 0x526   : > { %7483 = vmatpush2.bf16.msra.mxu1 %v12715_v53  ;;  %v5482_v27 = vmul.f32 %v5476_v20, %v5476_v20  ;;  %v14546_v54 = vpack.c.bf16 %v5481_v15, %v5481_v15  ;;  %v12781_v53 = vld [vmem:[#allocation13 + $0x5b0] ss:$24 sps:$4 sm:$0xff]   ;;  %v12787_v20 = vld [vmem:[#allocation13 + $0x580] ss:$24 sps:$4 sm:$0xff]   ;;  %v12795_v15 = vld [vmem:[#allocation13 + $0x554] ss:$24 sps:$4 sm:$0xff]  }
 0x527   : > { %7484 = vmatprep.subr.bf16.mxu1 %v12723_v28  ;;  %v12792_v28 = vld [vmem:[#allocation13 + $0x54c] ss:$24 sps:$4 sm:$0xff]  }
 0x528   : > { %v14544_v45 = vpack.c.bf16 %v5482_v27, %v5482_v27  ;;  %v12798_v27 = vld [vmem:[#allocation13 + $0x51c] ss:$24 sps:$4 sm:$0xff]  }
 0x52a   : > { %7485 = vmatpush2.bf16.msra.mxu1 %v12721_v57  ;;  %7363 = vmatprep.mubr.bf16.mxu0 %v14544_v45  ;;  %v12790_v57 = vld [vmem:[#allocation13 + $0x548] ss:$24 sps:$4 sm:$0xff]  }
 0x52b   : > { %7486 = vmatprep.mubr.bf16.mxu1 %v14544_v45  ;;  %v14550_v30 = vpop.f32.mrf.mxu0  ;;  %7364 = vmatmul.mubr.bf16.vlgmr.msra.gmra.mxu0 %v14546_v54 }
 0x52c   : > { %7414 = vmatpush1.bf16.msra.mxu0 %v12724_v31  ;;  %7445 = vmatprep.mubr.bf16.mxu0 %v14520_v46  ;;  %v12793_v31 = vld [vmem:[#allocation13 + $0x550] ss:$24 sps:$4 sm:$0xff]  }
 0x52d   : > { %7487 = vmatmul.mubr.bf16.vlgmr.msra.gmra.mxu1 %v14546_v54  ;;  %7536 = vmatprep.subr.bf16.mxu1 %v12729_v36  ;;  %v14555_v49 = vpop.f32.mrf.mxu0  ;;  %v12801_v36 = vld [vmem:[#allocation13 + $0x524] ss:$24 sps:$4 sm:$0xff]  }
 0x52e   : > { %7537 = vmatpush1.bf16.msra.mxu1 %v12727_v56  ;;  %7568 = vmatprep.mubr.bf16.mxu1 %v14520_v46  ;;  %v12745_v46 = vld [vmem:[#allocation13 + $0x3d0] ss:$24 sps:$4 sm:$0xff]  }
 0x52f   : > { %7415 = vmatprep.subr.bf16.mxu0 %v12732_v40  ;;  %v7287_v55 = vpop.f32.mrf.mxu0  ;;  %7538 = vmatprep.subr.bf16.mxu1 %v12735_v43  ;;  %v12796_v56 = vld [vmem:[#allocation13 + $0x518] ss:$24 sps:$4 sm:$0xff]   ;;  %v12804_v40 = vld [vmem:[#allocation13 + $0x4ec] ss:$24 sps:$4 sm:$0xff]  }
 0x530   : > { %7416 = vmatpush1.bf16.msra.mxu0 %v12730_v6  ;;  %v12799_v43 = vld [vmem:[#allocation13 + $0x520] ss:$24 sps:$4 sm:$0xff]   ;;  %v12807_v6 = vld [vmem:[#allocation13 + $0x4f4] ss:$24 sps:$4 sm:$0xff]   ;;  %v12805_v55 = vld [vmem:[#allocation13 + $0x4f0] ss:$24 sps:$4 sm:$0xff]  }
 0x531   : > { %v7288_v34 = vpop.f32.mrf.mxu0  ;;  %7417 = vmatprep.subr.bf16.mxu0 %v12738_v50  ;;  %v12802_v50 = vld [vmem:[#allocation13 + $0x4e8] ss:$24 sps:$4 sm:$0xff]  }
 0x532   : > { %7539 = vmatpush1.bf16.msra.mxu1 %v12733_v3  ;;  %v12810_v3 = vld [vmem:[#allocation13 + $0x4bc] ss:$24 sps:$4 sm:$0xff]   ;;  %v12816_v34 = vld [vmem:[#allocation13 + $0x48c] ss:$24 sps:$4 sm:$0xff]  }
 0x533   : > { %7540 = vmatprep.subr.bf16.mxu1 %v12741_v58  ;;  %v12813_v58 = vld [vmem:[#allocation13 + $0x4c4] ss:$24 sps:$4 sm:$0xff]  }
 0x534   : > { %7418 = vmatpush1.bf16.msra.mxu0 %v12736_v59  ;;  %v12808_v59 = vld [vmem:[#allocation13 + $0x4b8] ss:$24 sps:$4 sm:$0xff]  }
 0x535   : > { %7419 = vmatprep.subr.bf16.mxu0 %v12744_v61  ;;  %v12811_v61 = vld [vmem:[#allocation13 + $0x4c0] ss:$24 sps:$4 sm:$0xff]  }
 0x536   : > { %7541 = vmatpush1.bf16.msra.mxu1 %v12739_v63  ;;  %v12819_v63 = vld [vmem:[#allocation13 + $0x494] ss:$24 sps:$4 sm:$0xff]  }
 0x537   : > { %7542 = vmatprep.subr.bf16.mxu1 %v12747_v0  ;;  %v12814_v0 = vld [vmem:[#allocation13 + $0x488] ss:$24 sps:$4 sm:$0xff]  }
 0x538   : > { %7420 = vmatpush1.bf16.msra.mxu0 %v12742_v1  ;;  %v14558_v1 = vld [vmem:[#allocation14] sm:$0x3f] }
 0x539   : > { %7421 = vmatprep.subr.bf16.mxu0 %v12750_v2  ;;  %v12822_v2 = vld [vmem:[#allocation13 + $0x164] ss:$24 sps:$4 sm:$0xff]  }
 0x53a   : > { %7543 = vmatpush1.bf16.msra.mxu1 %v12745_v46  ;;  %v12817_v46 = vld [vmem:[#allocation13 + $0x490] ss:$24 sps:$4 sm:$0xff]  }
 0x53b   : > { %7544 = vmatprep.subr.bf16.mxu1 %v12753_v4  ;;  %v7222_v4 = vrot.slane %v14558_v1, %v14392_v25 }
 0x53c   : > { %7422 = vmatpush1.bf16.msra.mxu0 %v12748_v10  ;;  %v12820_v10 = vld [vmem:[#allocation13 + $0x160] ss:$24 sps:$4 sm:$0xff]  }
 0x53d   : > { %7423 = vmatprep.subr.bf16.mxu0 %v12756_v16  ;;  %v12825_v16 = vld [vmem:[#allocation13 + $0x134] ss:$24 sps:$4 sm:$0xff]  }
 0x53e   : > { %7545 = vmatpush1.bf16.msra.mxu1 %v12751_v17  ;;  %v7226_v17 = vrot.slane %v14558_v1, %v14360_v60 }
 0x53f   : > { %7546 = vmatprep.subr.bf16.mxu1 %v12759_v11  ;;  %v7284_v11 = vadd.f32 %v14550_v30, %v7222_v4  ;;  %v12831_v30 = vld [vmem:[#allocation13 + $0xd4] ss:$24 sps:$4 sm:$0xff]   ;;  %v12877_v4 = vld [vmem:[#allocation13 + $0x6d0] ss:$24 sps:$4 sm:$0xff]  }
 0x540   : > { %7424 = vmatpush1.bf16.msra.mxu0 %v12754_v18  ;;  %v12823_v18 = vld [vmem:[#allocation13 + $0x130] ss:$24 sps:$4 sm:$0xff]  }
 0x541   : > { %7425 = vmatprep.subr.bf16.mxu0 %v12762_v9 }
 0x542   : > { %7547 = vmatpush1.bf16.msra.mxu1 %v12757_v19  ;;  %v12828_v19 = vld [vmem:[#allocation13 + $0x104] ss:$24 sps:$4 sm:$0xff]  }
 0x543   : > { %7548 = vmatprep.subr.bf16.mxu1 %v12765_v21  ;;  %v7286_v21 = vadd.f32 %v14555_v49, %v7226_v17  ;;  %v12835_v49 = vld [vmem:[#allocation13 + $0x70] ss:$24 sps:$4 sm:$0xff]   ;;  %v12888_v17 = vld [vmem:[#allocation13 + $0x644] ss:$24 sps:$4 sm:$0xff]  }
 0x544   : > { %7426 = vmatpush1.bf16.msra.mxu0 %v12760_v22 }
 0x545   : > { %7427 = vmatprep.subr.bf16.mxu0 %v12768_v24 }
 0x546   : > { %7549 = vmatpush1.bf16.msra.mxu1 %v12763_v26 }
 0x547   : > { %7550 = vmatprep.subr.bf16.mxu1 %v12771_v37  ;;  %v12826_v37 = vld [vmem:[#allocation13 + $0x100] ss:$24 sps:$4 sm:$0xff]  }
 0x548   : > { %7428 = vmatpush1.bf16.msra.mxu0 %v12766_v5 }
 0x549   : > { %7429 = vmatprep.subr.bf16.mxu0 %v12774_v35 }
 0x54a   : > { %7551 = vmatpush1.bf16.msra.mxu1 %v12769_v44  ;;  %v12832_v44 = vld [vmem:[#allocation13 + $0xa0] ss:$24 sps:$4 sm:$0xff]  }
 0x54b   : > { %7552 = vmatprep.subr.bf16.mxu1 %v12777_v14  ;;  %v12837_v14 = vld [vmem:[#allocation13 + $0x74] ss:$24 sps:$4 sm:$0xff]  }
 0x54c   : > { %7430 = vmatpush2.bf16.msra.mxu0 %v12772_v42  ;;  %v12840_v42 = vld [vmem:[#allocation13 + $0x44] ss:$24 sps:$4 sm:$0xff]  }
 0x54d   : > { %7431 = vmatprep.subr.bf16.mxu0 %v12780_v52  ;;  %v12838_v52 = vld [vmem:[#allocation13 + $0x40] ss:$24 sps:$4 sm:$0xff]  }
 0x54e   : > { %7553 = vmatpush2.bf16.msra.mxu1 %v12775_v32  ;;  %v12843_v32 = vld [vmem:[#allocation13 + $0x14] ss:$24 sps:$4 sm:$0xff]  }
 0x54f   : > { %7554 = vmatprep.subr.bf16.mxu1 %v12783_v29  ;;  %v12841_v29 = vld [vmem:[#allocation13 + $0x10] ss:$24 sps:$4 sm:$0xff]  }
 0x550   : > { %7432 = vmatpush2.bf16.msra.mxu0 %v12778_v7  ;;  %v12846_v7 = vld [vmem:[#allocation13 + $0x2e4] ss:$24 sps:$4 sm:$0xff]  }
 0x551   : > { %7433 = vmatprep.subr.bf16.mxu0 %v12786_v41  ;;  %v12844_v41 = vld [vmem:[#allocation13 + $0x2e0] ss:$24 sps:$4 sm:$0xff]  }
 0x552   : > { %7555 = vmatpush2.bf16.msra.mxu1 %v12781_v53  ;;  %v12849_v53 = vld [vmem:[#allocation13 + $0x2b4] ss:$24 sps:$4 sm:$0xff]  }
 0x553   : > { %7556 = vmatprep.subr.bf16.mxu1 %v12789_v23  ;;  %v12847_v23 = vld [vmem:[#allocation13 + $0x2b0] ss:$24 sps:$4 sm:$0xff]  }
 0x554   : > { %7434 = vmatpush2.bf16.msra.mxu0 %v12784_v38  ;;  %v12852_v38 = vld [vmem:[#allocation13 + $0x284] ss:$24 sps:$4 sm:$0xff]  }
 0x555   : > { %7435 = vmatprep.subr.bf16.mxu0 %v12792_v28  ;;  %v12850_v28 = vld [vmem:[#allocation13 + $0x280] ss:$24 sps:$4 sm:$0xff]  }
 0x556   : > { %7557 = vmatpush2.bf16.msra.mxu1 %v12787_v20  ;;  %v12855_v20 = vld [vmem:[#allocation13 + $0x254] ss:$24 sps:$4 sm:$0xff]  }
 0x557   : > { %7558 = vmatprep.subr.bf16.mxu1 %v12795_v15  ;;  %v12853_v15 = vld [vmem:[#allocation13 + $0x250] ss:$24 sps:$4 sm:$0xff]  }
 0x558   : > { %7436 = vmatpush2.bf16.msra.mxu0 %v12790_v57  ;;  %v12858_v57 = vld [vmem:[#allocation13 + $0x224] ss:$24 sps:$4 sm:$0xff]  }
 0x559   : > { %7437 = vmatprep.subr.bf16.mxu0 %v12798_v27  ;;  %v12856_v27 = vld [vmem:[#allocation13 + $0x220] ss:$24 sps:$4 sm:$0xff]  }
 0x55a   : > { %7559 = vmatpush2.bf16.msra.mxu1 %v12793_v31  ;;  %v12861_v31 = vld [vmem:[#allocation13 + $0x1f4] ss:$24 sps:$4 sm:$0xff]  }
 0x55b   : > { %7560 = vmatprep.subr.bf16.mxu1 %v12801_v36  ;;  %v12859_v36 = vld [vmem:[#allocation13 + $0x1f0] ss:$24 sps:$4 sm:$0xff]  }
 0x55c   : > { %7438 = vmatpush2.bf16.msra.mxu0 %v12796_v56  ;;  %v12864_v56 = vld [vmem:[#allocation13 + $0x1c4] ss:$24 sps:$4 sm:$0xff]  }
 0x55d   : > { %7439 = vmatprep.subr.bf16.mxu0 %v12804_v40  ;;  %v12862_v40 = vld [vmem:[#allocation13 + $0x1c0] ss:$24 sps:$4 sm:$0xff]  }
 0x55e   : > { %7561 = vmatpush2.bf16.msra.mxu1 %v12799_v43  ;;  %v12867_v43 = vld [vmem:[#allocation13 + $0x194] ss:$24 sps:$4 sm:$0xff]  }
 0x55f   : > { %7562 = vmatprep.subr.bf16.mxu1 %v12807_v6  ;;  %v12865_v6 = vld [vmem:[#allocation13 + $0x190] ss:$24 sps:$4 sm:$0xff]  }
 0x560   : > { %7440 = vmatpush2.bf16.msra.mxu0 %v12802_v50  ;;  %v12870_v50 = vld [vmem:[#allocation13 + $0x764] ss:$24 sps:$4 sm:$0xff]  }
 0x561   : > { %7441 = vmatprep.subr.bf16.mxu0 %v12810_v3  ;;  %v12868_v3 = vld [vmem:[#allocation13 + $0x760] ss:$24 sps:$4 sm:$0xff]  }
 0x562   : > { %7563 = vmatpush2.bf16.msra.mxu1 %v12805_v55  ;;  %v12873_v55 = vld [vmem:[#allocation13 + $0x734] ss:$24 sps:$4 sm:$0xff]  }
 0x563   : > { %7564 = vmatprep.subr.bf16.mxu1 %v12813_v58  ;;  %v12871_v58 = vld [vmem:[#allocation13 + $0x730] ss:$24 sps:$4 sm:$0xff]  }
 0x564   : > { %7442 = vmatpush2.bf16.msra.mxu0 %v12808_v59 }
 0x565   : > { %7443 = vmatprep.subr.bf16.mxu0 %v12816_v34  ;;  %v12876_v34 = vld [vmem:[#allocation13 + $0x704] ss:$24 sps:$4 sm:$0xff]  }
 0x566   : > { %7565 = vmatpush2.bf16.msra.mxu1 %v12811_v61 }
 0x567   : > { %7566 = vmatprep.subr.bf16.mxu1 %v12819_v63  ;;  %v12874_v63 = vld [vmem:[#allocation13 + $0x700] ss:$24 sps:$4 sm:$0xff]  }
 0x568   : > { %7444 = vmatpush2.bf16.msra.mxu0 %v12814_v0 }
 0x569   : > { %7495 = vmatprep.subr.bf16.mxu0 %v12822_v2  ;;  %v12879_v2 = vld [vmem:[#allocation13 + $0x6d4] ss:$24 sps:$4 sm:$0xff]  }
 0x56a   : > { %7567 = vmatpush2.bf16.msra.mxu1 %v12817_v46 }
 0x56b   : > { %7446 = vmatmul.mubr.bf16.vlgmr.msra.gmra.mxu0 %v14522_v48 }
 0x56c   : > { %7496 = vmatpush1.bf16.msra.mxu0 %v12820_v10  ;;  %7527 = vmatprep.mubr.bf16.mxu0 %v14504_v8  ;;  %v12829_v8 = vld [vmem:[#allocation13 + $0xd0] ss:$24 sps:$4 sm:$0xff]   ;;  %v12880_v10 = vld [vmem:[#allocation13 + $0x6a0] ss:$24 sps:$4 sm:$0xff]  }
 0x56d   : > { %7569 = vmatmul.mubr.bf16.vlgmr.msra.gmra.mxu1 %v14522_v48  ;;  %v7324_v9 = vpop.f32.mrf.mxu1  ;;  %7497 = vmatprep.subr.bf16.mxu0 %v12825_v16  ;;  %v12834_v48 = vld [vmem:[#allocation13 + $0xa4] ss:$24 sps:$4 sm:$0xff]   ;;  %v12883_v16 = vld [vmem:[#allocation13 + $0x670] ss:$24 sps:$4 sm:$0xff]  }
 0x56e   : > { %v14569_v22 = vadd.f32 %v7324_v9, %v7284_v11  ;;  %v12886_v11 = vld [vmem:[#allocation13 + $0x640] ss:$24 sps:$4 sm:$0xff]   ;;  %v12889_v9 = vld [vmem:[#allocation13 + $0x610] ss:$24 sps:$4 sm:$0xff]  }
 0x56f   : > { %v7326_v24 = vpop.f32.mrf.mxu1 }
 0x570   : > { %v14571_v26 = vadd.f32 %v7326_v24, %v7286_v21  ;;  %7498 = vmatpush1.bf16.msra.mxu0 %v12823_v18  ;;  %v12891_v18 = vld [vmem:[#allocation13 + $0x614] ss:$24 sps:$4 sm:$0xff]   ;;  %v12892_v21 = vld [vmem:[#allocation13 + $0x8e0] ss:$24 sps:$4 sm:$0xff]  }
 0x571   : > { %v7328_v5 = vpop.f32.mrf.mxu1  ;;  %7499 = vmatprep.subr.bf16.mxu0 %v12828_v19  ;;  %v12894_v19 = vld [vmem:[#allocation13 + $0x8e4] ss:$24 sps:$4 sm:$0xff]   ;;  %v12897_v24 = vld [vmem:[#allocation13 + $0x8b4] ss:$24 sps:$4 sm:$0xff]  }
 0x572   : > { %v12900_v5 = vld [vmem:[#allocation13 + $0x884] ss:$24 sps:$4 sm:$0xff]  }
 0x573   : > { %v7329_v35 = vpop.f32.mrf.mxu1 }
 0x574   : > { %7500 = vmatpush1.bf16.msra.mxu0 %v12826_v37  ;;  %v12895_v37 = vld [vmem:[#allocation13 + $0x8b0] ss:$24 sps:$4 sm:$0xff]   ;;  %v12903_v35 = vld [vmem:[#allocation13 + $0x854] ss:$24 sps:$4 sm:$0xff]  }
 0x575   : > { %7501 = vmatprep.subr.bf16.mxu0 %v12831_v30  ;;  %v12898_v30 = vld [vmem:[#allocation13 + $0x880] ss:$24 sps:$4 sm:$0xff]  }
 0x578   : > { %7502 = vmatpush1.bf16.msra.mxu0 %v12829_v8  ;;  %v12901_v8 = vld [vmem:[#allocation13 + $0x850] ss:$24 sps:$4 sm:$0xff]  }
 0x579   : > { %7503 = vmatprep.subr.bf16.mxu0 %v12834_v48  ;;  %v12906_v48 = vld [vmem:[#allocation13 + $0x824] ss:$24 sps:$4 sm:$0xff]  }
 0x57c   : > { %7504 = vmatpush1.bf16.msra.mxu0 %v12832_v44  ;;  %v12904_v44 = vld [vmem:[#allocation13 + $0x820] ss:$24 sps:$4 sm:$0xff]  }
 0x57d   : > { %7505 = vmatprep.subr.bf16.mxu0 %v12837_v14  ;;  %v12909_v14 = vld [vmem:[#allocation13 + $0x7f4] ss:$24 sps:$4 sm:$0xff]  }
 0x580   : > { %7506 = vmatpush1.bf16.msra.mxu0 %v12835_v49  ;;  %v12907_v49 = vld [vmem:[#allocation13 + $0x7f0] ss:$24 sps:$4 sm:$0xff]  }
 0x581   : > { %7507 = vmatprep.subr.bf16.mxu0 %v12840_v42  ;;  %v12912_v42 = vld [vmem:[#allocation13 + $0x7c4] ss:$24 sps:$4 sm:$0xff]  }
 0x584   : > { %7508 = vmatpush1.bf16.msra.mxu0 %v12838_v52  ;;  %v12910_v52 = vld [vmem:[#allocation13 + $0x7c0] ss:$24 sps:$4 sm:$0xff]  }
 0x585   : > { %7509 = vmatprep.subr.bf16.mxu0 %v12843_v32  ;;  %v12915_v32 = vld [vmem:[#allocation13 + $0x794] ss:$24 sps:$4 sm:$0xff]  }
 0x588   : > { %7510 = vmatpush1.bf16.msra.mxu0 %v12841_v29  ;;  %v12913_v29 = vld [vmem:[#allocation13 + $0x790] ss:$24 sps:$4 sm:$0xff]  }
 0x589   : > { %7511 = vmatprep.subr.bf16.mxu0 %v12846_v7 }
 0x58c   : > { %7512 = vmatpush2.bf16.msra.mxu0 %v12844_v41 }
 0x58d   : > { %7513 = vmatprep.subr.bf16.mxu0 %v12849_v53 }
 0x590   : > { %7514 = vmatpush2.bf16.msra.mxu0 %v12847_v23 }
 0x591   : > { %7515 = vmatprep.subr.bf16.mxu0 %v12852_v38 }
 0x594   : > { %7516 = vmatpush2.bf16.msra.mxu0 %v12850_v28 }
 0x595   : > { %7517 = vmatprep.subr.bf16.mxu0 %v12855_v20 }
 0x598   : > { %7518 = vmatpush2.bf16.msra.mxu0 %v12853_v15 }
 0x599   : > { %7519 = vmatprep.subr.bf16.mxu0 %v12858_v57 }
 0x59c   : > { %7520 = vmatpush2.bf16.msra.mxu0 %v12856_v27 }
 0x59d   : > { %7521 = vmatprep.subr.bf16.mxu0 %v12861_v31  ;;  %v7230_v31 = vrot.slane %v14558_v1, %v14363_v62 }
 0x5a0   : > { %7522 = vmatpush2.bf16.msra.mxu0 %v12859_v36 }
 0x5a1   : > { %7523 = vmatprep.subr.bf16.mxu0 %v12864_v56 }
 0x5a4   : > { %7524 = vmatpush2.bf16.msra.mxu0 %v12862_v40 }
 0x5a5   : > { %7525 = vmatprep.subr.bf16.mxu0 %v12867_v43 }
 0x5a8   : > { %7526 = vmatpush2.bf16.msra.mxu0 %v12865_v6 }
 0x5a9   : > { %7577 = vmatprep.subr.bf16.mxu0 %v12870_v50 }
 0x5ab   : > { %7528 = vmatmul.mubr.bf16.vlgmr.msra.gmra.mxu0 %v14506_v12  ;;  %v12882_v12 = vld [vmem:[#allocation13 + $0x6a4] ss:$24 sps:$4 sm:$0xff]  }
 0x5ac   : > { %7578 = vmatpush1.bf16.msra.mxu0 %v12868_v3  ;;  %7609 = vmatprep.mubr.bf16.mxu0 %v14544_v45  ;;  %v12885_v45 = vld [vmem:[#allocation13 + $0x674] ss:$24 sps:$4 sm:$0xff]  }
 0x5ad   : > { %v14575_v59 = vpop.f32.mrf.mxu1  ;;  %7579 = vmatprep.subr.bf16.mxu0 %v12873_v55 }
 0x5ae   : > { %v7407_v36 = vadd.f32 %v14575_v59, %v7230_v31  ;;  %v12918_v59 = vld [vmem:[#allocation16 + $0x154] ss:$24 sps:$4 sm:$0xff]  }
 0x5af   : > { %v14577_v61 = vpop.f32.mrf.mxu1  ;;  %9419 = vmatprep.subr.bf16.mxu1 %v12918_v59 }
 0x5b0   : > { %7580 = vmatpush1.bf16.msra.mxu0 %v12871_v58 }
 0x5b1   : > { %v7410_v0 = vpop.f32.mrf.mxu1  ;;  %7581 = vmatprep.subr.bf16.mxu0 %v12876_v34 }
 0x5b3   : > { %v7411_v46 = vpop.f32.mrf.mxu1 }
 0x5b4   : > { %7582 = vmatpush1.bf16.msra.mxu0 %v12874_v63  ;;  %v12919_v46 = vld [vmem:[#allocation16 + $0x450] ss:$24 sps:$4 sm:$0xff]  }
 0x5b5   : > { %7583 = vmatprep.subr.bf16.mxu0 %v12879_v2  ;;  %v12916_v2 = vld [vmem:[#allocation16 + $0x150] ss:$24 sps:$4 sm:$0xff]  }
 0x5b6   : > { %9420 = vmatpush1.bf16.msra.mxu1 %v12916_v2 }
 0x5b8   : > { %7584 = vmatpush1.bf16.msra.mxu0 %v12877_v4  ;;  %v12921_v4 = vld [vmem:[#allocation16 + $0x454] ss:$24 sps:$4 sm:$0xff]  }
 0x5b9   : > { %7585 = vmatprep.subr.bf16.mxu0 %v12882_v12  ;;  %v12927_v12 = vld [vmem:[#allocation16 + $0x424] ss:$24 sps:$4 sm:$0xff]  }
 0x5bc   : > { %7586 = vmatpush1.bf16.msra.mxu0 %v12880_v10  ;;  %v12922_v10 = vld [vmem:[#allocation16 + $0x120] ss:$24 sps:$4 sm:$0xff]  }
 0x5bd   : > { %7587 = vmatprep.subr.bf16.mxu0 %v12885_v45  ;;  %v12925_v45 = vld [vmem:[#allocation16 + $0x420] ss:$24 sps:$4 sm:$0xff]  }
 0x5c0   : > { %7588 = vmatpush1.bf16.msra.mxu0 %v12883_v16  ;;  %v12930_v16 = vld [vmem:[#allocation16 + $0xf4] ss:$24 sps:$4 sm:$0xff]  }
 0x5c1   : > { %7589 = vmatprep.subr.bf16.mxu0 %v12888_v17  ;;  %v12933_v17 = vld [vmem:[#allocation16 + $0x3f4] ss:$24 sps:$4 sm:$0xff]  }
 0x5c4   : > { %7590 = vmatpush1.bf16.msra.mxu0 %v12886_v11  ;;  %v12928_v11 = vld [vmem:[#allocation16 + $0xf0] ss:$24 sps:$4 sm:$0xff]  }
 0x5c5   : > { %7591 = vmatprep.subr.bf16.mxu0 %v12891_v18  ;;  %v12931_v18 = vld [vmem:[#allocation16 + $0x3f0] ss:$24 sps:$4 sm:$0xff]  }
 0x5c8   : > { %7592 = vmatpush1.bf16.msra.mxu0 %v12889_v9  ;;  %v12936_v9 = vld [vmem:[#allocation16 + $0xc4] ss:$24 sps:$4 sm:$0xff]  }
 0x5c9   : > { %7593 = vmatprep.subr.bf16.mxu0 %v12894_v19  ;;  %v12939_v19 = vld [vmem:[#allocation16 + $0x3c4] ss:$24 sps:$4 sm:$0xff]  }
 0x5cc   : > { %7594 = vmatpush2.bf16.msra.mxu0 %v12892_v21  ;;  %v12934_v21 = vld [vmem:[#allocation16 + $0xc0] ss:$24 sps:$4 sm:$0xff]  }
 0x5cd   : > { %7595 = vmatprep.subr.bf16.mxu0 %v12897_v24  ;;  %v12937_v24 = vld [vmem:[#allocation16 + $0x3c0] ss:$24 sps:$4 sm:$0xff]  }
 0x5d0   : > { %7596 = vmatpush2.bf16.msra.mxu0 %v12895_v37  ;;  %v12942_v37 = vld [vmem:[#allocation16 + $0x94] ss:$24 sps:$4 sm:$0xff]  }
 0x5d1   : > { %7597 = vmatprep.subr.bf16.mxu0 %v12900_v5  ;;  %v12945_v5 = vld [vmem:[#allocation16 + $0x394] ss:$24 sps:$4 sm:$0xff]  }
 0x5d4   : > { %7598 = vmatpush2.bf16.msra.mxu0 %v12898_v30  ;;  %v12940_v30 = vld [vmem:[#allocation16 + $0x90] ss:$24 sps:$4 sm:$0xff]  }
 0x5d5   : > { %7599 = vmatprep.subr.bf16.mxu0 %v12903_v35  ;;  %v12943_v35 = vld [vmem:[#allocation16 + $0x390] ss:$24 sps:$4 sm:$0xff]  }
 0x5d8   : > { %7600 = vmatpush2.bf16.msra.mxu0 %v12901_v8  ;;  %v12948_v8 = vld [vmem:[#allocation16 + $0x64] ss:$24 sps:$4 sm:$0xff]  }
 0x5d9   : > { %7601 = vmatprep.subr.bf16.mxu0 %v12906_v48  ;;  %v12951_v48 = vld [vmem:[#allocation16 + $0x364] ss:$24 sps:$4 sm:$0xff]  }
 0x5dc   : > { %7602 = vmatpush2.bf16.msra.mxu0 %v12904_v44  ;;  %v12946_v44 = vld [vmem:[#allocation16 + $0x60] ss:$24 sps:$4 sm:$0xff]  }
 0x5dd   : > { %7603 = vmatprep.subr.bf16.mxu0 %v12909_v14  ;;  %v12949_v14 = vld [vmem:[#allocation16 + $0x360] ss:$24 sps:$4 sm:$0xff]  }
 0x5e0   : > { %7604 = vmatpush2.bf16.msra.mxu0 %v12907_v49  ;;  %v12954_v49 = vld [vmem:[#allocation16 + $0x34] ss:$24 sps:$4 sm:$0xff]  }
 0x5e1   : > { %7605 = vmatprep.subr.bf16.mxu0 %v12912_v42  ;;  %v12957_v42 = vld [vmem:[#allocation16 + $0x334] ss:$24 sps:$4 sm:$0xff]  }
 0x5e4   : > { %7606 = vmatpush2.bf16.msra.mxu0 %v12910_v52  ;;  %v12952_v52 = vld [vmem:[#allocation16 + $0x30] ss:$24 sps:$4 sm:$0xff]  }
 0x5e5   : > { %7607 = vmatprep.subr.bf16.mxu0 %v12915_v32  ;;  %v12955_v32 = vld [vmem:[#allocation16 + $0x330] ss:$24 sps:$4 sm:$0xff]  }
 0x5e8   : > { %7608 = vmatpush2.bf16.msra.mxu0 %v12913_v29 }
 0x5e9   : > { %9460 = vmatprep.subr.bf16.mxu0 %v12921_v4 }
 0x5eb   : > { %7610 = vmatmul.mubr.bf16.vlgmr.msra.gmra.mxu0 %v14546_v54  ;;  %v7365_v7 = vpop.f32.mrf.mxu0  ;;  %v7234_v54 = vrot.slane %v14558_v1, %v14357_v39 }
 0x5ec   : > { %v14581_v41 = vadd.f32 %v7365_v7, %v14569_v22  ;;  %9461 = vmatpush1.bf16.msra.mxu0 %v12919_v46 }
 0x5ed   : > { %v7488_v53 = vpop.f32.mrf.mxu1  ;;  %v7367_v23 = vpop.f32.mrf.mxu0  ;;  %v7409_v56 = vadd.f32 %v14577_v61, %v7234_v54  ;;  %v12924_v61 = vld [vmem:[#allocation16 + $0x124] ss:$24 sps:$4 sm:$0xff]   ;;  %9462 = vmatprep.subr.bf16.mxu0 %v12927_v12 }
 0x5ee   : > { %v14584_v38 = vadd.f32 %v7367_v23, %v14571_v26  ;;  %9421 = vmatprep.subr.bf16.mxu1 %v12924_v61 }
 0x5ef   : > { %v7490_v28 = vpop.f32.mrf.mxu1  ;;  %v7369_v20 = vpop.f32.mrf.mxu0  ;;  %9422 = vmatpush1.bf16.msra.mxu1 %v12922_v10 }
 0x5f0   : > { %9463 = vmatpush1.bf16.msra.mxu0 %v12925_v45  ;;  %9423 = vmatprep.subr.bf16.mxu1 %v12930_v16  ;;  %v7238_v20 = vrot.slane %v14558_v1, %v14422_v13 }
 0x5f1   : > { %v7492_v15 = vpop.f32.mrf.mxu1  ;;  %v7370_v57 = vpop.f32.mrf.mxu0  ;;  %9464 = vmatprep.subr.bf16.mxu0 %v12933_v17  ;;  %v12960_v17 = vld [vmem:[#allocation16 + $0x4] ss:$24 sps:$4 sm:$0xff]  }
 0x5f2   : > { %v7618_v15 = vmul.f32 %v14581_v41, %v14581_v41 }
 0x5f3   : > { %v7493_v27 = vpop.f32.mrf.mxu1  ;;  %9424 = vmatpush1.bf16.msra.mxu1 %v12928_v11  ;;  %v12963_v11 = vld [vmem:[#allocation16 + $0x304] ss:$24 sps:$4 sm:$0xff]  }
 0x5f4   : > { %9465 = vmatpush1.bf16.msra.mxu0 %v12931_v18  ;;  %9425 = vmatprep.subr.bf16.mxu1 %v12936_v9  ;;  %v7242_v27 = vrot.slane %v14558_v1, %v14397_v33  ;;  %v12958_v18 = vld [vmem:[#allocation16] ss:$24 sps:$4 sm:$0xff]  }
 0x5f5   : > { %9466 = vmatprep.subr.bf16.mxu0 %v12939_v19  ;;  %v12961_v9 = vld [vmem:[#allocation16 + $0x300] ss:$24 sps:$4 sm:$0xff]   ;;  %v12966_v19 = vld [vmem:[#allocation16 + $0x2d4] ss:$24 sps:$4 sm:$0xff]  }
 0x5f7   : > { %9426 = vmatpush1.bf16.msra.mxu1 %v12934_v21  ;;  %v12969_v21 = vld [vmem:[#allocation16 + $0x5d4] ss:$24 sps:$4 sm:$0xff]  }
 0x5f8   : > { %9467 = vmatpush1.bf16.msra.mxu0 %v12937_v24  ;;  %9427 = vmatprep.subr.bf16.mxu1 %v12942_v37  ;;  %v12964_v24 = vld [vmem:[#allocation16 + $0x2d0] ss:$24 sps:$4 sm:$0xff]  }
 0x5f9   : > { %9468 = vmatprep.subr.bf16.mxu0 %v12945_v5  ;;  %v12967_v37 = vld [vmem:[#allocation16 + $0x5d0] ss:$24 sps:$4 sm:$0xff]   ;;  %v12972_v5 = vld [vmem:[#allocation16 + $0x2a4] ss:$24 sps:$4 sm:$0xff]  }
 0x5fb   : > { %9428 = vmatpush1.bf16.msra.mxu1 %v12940_v30  ;;  %v12975_v30 = vld [vmem:[#allocation16 + $0x5a4] ss:$24 sps:$4 sm:$0xff]  }
 0x5fc   : > { %9469 = vmatpush1.bf16.msra.mxu0 %v12943_v35  ;;  %9429 = vmatprep.subr.bf16.mxu1 %v12948_v8  ;;  %v12970_v35 = vld [vmem:[#allocation16 + $0x2a0] ss:$24 sps:$4 sm:$0xff]  }
 0x5fd   : > { %9470 = vmatprep.subr.bf16.mxu0 %v12951_v48  ;;  %v12973_v8 = vld [vmem:[#allocation16 + $0x5a0] ss:$24 sps:$4 sm:$0xff]   ;;  %v12978_v48 = vld [vmem:[#allocation16 + $0x274] ss:$24 sps:$4 sm:$0xff]  }
 0x5ff   : > { %9430 = vmatpush1.bf16.msra.mxu1 %v12946_v44  ;;  %v12981_v44 = vld [vmem:[#allocation16 + $0x574] ss:$24 sps:$4 sm:$0xff]  }
 0x600   : > { %9471 = vmatpush1.bf16.msra.mxu0 %v12949_v14  ;;  %9431 = vmatprep.subr.bf16.mxu1 %v12954_v49  ;;  %v12976_v14 = vld [vmem:[#allocation16 + $0x270] ss:$24 sps:$4 sm:$0xff]  }
 0x601   : > { %9472 = vmatprep.subr.bf16.mxu0 %v12957_v42  ;;  %v12979_v49 = vld [vmem:[#allocation16 + $0x570] ss:$24 sps:$4 sm:$0xff]   ;;  %v12984_v42 = vld [vmem:[#allocation16 + $0x244] ss:$24 sps:$4 sm:$0xff]  }
 0x603   : > { %9432 = vmatpush1.bf16.msra.mxu1 %v12952_v52  ;;  %v12987_v52 = vld [vmem:[#allocation16 + $0x544] ss:$24 sps:$4 sm:$0xff]  }
 0x604   : > { %9473 = vmatpush1.bf16.msra.mxu0 %v12955_v32  ;;  %9433 = vmatprep.subr.bf16.mxu1 %v12960_v17  ;;  %v12982_v32 = vld [vmem:[#allocation16 + $0x240] ss:$24 sps:$4 sm:$0xff]  }
 0x605   : > { %9474 = vmatprep.subr.bf16.mxu0 %v12963_v11 }
 0x607   : > { %9434 = vmatpush1.bf16.msra.mxu1 %v12958_v18 }
 0x608   : > { %9475 = vmatpush1.bf16.msra.mxu0 %v12961_v9  ;;  %9435 = vmatprep.subr.bf16.mxu1 %v12966_v19  ;;  %v13012_v9 = vld [vmem:[#allocation16 + $0x750] ss:$24 sps:$4 sm:$0xff]  }
 0x609   : > { %9476 = vmatprep.subr.bf16.mxu0 %v12969_v21  ;;  %v13015_v19 = vld [vmem:[#allocation16 + $0x158] ss:$24 sps:$4 sm:$0xff]  }
 0x60b   : > { %9436 = vmatpush2.bf16.msra.mxu1 %v12964_v24  ;;  %v13021_v24 = vld [vmem:[#allocation16 + $0x128] ss:$24 sps:$4 sm:$0xff]  }
 0x60c   : > { %9477 = vmatpush2.bf16.msra.mxu0 %v12967_v37  ;;  %9437 = vmatprep.subr.bf16.mxu1 %v12972_v5  ;;  %v13026_v37 = vld [vmem:[#allocation16 + $0x6f4] ss:$24 sps:$4 sm:$0xff]  }
 0x60d   : > { %9478 = vmatprep.subr.bf16.mxu0 %v12975_v30  ;;  %v13029_v5 = vld [vmem:[#allocation16 + $0xfc] ss:$24 sps:$4 sm:$0xff]   ;;  %v13024_v30 = vld [vmem:[#allocation16 + $0x6f0] ss:$24 sps:$4 sm:$0xff]  }
 0x60f   : > { %9438 = vmatpush2.bf16.msra.mxu1 %v12970_v35  ;;  %v13027_v35 = vld [vmem:[#allocation16 + $0xf8] ss:$24 sps:$4 sm:$0xff]  }
 0x610   : > { %9479 = vmatpush2.bf16.msra.mxu0 %v12973_v8  ;;  %9439 = vmatprep.subr.bf16.mxu1 %v12978_v48  ;;  %v13032_v8 = vld [vmem:[#allocation16 + $0x6c4] ss:$24 sps:$4 sm:$0xff]  }
 0x611   : > { %9480 = vmatprep.subr.bf16.mxu0 %v12981_v44  ;;  %v13035_v48 = vld [vmem:[#allocation16 + $0xcc] ss:$24 sps:$4 sm:$0xff]   ;;  %v13030_v44 = vld [vmem:[#allocation16 + $0x6c0] ss:$24 sps:$4 sm:$0xff]  }
 0x613   : > { %9440 = vmatpush2.bf16.msra.mxu1 %v12976_v14  ;;  %v13033_v14 = vld [vmem:[#allocation16 + $0xc8] ss:$24 sps:$4 sm:$0xff]  }
 0x614   : > { %9481 = vmatpush2.bf16.msra.mxu0 %v12979_v49  ;;  %9441 = vmatprep.subr.bf16.mxu1 %v12984_v42  ;;  %v13038_v49 = vld [vmem:[#allocation16 + $0x694] ss:$24 sps:$4 sm:$0xff]  }
 0x615   : > { %9482 = vmatprep.subr.bf16.mxu0 %v12987_v52  ;;  %v13041_v42 = vld [vmem:[#allocation16 + $0x9c] ss:$24 sps:$4 sm:$0xff]   ;;  %v13036_v52 = vld [vmem:[#allocation16 + $0x690] ss:$24 sps:$4 sm:$0xff]  }
 0x617   : > { %9442 = vmatpush2.bf16.msra.mxu1 %v12982_v32  ;;  %v13039_v32 = vld [vmem:[#allocation16 + $0x98] ss:$24 sps:$4 sm:$0xff]  }
 0x62b   : > { %v7447_v22 = vpop.f32.mrf.mxu0 }
 0x62c   : > { %v7448_v40 = vadd.f32 %v7447_v22, %v7407_v36  ;;  %v7625_v36 = vsel %vm7624_vm2, %v7618_v15, 0.0  ;;  %v12999_v15 = vld [vmem:[#allocation16 + $0x4e4] ss:$24 sps:$4 sm:$0xff]  }
 0x62d   : > { %v7449_v43 = vpop.f32.mrf.mxu0  ;;  %v14592_v26 = vpop.f32.mrf.mxu1 }
 0x62e   : > { %v14594_v6 = vadd.f32 %v7488_v53, %v7448_v40  ;;  %v7450_v50 = vadd.f32 %v7449_v43, %v7409_v56 }
 0x62f   : > { %v7451_v3 = vpop.f32.mrf.mxu0  ;;  %v14596_v55 = vpop.f32.mrf.mxu1 }
 0x630   : > { %v14598_v58 = vadd.f32 %v7490_v28, %v7450_v50  ;;  %v7619_v28 = vmul.f32 %v14584_v38, %v14584_v38  ;;  %v7620_v57 = vmul.f32 %v14594_v6, %v14594_v6 }
 0x631   : > { %v7452_v34 = vpop.f32.mrf.mxu0  ;;  %v7574_v63 = vpop.f32.mrf.mxu1 }
 0x632   : > { %v7626_v31 = vsel %vm7624_vm2, %v7619_v28, 0.0  ;;  %v7628_v22 = vsel %vm7624_vm2, %v7620_v57, 0.0  ;;  %v7621_v56 = vmul.f32 %v14598_v58, %v14598_v58  ;;  %v12993_v28 = vld [vmem:[#allocation16 + $0x514] ss:$24 sps:$4 sm:$0xff]   ;;  %v12994_v57 = vld [vmem:[#allocation16 + $0x1e0] ss:$24 sps:$4 sm:$0xff]  }
 0x633   : > { %v7575_v0 = vpop.f32.mrf.mxu1  ;;  %v7627_v43 = vadd.f32 %v7626_v31, %v7625_v36  ;;  %v13002_v31 = vld [vmem:[#allocation16 + $0x1b4] ss:$24 sps:$4 sm:$0xff]   ;;  %v13000_v36 = vld [vmem:[#allocation16 + $0x1b0] ss:$24 sps:$4 sm:$0xff]  }
 0x634   : > { %v7630_v0 = vsel %vm7624_vm2, %v7621_v56, 0.0  ;;  %v13008_v56 = vld [vmem:[#allocation16 + $0x184] ss:$24 sps:$4 sm:$0xff]  }
 0x635   : > { %v7629_v34 = vadd.f32 %v7628_v22, %v7627_v43  ;;  %v13003_v22 = vld [vmem:[#allocation16 + $0x4b0] ss:$24 sps:$4 sm:$0xff]   ;;  %v13006_v43 = vld [vmem:[#allocation16 + $0x180] ss:$24 sps:$4 sm:$0xff]  }
 0x637   : > { %v7631_v61 = vadd.f32 %v7630_v0, %v7629_v34  ;;  %v13017_v34 = vld [vmem:[#allocation16 + $0x15c] ss:$24 sps:$4 sm:$0xff]  }
 0x66b   : > { %v7529_v29 = vpop.f32.mrf.mxu0 }
 0x66c   : > { %v7530_v54 = vadd.f32 %v7529_v29, %v7238_v20  ;;  %v12985_v29 = vld [vmem:[#allocation16 + $0x540] ss:$24 sps:$4 sm:$0xff]   ;;  %v12996_v20 = vld [vmem:[#allocation16 + $0x1e4] ss:$24 sps:$4 sm:$0xff]  }
 0x66d   : > { %v7531_v7 = vpop.f32.mrf.mxu0  ;;  %9483 = vmatpush2.bf16.msra.mxu0 %v12985_v29  ;;  %v13044_v29 = vld [vmem:[#allocation16 + $0x664] ss:$24 sps:$4 sm:$0xff]  }
 0x66e   : > { %v7532_v40 = vadd.f32 %v7531_v7, %v7242_v27  ;;  %v7571_v50 = vadd.f32 %v14592_v26, %v7530_v54  ;;  %v12988_v7 = vld [vmem:[#allocation16 + $0x210] ss:$24 sps:$4 sm:$0xff]   ;;  %9484 = vmatprep.subr.bf16.mxu0 %v12993_v28  ;;  %v12997_v27 = vld [vmem:[#allocation16 + $0x4e0] ss:$24 sps:$4 sm:$0xff]   ;;  %v13005_v54 = vld [vmem:[#allocation16 + $0x4b4] ss:$24 sps:$4 sm:$0xff]  }
 0x66f   : > { %v7533_v53 = vpop.f32.mrf.mxu0  ;;  %v13050_v28 = vld [vmem:[#allocation16 + $0x634] ss:$24 sps:$4 sm:$0xff]  }
 0x670   : > { %v7573_v1 = vadd.f32 %v14596_v55, %v7532_v40  ;;  %v12990_v53 = vld [vmem:[#allocation16 + $0x214] ss:$24 sps:$4 sm:$0xff]   ;;  %v13011_v40 = vld [vmem:[#allocation16 + $0x484] ss:$24 sps:$4 sm:$0xff]  }
 0x671   : > { %v7534_v23 = vpop.f32.mrf.mxu0  ;;  %9443 = vmatprep.subr.bf16.mxu1 %v12990_v53  ;;  %v13042_v53 = vld [vmem:[#allocation16 + $0x660] ss:$24 sps:$4 sm:$0xff]  }
 0x672   : > { %v12991_v23 = vld [vmem:[#allocation16 + $0x510] ss:$24 sps:$4 sm:$0xff]   ;;  %9444 = vmatpush2.bf16.msra.mxu1 %v12988_v7  ;;  %v13047_v7 = vld [vmem:[#allocation16 + $0x6c] ss:$24 sps:$4 sm:$0xff]  }
 0x673   : > { %9485 = vmatpush2.bf16.msra.mxu0 %v12991_v23  ;;  %9445 = vmatprep.subr.bf16.mxu1 %v12996_v20  ;;  %v13045_v23 = vld [vmem:[#allocation16 + $0x68] ss:$24 sps:$4 sm:$0xff]   ;;  %v13053_v20 = vld [vmem:[#allocation16 + $0x3c] ss:$24 sps:$4 sm:$0xff]  }
 0x674   : > { %9486 = vmatprep.subr.bf16.mxu0 %v12999_v15  ;;  %v13048_v15 = vld [vmem:[#allocation16 + $0x630] ss:$24 sps:$4 sm:$0xff]  }
 0x676   : > { %9446 = vmatpush2.bf16.msra.mxu1 %v12994_v57  ;;  %v13051_v57 = vld [vmem:[#allocation16 + $0x38] ss:$24 sps:$4 sm:$0xff]  }
 0x677   : > { %9487 = vmatpush2.bf16.msra.mxu0 %v12997_v27  ;;  %9447 = vmatprep.subr.bf16.mxu1 %v13002_v31  ;;  %v13056_v27 = vld [vmem:[#allocation16 + $0x604] ss:$24 sps:$4 sm:$0xff]  }
 0x678   : > { %9488 = vmatprep.subr.bf16.mxu0 %v13005_v54  ;;  %v13059_v31 = vld [vmem:[#allocation16 + $0xc] ss:$24 sps:$4 sm:$0xff]   ;;  %v13054_v54 = vld [vmem:[#allocation16 + $0x600] ss:$24 sps:$4 sm:$0xff]  }
 0x67a   : > { %9448 = vmatpush2.bf16.msra.mxu1 %v13000_v36  ;;  %v13057_v36 = vld [vmem:[#allocation16 + $0x8] ss:$24 sps:$4 sm:$0xff]  }
 0x67b   : > { %9489 = vmatpush2.bf16.msra.mxu0 %v13003_v22  ;;  %9449 = vmatprep.subr.bf16.mxu1 %v13008_v56  ;;  %v13062_v22 = vld [vmem:[#allocation16 + $0x8d4] ss:$24 sps:$4 sm:$0xff]  }
 0x67c   : > { %9490 = vmatprep.subr.bf16.mxu0 %v13011_v40  ;;  %v13065_v56 = vld [vmem:[#allocation16 + $0x2dc] ss:$24 sps:$4 sm:$0xff]   ;;  %v13060_v40 = vld [vmem:[#allocation16 + $0x8d0] ss:$24 sps:$4 sm:$0xff]  }
 0x67e   : > { %9450 = vmatpush2.bf16.msra.mxu1 %v13006_v43  ;;  %v13063_v43 = vld [vmem:[#allocation16 + $0x2d8] ss:$24 sps:$4 sm:$0xff]  }
 0x6ab   : > { %v7611_v3 = vpop.f32.mrf.mxu0 }
 0x6ac   : > { %v14616_v63 = vadd.f32 %v7611_v3, %v7571_v50  ;;  %v13009_v50 = vld [vmem:[#allocation16 + $0x480] ss:$24 sps:$4 sm:$0xff]   ;;  %v13014_v3 = vld [vmem:[#allocation16 + $0x754] ss:$24 sps:$4 sm:$0xff]  }
 0x6ad   : > { %v7613_v2 = vpop.f32.mrf.mxu0  ;;  %9491 = vmatpush2.bf16.msra.mxu0 %v13009_v50  ;;  %9501 = vmatprep.subr.bf16.mxu1 %v13014_v3  ;;  %v13068_v50 = vld [vmem:[#allocation16 + $0x8a4] ss:$24 sps:$4 sm:$0xff]  }
 0x6ae   : > { %v7622_v59 = vmul.f32 %v14616_v63, %v14616_v63  ;;  %v14622_v46 = vadd.f32 %v7613_v2, %v7573_v1  ;;  %9542 = vmatprep.subr.bf16.mxu0 %v13017_v34  ;;  %v13071_v3 = vld [vmem:[#allocation16 + $0x2ac] ss:$24 sps:$4 sm:$0xff]   ;;  %v13066_v34 = vld [vmem:[#allocation16 + $0x8a0] ss:$24 sps:$4 sm:$0xff]  }
 0x6af   : > { %v7615_v4 = vpop.f32.mrf.mxu0 }
 0x6b0   : > { %v7623_v12 = vmul.f32 %v14622_v46, %v14622_v46  ;;  %v7632_v26 = vsel %vm7624_vm2, %v7622_v59, 0.0 }
 0x6b1   : > { %v7616_v10 = vpop.f32.mrf.mxu0  ;;  %v7633_v45 = vadd.f32 %v7632_v26, %v7631_v61 }
 0x6b2   : > { %v7634_v16 = vsel %vm7624_vm2, %v7623_v12, 0.0 }
 0x6b3   : > { %v7635_v55 = vadd.f32 %v7634_v16, %v7633_v45 }
 0x6b5   : > { %7636 = vadd.xlane.f32.xlu0 %v7635_v55 }
 0x73e   : > { %v7637_v1 = vpop.xlane.xlu0 %7636 }
 0x73f   : > { %13376 = vrsqrt.f32 %v7637_v1  ;;  %vm7640_vm3 = vcmp.eq.f32.partialorder %v7637_v1, inf  ;;  %v7643_v59 = vand.u32 2147483648, %v7637_v1  ;;  %vm7642_vm4 = vcmp.eq.f32.partialorder %v7637_v1, 0.0 }
 0x74c   : > { %v13377_v0 = vpop.eup %13376 }
 0x74d   : > { %v7639_v2 = vmul.f32 %v13377_v0, %v7637_v1  ;;  %v13074_v0 = vld [vmem:[#allocation16 + $0x874] ss:$24 sps:$4 sm:$0xff]  }
 0x74f   : > { %v7641_v4 = vsel %vm7640_vm3, %v7637_v1, %v7639_v2  ;;  %v13069_v1 = vld [vmem:[#allocation16 + $0x2a8] ss:$24 sps:$4 sm:$0xff]   ;;  %v13077_v2 = vld [vmem:[#allocation16 + $0x27c] ss:$24 sps:$4 sm:$0xff]  }
 0x750   : > { %v7644_v61 = vsel %vm7642_vm4, %v7643_v59, %v7641_v4  ;;  %v13072_v59 = vld [vmem:[#allocation16 + $0x870] ss:$24 sps:$4 sm:$0xff]  }
 0x751   : > { %v7645_v12 = vadd.f32 1e-08, %v7644_v61  ;;  %v13075_v4 = vld [vmem:[#allocation16 + $0x278] ss:$24 sps:$4 sm:$0xff]   ;;  %v13080_v61 = vld [vmem:[#allocation16 + $0x844] ss:$24 sps:$4 sm:$0xff]  }
 0x753   : > { %13378 = vrcp.f32 %v7645_v12  ;;  %v13083_v12 = vld [vmem:[#allocation16 + $0x24c] ss:$24 sps:$4 sm:$0xff]  }
 0x760   : > { %v14628_v26 = vpop.eup %13378 }
 0x761   : > { %v7648_v10 = vmul.f32 %v14628_v26, %v14584_v38  ;;  %v7650_v45 = vmul.f32 %v14628_v26, %v14598_v58  ;;  %v7647_v16 = vmul.f32 %v14628_v26, %v14581_v41  ;;  %v7649_v55 = vmul.f32 %v14628_v26, %v14594_v6  ;;  %v13020_v41 = vld [vmem:[#allocation16 + $0x724] ss:$24 sps:$4 sm:$0xff]  }
 0x762   : > { %v7652_v17 = vmul.f32 %v14628_v26, %v14622_v46  ;;  %v13023_v58 = vld [vmem:[#allocation16 + $0x12c] ss:$24 sps:$4 sm:$0xff]   ;;  %v13018_v46 = vld [vmem:[#allocation16 + $0x720] ss:$24 sps:$4 sm:$0xff]  }
 0x763   : > { %v14640_v11 = vpack.c.bf16 %v7648_v10, %v7648_v10  ;;  %v14642_v18 = vpack.c.bf16 %v7650_v45, %v7650_v45  ;;  %v14644_v21 = vpack.c.bf16 %v7647_v16, %v7647_v16  ;;  %v14646_v38 = vpack.c.bf16 %v7649_v55, %v7649_v55  ;;  %v13078_v10 = vld [vmem:[#allocation16 + $0x840] ss:$24 sps:$4 sm:$0xff]   ;;  %v13086_v16 = vld [vmem:[#allocation16 + $0x814] ss:$24 sps:$4 sm:$0xff]  }
 0x764   : > { %v14652_v6 = vpack.c.bf16 %v7652_v17, %v7652_v17  ;;  %v13081_v45 = vld [vmem:[#allocation16 + $0x248] ss:$24 sps:$4 sm:$0xff]   ;;  %v13089_v55 = vld [vmem:[#allocation16 + $0x21c] ss:$24 sps:$4 sm:$0xff]  }
 0x765   : > { %9451 = vmatprep.mubr.bf16.mxu1 %v14640_v11  ;;  %9492 = vmatprep.mubr.bf16.mxu0 %v14642_v18  ;;  %v13084_v17 = vld [vmem:[#allocation16 + $0x810] ss:$24 sps:$4 sm:$0xff]  }
 0x766   : > { %9452 = vmatmul.mubr.bf16.vlgmr.msra.gmra.mxu1 %v14644_v21  ;;  %9493 = vmatmul.mubr.bf16.vlgmr.msra.gmra.mxu0 %v14646_v38 }
 0x767   : > { %9502 = vmatpush1.bf16.msra.mxu1 %v13012_v9  ;;  %9543 = vmatpush1.bf16.msra.mxu0 %v13015_v19  ;;  %v13087_v9 = vld [vmem:[#allocation16 + $0x218] ss:$24 sps:$4 sm:$0xff]   ;;  %v13092_v19 = vld [vmem:[#allocation16 + $0x7e4] ss:$24 sps:$4 sm:$0xff]  }
 0x768   : > { %9533 = vmatprep.mubr.bf16.mxu1 %v14652_v6  ;;  %9574 = vmatprep.mubr.bf16.mxu0 %v14640_v11 }
 0x769   : > { %9503 = vmatprep.subr.bf16.mxu1 %v13020_v41  ;;  %9544 = vmatprep.subr.bf16.mxu0 %v13023_v58  ;;  %v13095_v41 = vld [vmem:[#allocation16 + $0x1ec] ss:$24 sps:$4 sm:$0xff]   ;;  %v13090_v58 = vld [vmem:[#allocation16 + $0x7e0] ss:$24 sps:$4 sm:$0xff]  }
 0x76b   : > { %9504 = vmatpush1.bf16.msra.mxu1 %v13018_v46  ;;  %9545 = vmatpush1.bf16.msra.mxu0 %v13021_v24  ;;  %v13093_v46 = vld [vmem:[#allocation16 + $0x1e8] ss:$24 sps:$4 sm:$0xff]   ;;  %v13098_v24 = vld [vmem:[#allocation16 + $0x7b4] ss:$24 sps:$4 sm:$0xff]  }
 0x76c   : > { %9505 = vmatprep.subr.bf16.mxu1 %v13026_v37  ;;  %9546 = vmatprep.subr.bf16.mxu0 %v13029_v5  ;;  %v13101_v37 = vld [vmem:[#allocation16 + $0x1bc] ss:$24 sps:$4 sm:$0xff]   ;;  %v13096_v5 = vld [vmem:[#allocation16 + $0x7b0] ss:$24 sps:$4 sm:$0xff]  }
 0x76f   : > { %9506 = vmatpush1.bf16.msra.mxu1 %v13024_v30  ;;  %9547 = vmatpush1.bf16.msra.mxu0 %v13027_v35  ;;  %v13099_v30 = vld [vmem:[#allocation16 + $0x1b8] ss:$24 sps:$4 sm:$0xff]   ;;  %v13104_v35 = vld [vmem:[#allocation16 + $0x784] ss:$24 sps:$4 sm:$0xff]  }
 0x770   : > { %9507 = vmatprep.subr.bf16.mxu1 %v13032_v8  ;;  %9548 = vmatprep.subr.bf16.mxu0 %v13035_v48  ;;  %v13107_v8 = vld [vmem:[#allocation16 + $0x18c] ss:$24 sps:$4 sm:$0xff]   ;;  %v13102_v48 = vld [vmem:[#allocation16 + $0x780] ss:$24 sps:$4 sm:$0xff]  }
 0x773   : > { %9508 = vmatpush1.bf16.msra.mxu1 %v13030_v44  ;;  %9549 = vmatpush1.bf16.msra.mxu0 %v13033_v14  ;;  %v13105_v44 = vld [vmem:[#allocation16 + $0x188] ss:$24 sps:$4 sm:$0xff]   ;;  %v7651_v14 = vmul.f32 %v14628_v26, %v14616_v63 }
 0x774   : > { %9509 = vmatprep.subr.bf16.mxu1 %v13038_v49  ;;  %9550 = vmatprep.subr.bf16.mxu0 %v13041_v42  ;;  %v13110_v49 = vld [vmem:[#allocation16 + $0x45c] ss:$24 sps:$4 sm:$0xff]   ;;  %v13114_v63 = vld [vmem:[#allocation16 + $0x428] ss:$24 sps:$4 sm:$0xff]  }
 0x775   : > { %v13113_v42 = vld [vmem:[#allocation16 + $0x75c] ss:$24 sps:$4 sm:$0xff]   ;;  %v13117_v26 = vld [vmem:[#allocation16 + $0x728] ss:$24 sps:$4 sm:$0xff]  }
 0x777   : > { %9510 = vmatpush1.bf16.msra.mxu1 %v13036_v52  ;;  %9551 = vmatpush1.bf16.msra.mxu0 %v13039_v32  ;;  %v13108_v52 = vld [vmem:[#allocation16 + $0x458] ss:$24 sps:$4 sm:$0xff]   ;;  %v14658_v32 = vpack.c.bf16 %v7651_v14, %v7651_v14  ;;  %v13185_v14 = vld [vmem:[#allocation16 + $0x81c] ss:$24 sps:$4 sm:$0xff]  }
 0x778   : > { %9511 = vmatprep.subr.bf16.mxu1 %v13044_v29  ;;  %9552 = vmatprep.subr.bf16.mxu0 %v13047_v7  ;;  %v13111_v29 = vld [vmem:[#allocation16 + $0x758] ss:$24 sps:$4 sm:$0xff]   ;;  %v13116_v7 = vld [vmem:[#allocation16 + $0x42c] ss:$24 sps:$4 sm:$0xff]  }
 0x77b   : > { %9512 = vmatpush1.bf16.msra.mxu1 %v13042_v53  ;;  %9553 = vmatpush1.bf16.msra.mxu0 %v13045_v23  ;;  %v13119_v53 = vld [vmem:[#allocation16 + $0x72c] ss:$24 sps:$4 sm:$0xff]   ;;  %v13122_v23 = vld [vmem:[#allocation16 + $0x3fc] ss:$24 sps:$4 sm:$0xff]  }
 0x77c   : > { %9513 = vmatprep.subr.bf16.mxu1 %v13050_v28  ;;  %9554 = vmatprep.subr.bf16.mxu0 %v13053_v20  ;;  %v13125_v28 = vld [vmem:[#allocation16 + $0x6fc] ss:$24 sps:$4 sm:$0xff]   ;;  %v13120_v20 = vld [vmem:[#allocation16 + $0x3f8] ss:$24 sps:$4 sm:$0xff]  }
 0x77f   : > { %9514 = vmatpush1.bf16.msra.mxu1 %v13048_v15  ;;  %9555 = vmatpush1.bf16.msra.mxu0 %v13051_v57  ;;  %v13123_v15 = vld [vmem:[#allocation16 + $0x6f8] ss:$24 sps:$4 sm:$0xff]   ;;  %v13128_v57 = vld [vmem:[#allocation16 + $0x3cc] ss:$24 sps:$4 sm:$0xff]  }
 0x780   : > { %9515 = vmatprep.subr.bf16.mxu1 %v13056_v27  ;;  %9556 = vmatprep.subr.bf16.mxu0 %v13059_v31  ;;  %v13131_v27 = vld [vmem:[#allocation16 + $0x6cc] ss:$24 sps:$4 sm:$0xff]   ;;  %v13126_v31 = vld [vmem:[#allocation16 + $0x3c8] ss:$24 sps:$4 sm:$0xff]  }
 0x783   : > { %9516 = vmatpush1.bf16.msra.mxu1 %v13054_v54  ;;  %9557 = vmatpush1.bf16.msra.mxu0 %v13057_v36  ;;  %v13129_v54 = vld [vmem:[#allocation16 + $0x6c8] ss:$24 sps:$4 sm:$0xff]   ;;  %v13134_v36 = vld [vmem:[#allocation16 + $0x39c] ss:$24 sps:$4 sm:$0xff]  }
 0x784   : > { %9517 = vmatprep.subr.bf16.mxu1 %v13062_v22  ;;  %9558 = vmatprep.subr.bf16.mxu0 %v13065_v56  ;;  %v13137_v22 = vld [vmem:[#allocation16 + $0x69c] ss:$24 sps:$4 sm:$0xff]   ;;  %v13132_v56 = vld [vmem:[#allocation16 + $0x398] ss:$24 sps:$4 sm:$0xff]  }
 0x787   : > { %9518 = vmatpush2.bf16.msra.mxu1 %v13060_v40  ;;  %9559 = vmatpush2.bf16.msra.mxu0 %v13063_v43  ;;  %v13135_v40 = vld [vmem:[#allocation16 + $0x698] ss:$24 sps:$4 sm:$0xff]   ;;  %v13140_v43 = vld [vmem:[#allocation16 + $0x36c] ss:$24 sps:$4 sm:$0xff]  }
 0x788   : > { %9519 = vmatprep.subr.bf16.mxu1 %v13068_v50  ;;  %9560 = vmatprep.subr.bf16.mxu0 %v13071_v3  ;;  %v13143_v50 = vld [vmem:[#allocation16 + $0x66c] ss:$24 sps:$4 sm:$0xff]   ;;  %v13138_v3 = vld [vmem:[#allocation16 + $0x368] ss:$24 sps:$4 sm:$0xff]  }
 0x78b   : > { %9520 = vmatpush2.bf16.msra.mxu1 %v13066_v34  ;;  %9561 = vmatpush2.bf16.msra.mxu0 %v13069_v1  ;;  %v13141_v34 = vld [vmem:[#allocation16 + $0x668] ss:$24 sps:$4 sm:$0xff]   ;;  %v13146_v1 = vld [vmem:[#allocation16 + $0x33c] ss:$24 sps:$4 sm:$0xff]  }
 0x78c   : > { %9521 = vmatprep.subr.bf16.mxu1 %v13074_v0  ;;  %9562 = vmatprep.subr.bf16.mxu0 %v13077_v2  ;;  %v13149_v0 = vld [vmem:[#allocation16 + $0x63c] ss:$24 sps:$4 sm:$0xff]   ;;  %v13144_v2 = vld [vmem:[#allocation16 + $0x338] ss:$24 sps:$4 sm:$0xff]  }
 0x78f   : > { %9522 = vmatpush2.bf16.msra.mxu1 %v13072_v59  ;;  %9563 = vmatpush2.bf16.msra.mxu0 %v13075_v4  ;;  %v13147_v59 = vld [vmem:[#allocation16 + $0x638] ss:$24 sps:$4 sm:$0xff]   ;;  %v13152_v4 = vld [vmem:[#allocation16 + $0x30c] ss:$24 sps:$4 sm:$0xff]  }
 0x790   : > { %9523 = vmatprep.subr.bf16.mxu1 %v13080_v61  ;;  %9564 = vmatprep.subr.bf16.mxu0 %v13083_v12  ;;  %v13155_v61 = vld [vmem:[#allocation16 + $0x60c] ss:$24 sps:$4 sm:$0xff]   ;;  %v13150_v12 = vld [vmem:[#allocation16 + $0x308] ss:$24 sps:$4 sm:$0xff]  }
 0x793   : > { %9524 = vmatpush2.bf16.msra.mxu1 %v13078_v10  ;;  %9565 = vmatpush2.bf16.msra.mxu0 %v13081_v45  ;;  %v13153_v10 = vld [vmem:[#allocation16 + $0x608] ss:$24 sps:$4 sm:$0xff]   ;;  %v13158_v45 = vld [vmem:[#allocation16 + $0x5dc] ss:$24 sps:$4 sm:$0xff]  }
 0x794   : > { %9525 = vmatprep.subr.bf16.mxu1 %v13086_v16  ;;  %9566 = vmatprep.subr.bf16.mxu0 %v13089_v55  ;;  %v13161_v16 = vld [vmem:[#allocation16 + $0x8dc] ss:$24 sps:$4 sm:$0xff]   ;;  %v13156_v55 = vld [vmem:[#allocation16 + $0x5d8] ss:$24 sps:$4 sm:$0xff]  }
 0x797   : > { %9526 = vmatpush2.bf16.msra.mxu1 %v13084_v17  ;;  %9567 = vmatpush2.bf16.msra.mxu0 %v13087_v9  ;;  %v13159_v17 = vld [vmem:[#allocation16 + $0x8d8] ss:$24 sps:$4 sm:$0xff]   ;;  %v13164_v9 = vld [vmem:[#allocation16 + $0x5ac] ss:$24 sps:$4 sm:$0xff]  }
 0x798   : > { %9527 = vmatprep.subr.bf16.mxu1 %v13092_v19  ;;  %9568 = vmatprep.subr.bf16.mxu0 %v13095_v41  ;;  %v13167_v19 = vld [vmem:[#allocation16 + $0x8ac] ss:$24 sps:$4 sm:$0xff]   ;;  %v13162_v41 = vld [vmem:[#allocation16 + $0x5a8] ss:$24 sps:$4 sm:$0xff]  }
 0x79b   : > { %9528 = vmatpush2.bf16.msra.mxu1 %v13090_v58  ;;  %9569 = vmatpush2.bf16.msra.mxu0 %v13093_v46  ;;  %v13165_v58 = vld [vmem:[#allocation16 + $0x8a8] ss:$24 sps:$4 sm:$0xff]   ;;  %v13170_v46 = vld [vmem:[#allocation16 + $0x57c] ss:$24 sps:$4 sm:$0xff]  }
 0x79c   : > { %9529 = vmatprep.subr.bf16.mxu1 %v13098_v24  ;;  %9570 = vmatprep.subr.bf16.mxu0 %v13101_v37  ;;  %v13173_v24 = vld [vmem:[#allocation16 + $0x87c] ss:$24 sps:$4 sm:$0xff]   ;;  %v13168_v37 = vld [vmem:[#allocation16 + $0x578] ss:$24 sps:$4 sm:$0xff]  }
 0x79f   : > { %9530 = vmatpush2.bf16.msra.mxu1 %v13096_v5  ;;  %9571 = vmatpush2.bf16.msra.mxu0 %v13099_v30  ;;  %v13171_v5 = vld [vmem:[#allocation16 + $0x878] ss:$24 sps:$4 sm:$0xff]   ;;  %v13176_v30 = vld [vmem:[#allocation16 + $0x54c] ss:$24 sps:$4 sm:$0xff]  }
 0x7a0   : > { %9531 = vmatprep.subr.bf16.mxu1 %v13104_v35  ;;  %9572 = vmatprep.subr.bf16.mxu0 %v13107_v8  ;;  %v13179_v35 = vld [vmem:[#allocation16 + $0x84c] ss:$24 sps:$4 sm:$0xff]   ;;  %v13174_v8 = vld [vmem:[#allocation16 + $0x548] ss:$24 sps:$4 sm:$0xff]  }
 0x7a3   : > { %9532 = vmatpush2.bf16.msra.mxu1 %v13102_v48  ;;  %9573 = vmatpush2.bf16.msra.mxu0 %v13105_v44  ;;  %v13177_v48 = vld [vmem:[#allocation16 + $0x848] ss:$24 sps:$4 sm:$0xff]   ;;  %v13182_v44 = vld [vmem:[#allocation16 + $0x51c] ss:$24 sps:$4 sm:$0xff]  }
 0x7a4   : > { %9583 = vmatprep.subr.bf16.mxu1 %v13110_v49  ;;  %9624 = vmatprep.subr.bf16.mxu0 %v13113_v42  ;;  %v13180_v49 = vld [vmem:[#allocation16 + $0x518] ss:$24 sps:$4 sm:$0xff]  }
 0x7a5   : > { %v13183_v42 = vld [vmem:[#allocation16 + $0x818] ss:$24 sps:$4 sm:$0xff]  }
 0x7a6   : > { %9534 = vmatmul.mubr.bf16.vlgmr.msra.gmra.mxu1 %v14658_v32  ;;  %9575 = vmatmul.mubr.bf16.vlgmr.msra.gmra.mxu0 %v14644_v21 }
 0x7a7   : > { %9584 = vmatpush1.bf16.msra.mxu1 %v13108_v52  ;;  %9615 = vmatprep.mubr.bf16.mxu1 %v14642_v18  ;;  %v13188_v52 = vld [vmem:[#allocation16 + $0x4ec] ss:$24 sps:$4 sm:$0xff]  }
 0x7a8   : > { %9625 = vmatpush1.bf16.msra.mxu0 %v13111_v29  ;;  %9656 = vmatprep.mubr.bf16.mxu0 %v14652_v6  ;;  %v13191_v29 = vld [vmem:[#allocation16 + $0x7ec] ss:$24 sps:$4 sm:$0xff]  }
 0x7a9   : > { %9585 = vmatprep.subr.bf16.mxu1 %v13116_v7  ;;  %9626 = vmatprep.subr.bf16.mxu0 %v13119_v53  ;;  %v13186_v7 = vld [vmem:[#allocation16 + $0x4e8] ss:$24 sps:$4 sm:$0xff]  }
 0x7aa   : > { %v13189_v53 = vld [vmem:[#allocation16 + $0x7e8] ss:$24 sps:$4 sm:$0xff]  }
 0x7ab   : > { %9586 = vmatpush1.bf16.msra.mxu1 %v13114_v63  ;;  %v13194_v63 = vld [vmem:[#allocation16 + $0x4bc] ss:$24 sps:$4 sm:$0xff]  }
 0x7ac   : > { %9627 = vmatpush1.bf16.msra.mxu0 %v13117_v26  ;;  %9587 = vmatprep.subr.bf16.mxu1 %v13122_v23  ;;  %v13197_v26 = vld [vmem:[#allocation16 + $0x7bc] ss:$24 sps:$4 sm:$0xff]   ;;  %v13192_v23 = vld [vmem:[#allocation16 + $0x4b8] ss:$24 sps:$4 sm:$0xff]  }
 0x7ad   : > { %9628 = vmatprep.subr.bf16.mxu0 %v13125_v28  ;;  %v13195_v28 = vld [vmem:[#allocation16 + $0x7b8] ss:$24 sps:$4 sm:$0xff]  }
 0x7af   : > { %9588 = vmatpush1.bf16.msra.mxu1 %v13120_v20  ;;  %v13200_v20 = vld [vmem:[#allocation16 + $0x48c] ss:$24 sps:$4 sm:$0xff]  }
 0x7b0   : > { %9629 = vmatpush1.bf16.msra.mxu0 %v13123_v15  ;;  %9589 = vmatprep.subr.bf16.mxu1 %v13128_v57  ;;  %v13203_v15 = vld [vmem:[#allocation16 + $0x78c] ss:$24 sps:$4 sm:$0xff]   ;;  %v13198_v57 = vld [vmem:[#allocation16 + $0x488] ss:$24 sps:$4 sm:$0xff]  }
 0x7b1   : > { %9630 = vmatprep.subr.bf16.mxu0 %v13131_v27  ;;  %v13201_v27 = vld [vmem:[#allocation16 + $0x788] ss:$24 sps:$4 sm:$0xff]  }
 0x7b3   : > { %9590 = vmatpush1.bf16.msra.mxu1 %v13126_v31  ;;  %v13206_v31 = vld [vmem:[#allocation16 + $0x164] ss:$24 sps:$4 sm:$0xff]  }
 0x7b4   : > { %9631 = vmatpush1.bf16.msra.mxu0 %v13129_v54  ;;  %9591 = vmatprep.subr.bf16.mxu1 %v13134_v36  ;;  %v13209_v54 = vld [vmem:[#allocation16 + $0x464] ss:$24 sps:$4 sm:$0xff]   ;;  %v13204_v36 = vld [vmem:[#allocation16 + $0x160] ss:$24 sps:$4 sm:$0xff]  }
 0x7b5   : > { %9632 = vmatprep.subr.bf16.mxu0 %v13137_v22  ;;  %v13207_v22 = vld [vmem:[#allocation16 + $0x460] ss:$24 sps:$4 sm:$0xff]  }
 0x7b7   : > { %9592 = vmatpush1.bf16.msra.mxu1 %v13132_v56  ;;  %v13212_v56 = vld [vmem:[#allocation16 + $0x134] ss:$24 sps:$4 sm:$0xff]  }
 0x7b8   : > { %9633 = vmatpush1.bf16.msra.mxu0 %v13135_v40  ;;  %9593 = vmatprep.subr.bf16.mxu1 %v13140_v43  ;;  %v13215_v40 = vld [vmem:[#allocation16 + $0x434] ss:$24 sps:$4 sm:$0xff]   ;;  %v13210_v43 = vld [vmem:[#allocation16 + $0x130] ss:$24 sps:$4 sm:$0xff]  }
 0x7b9   : > { %9634 = vmatprep.subr.bf16.mxu0 %v13143_v50  ;;  %v13213_v50 = vld [vmem:[#allocation16 + $0x430] ss:$24 sps:$4 sm:$0xff]  }
 0x7bb   : > { %9594 = vmatpush1.bf16.msra.mxu1 %v13138_v3  ;;  %v13218_v3 = vld [vmem:[#allocation16 + $0x104] ss:$24 sps:$4 sm:$0xff]  }
 0x7bc   : > { %9635 = vmatpush1.bf16.msra.mxu0 %v13141_v34  ;;  %9595 = vmatprep.subr.bf16.mxu1 %v13146_v1  ;;  %v13221_v34 = vld [vmem:[#allocation16 + $0x404] ss:$24 sps:$4 sm:$0xff]   ;;  %v13216_v1 = vld [vmem:[#allocation16 + $0x100] ss:$24 sps:$4 sm:$0xff]  }
 0x7bd   : > { %9636 = vmatprep.subr.bf16.mxu0 %v13149_v0  ;;  %v13219_v0 = vld [vmem:[#allocation16 + $0x400] ss:$24 sps:$4 sm:$0xff]  }
 0x7bf   : > { %9596 = vmatpush1.bf16.msra.mxu1 %v13144_v2  ;;  %v13224_v2 = vld [vmem:[#allocation16 + $0xd4] ss:$24 sps:$4 sm:$0xff]  }
 0x7c0   : > { %9637 = vmatpush1.bf16.msra.mxu0 %v13147_v59  ;;  %9597 = vmatprep.subr.bf16.mxu1 %v13152_v4  ;;  %v13227_v59 = vld [vmem:[#allocation16 + $0x3d4] ss:$24 sps:$4 sm:$0xff]   ;;  %v13222_v4 = vld [vmem:[#allocation16 + $0xd0] ss:$24 sps:$4 sm:$0xff]  }
 0x7c1   : > { %9638 = vmatprep.subr.bf16.mxu0 %v13155_v61  ;;  %v13230_v61 = vld [vmem:[#allocation16 + $0xa4] ss:$24 sps:$4 sm:$0xff]  }
 0x7c3   : > { %9598 = vmatpush1.bf16.msra.mxu1 %v13150_v12  ;;  %v13233_v12 = vld [vmem:[#allocation16 + $0x3a4] ss:$24 sps:$4 sm:$0xff]  }
 0x7c4   : > { %9639 = vmatpush1.bf16.msra.mxu0 %v13153_v10  ;;  %9599 = vmatprep.subr.bf16.mxu1 %v13158_v45  ;;  %v13231_v10 = vld [vmem:[#allocation16 + $0x3a0] ss:$24 sps:$4 sm:$0xff]   ;;  %v13236_v45 = vld [vmem:[#allocation16 + $0x74] ss:$24 sps:$4 sm:$0xff]  }
 0x7c5   : > { %9640 = vmatprep.subr.bf16.mxu0 %v13161_v16  ;;  %v13239_v16 = vld [vmem:[#allocation16 + $0x374] ss:$24 sps:$4 sm:$0xff]  }
 0x7c7   : > { %9600 = vmatpush2.bf16.msra.mxu1 %v13156_v55  ;;  %v13234_v55 = vld [vmem:[#allocation16 + $0x70] ss:$24 sps:$4 sm:$0xff]  }
 0x7c8   : > { %9641 = vmatpush2.bf16.msra.mxu0 %v13159_v17  ;;  %9601 = vmatprep.subr.bf16.mxu1 %v13164_v9  ;;  %v13237_v17 = vld [vmem:[#allocation16 + $0x370] ss:$24 sps:$4 sm:$0xff]   ;;  %v13242_v9 = vld [vmem:[#allocation16 + $0x44] ss:$24 sps:$4 sm:$0xff]  }
 0x7c9   : > { %9642 = vmatprep.subr.bf16.mxu0 %v13167_v19  ;;  %v13245_v19 = vld [vmem:[#allocation16 + $0x344] ss:$24 sps:$4 sm:$0xff]  }
 0x7cb   : > { %9602 = vmatpush2.bf16.msra.mxu1 %v13162_v41  ;;  %v13240_v41 = vld [vmem:[#allocation16 + $0x40] ss:$24 sps:$4 sm:$0xff]  }
 0x7cc   : > { %9643 = vmatpush2.bf16.msra.mxu0 %v13165_v58  ;;  %9603 = vmatprep.subr.bf16.mxu1 %v13170_v46  ;;  %v13243_v58 = vld [vmem:[#allocation16 + $0x340] ss:$24 sps:$4 sm:$0xff]   ;;  %v13248_v46 = vld [vmem:[#allocation16 + $0x14] ss:$24 sps:$4 sm:$0xff]  }
 0x7cd   : > { %9644 = vmatprep.subr.bf16.mxu0 %v13173_v24  ;;  %v13251_v24 = vld [vmem:[#allocation16 + $0x314] ss:$24 sps:$4 sm:$0xff]  }
 0x7cf   : > { %9604 = vmatpush2.bf16.msra.mxu1 %v13168_v37  ;;  %v13246_v37 = vld [vmem:[#allocation16 + $0x10] ss:$24 sps:$4 sm:$0xff]  }
 0x7d0   : > { %9645 = vmatpush2.bf16.msra.mxu0 %v13171_v5  ;;  %9605 = vmatprep.subr.bf16.mxu1 %v13176_v30  ;;  %v13249_v5 = vld [vmem:[#allocation16 + $0x310] ss:$24 sps:$4 sm:$0xff]   ;;  %v13254_v30 = vld [vmem:[#allocation16 + $0x2e4] ss:$24 sps:$4 sm:$0xff]  }
 0x7d1   : > { %9646 = vmatprep.subr.bf16.mxu0 %v13179_v35  ;;  %v13257_v35 = vld [vmem:[#allocation16 + $0x5e4] ss:$24 sps:$4 sm:$0xff]  }
 0x7d3   : > { %9606 = vmatpush2.bf16.msra.mxu1 %v13174_v8  ;;  %v13252_v8 = vld [vmem:[#allocation16 + $0x2e0] ss:$24 sps:$4 sm:$0xff]  }
 0x7d4   : > { %9647 = vmatpush2.bf16.msra.mxu0 %v13177_v48  ;;  %9607 = vmatprep.subr.bf16.mxu1 %v13182_v44  ;;  %v13255_v48 = vld [vmem:[#allocation16 + $0x5e0] ss:$24 sps:$4 sm:$0xff]   ;;  %v13260_v44 = vld [vmem:[#allocation16 + $0x2b4] ss:$24 sps:$4 sm:$0xff]  }
 0x7d5   : > { %9648 = vmatprep.subr.bf16.mxu0 %v13185_v14  ;;  %v13263_v14 = vld [vmem:[#allocation16 + $0x5b4] ss:$24 sps:$4 sm:$0xff]  }
 0x7d7   : > { %9608 = vmatpush2.bf16.msra.mxu1 %v13180_v49  ;;  %v13258_v49 = vld [vmem:[#allocation16 + $0x2b0] ss:$24 sps:$4 sm:$0xff]  }
 0x7d8   : > { %9649 = vmatpush2.bf16.msra.mxu0 %v13183_v42  ;;  %9609 = vmatprep.subr.bf16.mxu1 %v13188_v52  ;;  %v13261_v42 = vld [vmem:[#allocation16 + $0x5b0] ss:$24 sps:$4 sm:$0xff]   ;;  %v13266_v52 = vld [vmem:[#allocation16 + $0x284] ss:$24 sps:$4 sm:$0xff]  }
 0x7d9   : > { %9650 = vmatprep.subr.bf16.mxu0 %v13191_v29  ;;  %v13269_v29 = vld [vmem:[#allocation16 + $0x584] ss:$24 sps:$4 sm:$0xff]  }
 0x7db   : > { %9610 = vmatpush2.bf16.msra.mxu1 %v13186_v7  ;;  %v13264_v7 = vld [vmem:[#allocation16 + $0x280] ss:$24 sps:$4 sm:$0xff]  }
 0x7dc   : > { %9651 = vmatpush2.bf16.msra.mxu0 %v13189_v53  ;;  %9611 = vmatprep.subr.bf16.mxu1 %v13194_v63  ;;  %v13267_v53 = vld [vmem:[#allocation16 + $0x580] ss:$24 sps:$4 sm:$0xff]   ;;  %v13272_v63 = vld [vmem:[#allocation16 + $0x254] ss:$24 sps:$4 sm:$0xff]  }
 0x7dd   : > { %9652 = vmatprep.subr.bf16.mxu0 %v13197_v26  ;;  %v13275_v26 = vld [vmem:[#allocation16 + $0x554] ss:$24 sps:$4 sm:$0xff]  }
 0x7df   : > { %9612 = vmatpush2.bf16.msra.mxu1 %v13192_v23  ;;  %v13270_v23 = vld [vmem:[#allocation16 + $0x250] ss:$24 sps:$4 sm:$0xff]  }
 0x7e0   : > { %9653 = vmatpush2.bf16.msra.mxu0 %v13195_v28  ;;  %9613 = vmatprep.subr.bf16.mxu1 %v13200_v20  ;;  %v13273_v28 = vld [vmem:[#allocation16 + $0x550] ss:$24 sps:$4 sm:$0xff]   ;;  %v13278_v20 = vld [vmem:[#allocation16 + $0x224] ss:$24 sps:$4 sm:$0xff]  }
 0x7e1   : > { %9654 = vmatprep.subr.bf16.mxu0 %v13203_v15  ;;  %v13281_v15 = vld [vmem:[#allocation16 + $0x524] ss:$24 sps:$4 sm:$0xff]  }
 0x7e3   : > { %9614 = vmatpush2.bf16.msra.mxu1 %v13198_v57  ;;  %v13276_v57 = vld [vmem:[#allocation16 + $0x220] ss:$24 sps:$4 sm:$0xff]  }
 0x7e4   : > { %9655 = vmatpush2.bf16.msra.mxu0 %v13201_v27  ;;  %9665 = vmatprep.subr.bf16.mxu1 %v13206_v31  ;;  %v13279_v27 = vld [vmem:[#allocation16 + $0x520] ss:$24 sps:$4 sm:$0xff]   ;;  %v13284_v31 = vld [vmem:[#allocation16 + $0x1f4] ss:$24 sps:$4 sm:$0xff]  }
 0x7e5   : > { %9706 = vmatprep.subr.bf16.mxu0 %v13209_v54  ;;  %v13287_v54 = vld [vmem:[#allocation16 + $0x4f4] ss:$24 sps:$4 sm:$0xff]  }
 0x7e6   : > { %9616 = vmatmul.mubr.bf16.vlgmr.msra.gmra.mxu1 %v14646_v38 }
 0x7e7   : > { %9657 = vmatmul.mubr.bf16.vlgmr.msra.gmra.mxu0 %v14658_v32  ;;  %9666 = vmatpush1.bf16.msra.mxu1 %v13204_v36  ;;  %v13282_v36 = vld [vmem:[#allocation16 + $0x1f0] ss:$24 sps:$4 sm:$0xff]  }
 0x7e8   : > { %9697 = vmatprep.mubr.bf16.mxu1 %v14640_v11  ;;  %9707 = vmatpush1.bf16.msra.mxu0 %v13207_v22  ;;  %v13225_v11 = vld [vmem:[#allocation16 + $0x3d0] ss:$24 sps:$4 sm:$0xff]  }
 0x7e9   : > { %9738 = vmatprep.mubr.bf16.mxu0 %v14642_v18  ;;  %9667 = vmatprep.subr.bf16.mxu1 %v13212_v56  ;;  %v13228_v18 = vld [vmem:[#allocation16 + $0xa0] ss:$24 sps:$4 sm:$0xff]   ;;  %v13285_v22 = vld [vmem:[#allocation16 + $0x4f0] ss:$24 sps:$4 sm:$0xff]   ;;  %v13290_v56 = vld [vmem:[#allocation16 + $0x1c4] ss:$24 sps:$4 sm:$0xff]  }
 0x7ea   : > { %9708 = vmatprep.subr.bf16.mxu0 %v13215_v40  ;;  %v13293_v40 = vld [vmem:[#allocation16 + $0x4c4] ss:$24 sps:$4 sm:$0xff]  }
 0x7eb   : > { %9668 = vmatpush1.bf16.msra.mxu1 %v13210_v43  ;;  %v13288_v43 = vld [vmem:[#allocation16 + $0x1c0] ss:$24 sps:$4 sm:$0xff]  }
 0x7ec   : > { %9709 = vmatpush1.bf16.msra.mxu0 %v13213_v50  ;;  %9669 = vmatprep.subr.bf16.mxu1 %v13218_v3  ;;  %v13291_v50 = vld [vmem:[#allocation16 + $0x4c0] ss:$24 sps:$4 sm:$0xff]   ;;  %v13296_v3 = vld [vmem:[#allocation16 + $0x194] ss:$24 sps:$4 sm:$0xff]  }
 0x7ed   : > { %9710 = vmatprep.subr.bf16.mxu0 %v13221_v34  ;;  %v13299_v34 = vld [vmem:[#allocation16 + $0x494] ss:$24 sps:$4 sm:$0xff]  }
 0x7ef   : > { %9670 = vmatpush1.bf16.msra.mxu1 %v13216_v1  ;;  %v13294_v1 = vld [vmem:[#allocation16 + $0x190] ss:$24 sps:$4 sm:$0xff]  }
 0x7f0   : > { %9711 = vmatpush1.bf16.msra.mxu0 %v13219_v0  ;;  %9671 = vmatprep.subr.bf16.mxu1 %v13224_v2  ;;  %v13297_v0 = vld [vmem:[#allocation16 + $0x490] ss:$24 sps:$4 sm:$0xff]   ;;  %v13302_v2 = vld [vmem:[#allocation16 + $0x764] ss:$24 sps:$4 sm:$0xff]  }
 0x7f1   : > { %9712 = vmatprep.subr.bf16.mxu0 %v13227_v59  ;;  %v14668_v59 = vld [vmem:[#allocation17] sm:$0x3f] }
 0x7f3   : > { %9672 = vmatpush1.bf16.msra.mxu1 %v13222_v4  ;;  %v13300_v4 = vld [vmem:[#allocation16 + $0x760] ss:$24 sps:$4 sm:$0xff]  }
 0x7f4   : > { %9713 = vmatpush1.bf16.msra.mxu0 %v13225_v11  ;;  %9673 = vmatprep.subr.bf16.mxu1 %v13230_v61  ;;  %v9392_v11 = vrot.slane %v14668_v59, %v14392_v25  ;;  %v13305_v61 = vld [vmem:[#allocation16 + $0x734] ss:$24 sps:$4 sm:$0xff]   ;;  %v13308_v25 = vld [vmem:[#allocation16 + $0x704] ss:$24 sps:$4 sm:$0xff]  }
 0x7f5   : > { %9714 = vmatprep.subr.bf16.mxu0 %v13233_v12  ;;  %v9396_v12 = vrot.slane %v14668_v59, %v14360_v60 }
 0x7f7   : > { %9674 = vmatpush1.bf16.msra.mxu1 %v13228_v18 }
 0x7f8   : > { %9715 = vmatpush1.bf16.msra.mxu0 %v13231_v10  ;;  %9675 = vmatprep.subr.bf16.mxu1 %v13236_v45 }
 0x7f9   : > { %9716 = vmatprep.subr.bf16.mxu0 %v13239_v16  ;;  %v13303_v16 = vld [vmem:[#allocation16 + $0x730] ss:$24 sps:$4 sm:$0xff]  }
 0x7fb   : > { %9676 = vmatpush1.bf16.msra.mxu1 %v13234_v55 }
 0x7fc   : > { %9717 = vmatpush1.bf16.msra.mxu0 %v13237_v17  ;;  %9677 = vmatprep.subr.bf16.mxu1 %v13242_v9 }
 0x7fd   : > { %9718 = vmatprep.subr.bf16.mxu0 %v13245_v19 }
 0x7ff   : > { %9678 = vmatpush1.bf16.msra.mxu1 %v13240_v41 }
 0x800   : > { %9719 = vmatpush1.bf16.msra.mxu0 %v13243_v58  ;;  %9679 = vmatprep.subr.bf16.mxu1 %v13248_v46 }
 0x801   : > { %9720 = vmatprep.subr.bf16.mxu0 %v13251_v24  ;;  %v13311_v24 = vld [vmem:[#allocation16 + $0x6d4] ss:$24 sps:$4 sm:$0xff]  }
 0x803   : > { %9680 = vmatpush1.bf16.msra.mxu1 %v13246_v37  ;;  %v13309_v37 = vld [vmem:[#allocation16 + $0x6d0] ss:$24 sps:$4 sm:$0xff]  }
 0x804   : > { %9721 = vmatpush1.bf16.msra.mxu0 %v13249_v5  ;;  %9681 = vmatprep.subr.bf16.mxu1 %v13254_v30  ;;  %v13312_v5 = vld [vmem:[#allocation16 + $0x6a0] ss:$24 sps:$4 sm:$0xff]   ;;  %v13317_v30 = vld [vmem:[#allocation16 + $0x674] ss:$24 sps:$4 sm:$0xff]  }
 0x805   : > { %9722 = vmatprep.subr.bf16.mxu0 %v13257_v35  ;;  %v13315_v35 = vld [vmem:[#allocation16 + $0x670] ss:$24 sps:$4 sm:$0xff]  }
 0x807   : > { %9682 = vmatpush2.bf16.msra.mxu1 %v13252_v8  ;;  %v13320_v8 = vld [vmem:[#allocation16 + $0x644] ss:$24 sps:$4 sm:$0xff]  }
 0x808   : > { %9723 = vmatpush2.bf16.msra.mxu0 %v13255_v48  ;;  %9683 = vmatprep.subr.bf16.mxu1 %v13260_v44  ;;  %v13318_v48 = vld [vmem:[#allocation16 + $0x640] ss:$24 sps:$4 sm:$0xff]   ;;  %v13323_v44 = vld [vmem:[#allocation16 + $0x614] ss:$24 sps:$4 sm:$0xff]  }
 0x809   : > { %9724 = vmatprep.subr.bf16.mxu0 %v13263_v14  ;;  %v13321_v14 = vld [vmem:[#allocation16 + $0x610] ss:$24 sps:$4 sm:$0xff]  }
 0x80b   : > { %9684 = vmatpush2.bf16.msra.mxu1 %v13258_v49  ;;  %v13326_v49 = vld [vmem:[#allocation16 + $0x8e4] ss:$24 sps:$4 sm:$0xff]  }
 0x80c   : > { %9725 = vmatpush2.bf16.msra.mxu0 %v13261_v42  ;;  %9685 = vmatprep.subr.bf16.mxu1 %v13266_v52  ;;  %v13324_v42 = vld [vmem:[#allocation16 + $0x8e0] ss:$24 sps:$4 sm:$0xff]   ;;  %v13329_v52 = vld [vmem:[#allocation16 + $0x8b4] ss:$24 sps:$4 sm:$0xff]  }
 0x80d   : > { %9726 = vmatprep.subr.bf16.mxu0 %v13269_v29  ;;  %v13327_v29 = vld [vmem:[#allocation16 + $0x8b0] ss:$24 sps:$4 sm:$0xff]  }
 0x80f   : > { %9686 = vmatpush2.bf16.msra.mxu1 %v13264_v7  ;;  %v13332_v7 = vld [vmem:[#allocation16 + $0x884] ss:$24 sps:$4 sm:$0xff]  }
 0x810   : > { %9727 = vmatpush2.bf16.msra.mxu0 %v13267_v53  ;;  %9687 = vmatprep.subr.bf16.mxu1 %v13272_v63  ;;  %v13330_v53 = vld [vmem:[#allocation16 + $0x880] ss:$24 sps:$4 sm:$0xff]   ;;  %v13335_v63 = vld [vmem:[#allocation16 + $0x854] ss:$24 sps:$4 sm:$0xff]  }
 0x811   : > { %9728 = vmatprep.subr.bf16.mxu0 %v13275_v26  ;;  %v13333_v26 = vld [vmem:[#allocation16 + $0x850] ss:$24 sps:$4 sm:$0xff]  }
 0x813   : > { %9688 = vmatpush2.bf16.msra.mxu1 %v13270_v23  ;;  %v13338_v23 = vld [vmem:[#allocation16 + $0x824] ss:$24 sps:$4 sm:$0xff]  }
 0x814   : > { %9729 = vmatpush2.bf16.msra.mxu0 %v13273_v28  ;;  %9689 = vmatprep.subr.bf16.mxu1 %v13278_v20  ;;  %v13336_v28 = vld [vmem:[#allocation16 + $0x820] ss:$24 sps:$4 sm:$0xff]   ;;  %v13341_v20 = vld [vmem:[#allocation16 + $0x7f4] ss:$24 sps:$4 sm:$0xff]  }
 0x815   : > { %9730 = vmatprep.subr.bf16.mxu0 %v13281_v15  ;;  %v13339_v15 = vld [vmem:[#allocation16 + $0x7f0] ss:$24 sps:$4 sm:$0xff]  }
 0x817   : > { %9690 = vmatpush2.bf16.msra.mxu1 %v13276_v57  ;;  %v13344_v57 = vld [vmem:[#allocation16 + $0x7c4] ss:$24 sps:$4 sm:$0xff]  }
 0x818   : > { %9731 = vmatpush2.bf16.msra.mxu0 %v13279_v27  ;;  %9691 = vmatprep.subr.bf16.mxu1 %v13284_v31  ;;  %v13342_v27 = vld [vmem:[#allocation16 + $0x7c0] ss:$24 sps:$4 sm:$0xff]   ;;  %v13347_v31 = vld [vmem:[#allocation16 + $0x794] ss:$24 sps:$4 sm:$0xff]  }
 0x819   : > { %9732 = vmatprep.subr.bf16.mxu0 %v13287_v54  ;;  %v13345_v54 = vld [vmem:[#allocation16 + $0x790] ss:$24 sps:$4 sm:$0xff]  }
 0x81b   : > { %9692 = vmatpush2.bf16.msra.mxu1 %v13282_v36 }
 0x81c   : > { %9733 = vmatpush2.bf16.msra.mxu0 %v13285_v22  ;;  %9693 = vmatprep.subr.bf16.mxu1 %v13290_v56 }
 0x81d   : > { %9734 = vmatprep.subr.bf16.mxu0 %v13293_v40 }
 0x81f   : > { %9694 = vmatpush2.bf16.msra.mxu1 %v13288_v43 }
 0x820   : > { %9735 = vmatpush2.bf16.msra.mxu0 %v13291_v50  ;;  %9695 = vmatprep.subr.bf16.mxu1 %v13296_v3 }
 0x821   : > { %9736 = vmatprep.subr.bf16.mxu0 %v13299_v34 }
 0x823   : > { %9696 = vmatpush2.bf16.msra.mxu1 %v13294_v1 }
 0x824   : > { %9737 = vmatpush2.bf16.msra.mxu0 %v13297_v0  ;;  %9747 = vmatprep.subr.bf16.mxu1 %v13302_v2 }
 0x826   : > { %9698 = vmatmul.mubr.bf16.vlgmr.msra.gmra.mxu1 %v14644_v21  ;;  %v9453_v18 = vpop.f32.mrf.mxu1  ;;  %v9494_v10 = vpop.f32.mrf.mxu0  ;;  %v13306_v21 = vld [vmem:[#allocation16 + $0x700] ss:$24 sps:$4 sm:$0xff]  }
 0x827   : > { %9739 = vmatmul.mubr.bf16.vlgmr.msra.gmra.mxu0 %v14646_v38  ;;  %v9454_v45 = vadd.f32 %v9453_v18, %v9392_v11  ;;  %9748 = vmatpush1.bf16.msra.mxu1 %v13300_v4  ;;  %v9400_v4 = vrot.slane %v14668_v59, %v14363_v62  ;;  %v13873_v11 = vmov 1966171168  }
 0x828   : > { %9779 = vmatprep.mubr.bf16.mxu1 %v14652_v6  ;;  %v9455_v55 = vpop.f32.mrf.mxu1  ;;  %v9496_v17 = vpop.f32.mrf.mxu0  ;;  %9749 = vmatprep.subr.bf16.mxu1 %v13305_v61  ;;  %v13314_v6 = vld [vmem:[#allocation16 + $0x6a4] ss:$24 sps:$4 sm:$0xff]   ;;  %v9798_v61 = vunpack.c.l.s4 %v13873_v11 }
 0x829   : > { %v14677_v9 = vadd.f32 %v9494_v10, %v9454_v45  ;;  %v9456_v19 = vadd.f32 %v9455_v55, %v9396_v12  ;;  %v9404_v12 = vrot.slane %v14668_v59, %v14357_v39 }
 0x82a   : > { %v9457_v41 = vpop.f32.mrf.mxu1  ;;  %v9498_v60 = vpop.f32.mrf.mxu0  ;;  %v9799_v10 = vunpack.c.0.s8 %v9798_v61 }
 0x82b   : > { %v14679_v58 = vadd.f32 %v9496_v17, %v9456_v19  ;;  %9750 = vmatpush1.bf16.msra.mxu1 %v13303_v16 }
 0x82c   : > { %v9458_v46 = vpop.f32.mrf.mxu1  ;;  %v9499_v38 = vpop.f32.mrf.mxu0  ;;  %9751 = vmatprep.subr.bf16.mxu1 %v13308_v25  ;;  %v14689_v62 = vsub.s32 %v9799_v10, %v14351_v51 }
 0x82f   : > { %9752 = vmatpush1.bf16.msra.mxu1 %v13306_v21 }
 0x830   : > { %9753 = vmatprep.subr.bf16.mxu1 %v13311_v24 }
 0x833   : > { %9754 = vmatpush1.bf16.msra.mxu1 %v13309_v37 }
 0x834   : > { %9755 = vmatprep.subr.bf16.mxu1 %v13314_v6 }
 0x837   : > { %9756 = vmatpush1.bf16.msra.mxu1 %v13312_v5 }
 0x838   : > { %9757 = vmatprep.subr.bf16.mxu1 %v13317_v30 }
 0x83b   : > { %9758 = vmatpush1.bf16.msra.mxu1 %v13315_v35 }
 0x83c   : > { %9759 = vmatprep.subr.bf16.mxu1 %v13320_v8 }
 0x83f   : > { %9760 = vmatpush1.bf16.msra.mxu1 %v13318_v48 }
 0x840   : > { %9761 = vmatprep.subr.bf16.mxu1 %v13323_v44 }
 0x843   : > { %9762 = vmatpush1.bf16.msra.mxu1 %v13321_v14 }
 0x844   : > { %9763 = vmatprep.subr.bf16.mxu1 %v13326_v49 }
 0x847   : > { %9764 = vmatpush2.bf16.msra.mxu1 %v13324_v42 }
 0x848   : > { %9765 = vmatprep.subr.bf16.mxu1 %v13329_v52 }
 0x84b   : > { %9766 = vmatpush2.bf16.msra.mxu1 %v13327_v29 }
 0x84c   : > { %9767 = vmatprep.subr.bf16.mxu1 %v13332_v7 }
 0x84f   : > { %9768 = vmatpush2.bf16.msra.mxu1 %v13330_v53 }
 0x850   : > { %9769 = vmatprep.subr.bf16.mxu1 %v13335_v63 }
 0x853   : > { %9770 = vmatpush2.bf16.msra.mxu1 %v13333_v26 }
 0x854   : > { %9771 = vmatprep.subr.bf16.mxu1 %v13338_v23 }
 0x857   : > { %9772 = vmatpush2.bf16.msra.mxu1 %v13336_v28 }
 0x858   : > { %9773 = vmatprep.subr.bf16.mxu1 %v13341_v20 }
 0x85b   : > { %9774 = vmatpush2.bf16.msra.mxu1 %v13339_v15 }
 0x85c   : > { %9775 = vmatprep.subr.bf16.mxu1 %v13344_v57 }
 0x85f   : > { %9776 = vmatpush2.bf16.msra.mxu1 %v13342_v27 }
 0x860   : > { %9777 = vmatprep.subr.bf16.mxu1 %v13347_v31 }
 0x863   : > { %9778 = vmatpush2.bf16.msra.mxu1 %v13345_v54 }
 0x866   : > { %v9535_v36 = vpop.f32.mrf.mxu1  ;;  %v9576_v22 = vpop.f32.mrf.mxu0  ;;  %9780 = vmatmul.mubr.bf16.vlgmr.msra.gmra.mxu1 %v14658_v32 }
 0x867   : > { %v9536_v56 = vadd.f32 %v9535_v36, %v14677_v9  ;;  %v9577_v32 = vadd.f32 %v9576_v22, %v9400_v4 }
 0x868   : > { %v9537_v40 = vpop.f32.mrf.mxu1  ;;  %v9578_v43 = vpop.f32.mrf.mxu0 }
 0x869   : > { %v9538_v50 = vadd.f32 %v9537_v40, %v14679_v58  ;;  %v9579_v45 = vadd.f32 %v9578_v43, %v9404_v12 }
 0x86a   : > { %v9539_v3 = vpop.f32.mrf.mxu1  ;;  %v9580_v34 = vpop.f32.mrf.mxu0 }
 0x86b   : > { %v9794_v1 = vcombine.low %v9536_v56, %v9538_v50 }
 0x86c   : > { %v9540_v0 = vpop.f32.mrf.mxu1  ;;  %v9581_v2 = vpop.f32.mrf.mxu0 }
 0x86d   : > { %v9803_v38 = vrot.slane %v9794_v1, %v14689_v62 }
 0x8a6   : > { %v9617_v18 = vpop.f32.mrf.mxu1 }
 0x8a7   : > { %v9618_v16 = vadd.f32 %v9617_v18, %v9577_v32  ;;  %v9658_v55 = vpop.f32.mrf.mxu0 }
 0x8a8   : > { %v9619_v17 = vpop.f32.mrf.mxu1 }
 0x8a9   : > { %v9659_v25 = vadd.f32 %v9658_v55, %v9618_v16  ;;  %v9620_v9 = vadd.f32 %v9619_v17, %v9579_v45  ;;  %v9660_v19 = vpop.f32.mrf.mxu0 }
 0x8aa   : > { %v9621_v41 = vpop.f32.mrf.mxu1 }
 0x8ab   : > { %v9661_v60 = vadd.f32 %v9660_v19, %v9620_v9  ;;  %v9662_v39 = vpop.f32.mrf.mxu0 }
 0x8ac   : > { %v9622_v58 = vpop.f32.mrf.mxu1 }
 0x8ad   : > { %v9795_v21 = vcombine.low %v9659_v25, %v9661_v60  ;;  %v9663_v46 = vpop.f32.mrf.mxu0 }
 0x8af   : > { %v9810_v24 = vrot.slane %v9795_v21, %v14689_v62 }
 0x8b1   : > { %v9818_v37 = vcombine.low %v9803_v38, %v9810_v24 }
 0x8b2   : > { %13743 = shalt.err (!%p13740_p12)
}
 0x8b3   : > { %s13744_s27 = scalar_lea.hbm %s9870_s29, 16  ;;  %s13748_s2 = scalar_lea.hbm %s14826_s30, 32 }
 0x8b4   : > { %p13745_p0 = scmp.ne.s32.totalorder %s9870_s29, %s13744_s27  ;;  %p13749_p5 = scmp.lt.s32.totalorder %s9870_s29, %s14826_s30 }
 0x8b5   : > { %p13750_p13 = scmp.lt.s32.totalorder %s13748_s2, %s13744_s27 }
 0x8b6   : > { %p13746_p2 = pnand %p13745_p0, %p14827_p7 }
 0x8b7   : > { %p13751_p6 = por %p13750_p13, %p13749_p5 }
 0x8b8   : > { %p13747_p4 = pneg %p13746_p2 }
 0x8ba   : > { %p13752_p1 = pnand %p13751_p6, %p13747_p4 }
 0x8bc   : > { %13755 = shalt.err (!%p13752_p1)
}
 0x8bd   : > { %11495 = dma.vmem_to_hbm [thread:$0]  (%p14827_p7), %s9873_s14, 16, %s9870_s29, %s9846_s7   ;;  %v9408_v14 = vrot.slane %v14668_v59, %v14422_v13  ;;  %v9412_v49 = vrot.slane %v14668_v59, %v14397_v33  ;;  %v9825_v33 = vrot.slane %v9818_v37, %v14689_v62  ;;  %vm9837_vm5 = vcmp.lt.s32.totalorder %v2894_v47, 768 }
 0x8be   : > { %s11445_s14 = smul.u32 96, %s13977_s24  ;;  %s699_s29 = scalar_lea.vmem [#allocation23], %s11444_s12 }
 0x8bf   : > { %s9859_s7 = sshll.u32 %s699_s29, 4  ;;  %s14828_s6 = sld [smem:[#allocation45_spill]]  ;;  %s9860_s7 = int_to_ptr.vmem [resolvable:$true] %s9859_s7 }
 0x8c0   : > { %s9841_s27 = scalar_lea.sflag [#allocation4], %s14194_s0  ;;  %s13756_s4 = scalar_lea.vmem %s9860_s7, 96 }
 0x8c1   : > { %p13757_p3 = scmp.ne.s32.totalorder %s9860_s7, %s13756_s4  ;;  %s13875_s24 = smov [#allocation23]  }
 0x8c2   : > { %s13760_s12 = sshll.u32 %s13875_s24, 4  ;;  %s13761_s12 = int_to_ptr.vmem [resolvable:$false] %s13760_s12 }
 0x8c3   : > { %p13758_p9 = pnand %p13757_p3, %p14827_p7  ;;  %s13762_s5 = scalar_lea.vmem %s13761_s12, 192 }
 0x8c4   : > { %p13763_p10 = scmp.lt.s32.totalorder %s9860_s7, %s13761_s12  ;;  %p13764_p11 = scmp.lt.s32.totalorder %s13762_s5, %s13756_s4 }
 0x8c5   : > { %s9857_s22 = scalar_lea.hbm %s14828_s6, %s11445_s14  ;;  %p13759_p8 = pneg %p13758_p9 }
 0x8c6   : > { %p13765_p12 = por %p13764_p11, %p13763_p10 }
 0x8c8   : > { %p13766_p0 = pnand %p13765_p12, %p13759_p8 }
 0x8e6   : > { %v9699_v51 = vpop.f32.mrf.mxu1 }
 0x8e7   : > { %v9740_v6 = vpop.f32.mrf.mxu0  ;;  %v9700_v42 = vadd.f32 %v9699_v51, %v9408_v14 }
 0x8e8   : > { %v9701_v5 = vpop.f32.mrf.mxu1 }
 0x8e9   : > { %v9742_v30 = vpop.f32.mrf.mxu0  ;;  %v9702_v52 = vadd.f32 %v9701_v5, %v9412_v49  ;;  %v9741_v7 = vadd.f32 %v9740_v6, %v9700_v42 }
 0x8ea   : > { %v9703_v35 = vpop.f32.mrf.mxu1 }
 0x8eb   : > { %v9744_v8 = vpop.f32.mrf.mxu0  ;;  %v9743_v53 = vadd.f32 %v9742_v30, %v9702_v52 }
 0x8ec   : > { %v9704_v48 = vpop.f32.mrf.mxu1 }
 0x8ed   : > { %v9745_v44 = vpop.f32.mrf.mxu0 }
 0x926   : > { %v9781_v29 = vpop.f32.mrf.mxu1 }
 0x927   : > { %v9782_v26 = vadd.f32 %v9781_v29, %v9741_v7 }
 0x928   : > { %v9783_v63 = vpop.f32.mrf.mxu1 }
 0x929   : > { %v9784_v23 = vadd.f32 %v9783_v63, %v9743_v53 }
 0x92a   : > { %v9785_v28 = vpop.f32.mrf.mxu1 }
 0x92b   : > { %v9796_v20 = vcombine.low %v9782_v26, %v9784_v23 }
 0x92c   : > { %v9786_v15 = vpop.f32.mrf.mxu1 }
 0x92d   : > { %v9817_v57 = vrot.slane %v9796_v20, %v14689_v62 }
 0x92f   : > { %v9832_v13 = vrot.slane %v9817_v57, %v14689_v62 }
 0x931   : > { %v9833_v59 = vcombine.low %v9825_v33, %v9832_v13 }
 0x933   : > { %9839 = vst.msk [vmem:[%s699_s29] sm:$0x3f] %vm9837_vm5, %v9833_v59 }
 0x934   : > { %13769 = shalt.err (!%p13766_p0)
}
 0x935   : > { %s13770_s2 = scalar_lea.hbm %s9857_s22, 96  ;;  %s13774_s25 = scalar_lea.hbm %s14828_s6, 192 }
 0x936   : > { %p13771_p2 = scmp.ne.s32.totalorder %s9857_s22, %s13770_s2  ;;  %p13775_p13 = scmp.lt.s32.totalorder %s9857_s22, %s14828_s6 }
 0x937   : > { %p13776_p6 = scmp.lt.s32.totalorder %s13774_s25, %s13770_s2 }
 0x938   : > { %p13772_p4 = pnand %p13771_p2, %p14827_p7 }
 0x939   : > { %p13777_p1 = por %p13776_p6, %p13775_p13 }
 0x93a   : > { %p13773_p5 = pneg %p13772_p4 }
 0x93c   : > { %p13778_p3 = pnand %p13777_p1, %p13773_p5 }
 0x93e   : > { %13781 = shalt.err (!%p13778_p3)
}
 0x93f   : > { %11494 = dma.vmem_to_hbm [thread:$0]  (%p14827_p7), %s9860_s7, 96, %s9857_s22, %s9841_s27  }
 0x940 PF: > { %s9884_s16 = sand.u32 1, %s13840_s18   ;;  %p14829_p9 = scmp.ne.s32.totalorder %s14807_s17, 0 }
 0x941   : > { %p14830_p8 = scmp.ge.s32.totalorder %s13852_s21, 2  ;;  %s9885_s8 = scalar_lea.sflag [#allocation4], %s9884_s16 }
 0x943   : > { %p11540_p10 = pnand %p14830_p8, %p14829_p9 }
 0x945   : > { %p11541_p11 = pneg %p11540_p10 }
 0x947   : > { %13831 = dma.done.wait (%p11541_p11), %s9885_s8, 96  }
 0x948   : > { %13833 = vsyncadd (%p11541_p11), %s9885_s8, 4294967200  ;;  %s9894_s4 = scalar_lea.sflag [#allocation25], %s9884_s16 }
 0x949   : > { %13835 = dma.done.wait (%p11541_p11), %s9894_s4, 16  }
 0x94a   : > { %13837 = vsyncadd (%p11541_p11), %s9894_s4, 4294967280  ;;  %p40_p7 = scmp.ge.s32.totalorder %s14099_s28, 4   ;;  %s14831_s18 = smov %s13844_s19 }
 0x94b   : > { %s14832_s19 = smov %s13848_s20  ;;  %s14833_s20 = smov %s14111_s15 }
 0x94c   : > { %s14834_s21 = smov %s14099_s28  ;;  %42 = sbr.rel (!%p40_p7) target bundleno = 26 (0x1a), region = 195 }
 0x951   :  { %9898 = vsyncpa [#allocation3], 1 }
 0x952   :  { %9900 = vsyncpa [#allocation3 + $0x1], 1 }
 0x953   :  { %9901 = vsyncpa [#allocation6], 1 }
 0x954   :  { %9903 = vsyncpa [#allocation6 + $0x1], 1 }
 0x955   :  { %9904 = vsyncpa [#allocation9], 1 }
 0x956   :  { %9905 = vsyncpa [#allocation12], 1 }
 0x957   :  { %9906 = vsyncpa [#allocation15], 1 }
 0x958   :  { %9907 = vsyncpa [#allocation18], 1 }
 0x959   :  { %9908 = vsyncpa [#allocation21], 1 }
 0x95a   :  { %9909 = vsyncpa [#allocation4], 1 }
 0x95b   :  { %9911 = vsyncpa [#allocation4 + $0x1], 1 }
 0x95c   :  { %9912 = vsyncpa [#allocation25], 1 }
 0x95d   :  { %9914 = vsyncpa [#allocation25 + $0x1], 1 }

</bundles_post_ra>
